<compile_context>
chip_gen: v7x
topology: tpu7x:2x2x1
jax: 0.10.0
libtpu: 0.0.40
codegen_flags: <defaults>
</compile_context>

<pallas_src>
import jax
import jax.numpy as jnp
from jax.experimental import pallas as pl
from jax.experimental.pallas import tpu as pltpu


# ----------------------------------------------------------------------------
# Kernel: DMA-gather nBest embedding rows from HBM, then project to hidden.
# ----------------------------------------------------------------------------
def _make_embed_proj_kernel(tm, nbest, D, H, nlook):
    """Builds the kernel closure for fixed tile/shape constants."""

    def kernel(ids_ref, w_ref, b_ref, emb_hbm, o_ref, gbuf, sem):
        # ids_ref : (M*nbest,) int32 in SMEM (scalar prefetch)
        # w_ref   : (nbest*D, H) bf16 in VMEM (torch Linear weight, transposed)
        # b_ref   : (1, H) f32 in VMEM
        # emb_hbm : (V, D) f32, HBM-resident (pl.ANY) -- DMA gathered
        # o_ref   : (tm, H) f32 output tile
        # gbuf    : (nbest, tm, D) f32 VMEM gather scratch
        # sem     : (nlook,) DMA semaphores, one per pipeline slot
        base = pl.program_id(0) * (tm * nbest)

        def issue_row(r):
            # Start nbest row-gather DMAs for logical row r of this tile.
            slot = r & (nlook - 1)
            for n in range(nbest):
                tok = ids_ref[base + r * nbest + n]
                pltpu.make_async_copy(
                    emb_hbm.at[pl.ds(tok, 1), :],        # (1, D) source row
                    gbuf.at[n, pl.ds(r, 1), :],          # (1, D) destination
                    sem.at[slot],
                ).start()

        def wait_row(r):
            # Wait for this row's nbest completions on its own slot semaphore.
            # Descriptor names the consumed region so later gbuf reads stay
            # ordered after the wait.
            slot = r & (nlook - 1)
            for n in range(nbest):
                pltpu.make_async_copy(
                    emb_hbm.at[pl.ds(0, 1), :],
                    gbuf.at[n, pl.ds(r, 1), :],
                    sem.at[slot],
                ).wait()

        # Software-pipelined gather: keep `nlook` rows of DMAs in flight
        # (bounded queue occupancy, overlapped latency).  A slot is only
        # reissued after its previous occupant has been fully waited on.
        for r in range(nlook):                            # static prologue
            issue_row(r)

        @pl.loop(0, tm)
        def _(r):
            wait_row(r)

            @pl.when(r + nlook < tm)
            def _():
                issue_row(r + nlook)

        # Projection: Embedding(input_id).flatten(2) @ W + b, expressed as a
        # sum of per-slot matmuls so every operand/result is lane-dense (tm,H).
        acc = jnp.zeros((tm, H), jnp.float32)
        for n in range(nbest):
            acc = acc + jnp.dot(
                gbuf[n].astype(jnp.bfloat16),             # (tm, D) bf16
                w_ref[n * D:(n + 1) * D, :],              # (D, H) bf16
                preferred_element_type=jnp.float32,
            )
        o_ref[...] = (acc + b_ref[...]).astype(o_ref.dtype)

    return kernel


def nbest_embed_proj(input_id, emb_table, w_t, bias, *, tm=256, lookahead=8):
    """aligned = Emb(input_id); aligned = flatten(2); proj = Linear(aligned)."""
    B, L, nbest = input_id.shape
    V, D = emb_table.shape
    K, H = w_t.shape
    assert K == nbest * D
    assert H % 128 == 0, "hidden dim must be a multiple of 128 (lane-dense out)"
    assert D % 8 == 0, "align_embedding must be sublane-aligned"
    M = B * L
    tm = min(tm, M)
    # Prefer >=4 grid steps so both v7x TensorCores get work.
    while tm > 8 and (M % tm != 0 or M // tm < 4):
        tm //= 2
    assert M % tm == 0 and tm % 8 == 0

    nlook = max(1, min(lookahead, tm))
    nlook = 1 << (nlook.bit_length() - 1)                  # power of 2 for & mask

    ids_flat = input_id.reshape(M * nbest).astype(jnp.int32)   # SMEM prefetch
    emb_f32 = emb_table.astype(jnp.float32)                    # HBM-resident
    w_bf = w_t.astype(jnp.bfloat16)
    b2d = bias.reshape(1, H).astype(jnp.float32)

    # VMEM budget: double-buffered out tile + weight + bias + gather scratch.
    est = (2 * tm * H * 4) + (2 * K * H * 2) + (2 * H * 4) \
        + (nbest * tm * D * 4) + (1 << 20)
    vmem_limit = int(min(max(est, 32 * 2**20), 56 * 2**20))    # stay < v7x 64MiB

    kernel = _make_embed_proj_kernel(tm, nbest, D, H, nlook)

    out = pl.pallas_call(
        kernel,
        out_shape=jax.ShapeDtypeStruct((M, H), jnp.float32),
        grid_spec=pltpu.PrefetchScalarGridSpec(
            num_scalar_prefetch=1,
            grid=(M // tm,),
            in_specs=[
                pl.BlockSpec((K, H), lambda i, ids: (0, 0)),   # weight (const)
                pl.BlockSpec((1, H), lambda i, ids: (0, 0)),   # bias  (const)
                pl.BlockSpec(memory_space=pl.ANY),             # emb table, HBM
            ],
            out_specs=pl.BlockSpec((tm, H), lambda i, ids: (i, 0)),
            scratch_shapes=[
                pltpu.VMEM((nbest, tm, D), jnp.float32),       # gather buffer
                pltpu.SemaphoreType.DMA((nlook,)),             # per-slot sems
            ],
        ),
        compiler_params=pltpu.CompilerParams(
            dimension_semantics=("parallel",),
            vmem_limit_bytes=vmem_limit,
        ),
    )(ids_flat, w_bf, b2d, emb_f32)

    return out.reshape(B, L, H)


def mask_labels(labels):
    # labels[labels == 0] = -100
    # A single elementwise select is best left to XLA's fused select; a
    # dedicated pallas_call would be dominated by launch/DMA overhead.
    labels = labels.astype(jnp.int32)
    return jnp.where(labels == 0, jnp.int32(-100), labels)


# ----------------------------------------------------------------------------
# Deterministic synthetic parameters + demo / correctness check
# ----------------------------------------------------------------------------
if __name__ == "__main__":
    # Small shapes consistent with the module's forward
    # (real module: align_embedding=768, hidden=768, vocab~=50k).
    B, L, NBEST = 2, 64, 4
    D = 128            # align_embedding
    H = 256            # BART hidden size (multiple of 128 for lane-dense out)
    V = 512            # vocab size
    PAD = 0            # '[PAD]' id; nn.Embedding(padding_idx=PAD)

    key = jax.random.PRNGKey(0)
    k_ids, k_emb, k_w, k_b, k_lab = jax.random.split(key, 5)

    # Inputs (ids in-range; like torch, OOB ids are undefined behaviour).
    input_id = jax.random.randint(k_ids, (B, L, NBEST), 0, V, dtype=jnp.int32)
    attention_mask = jnp.ones((B, L), dtype=jnp.int32)   # consumed by BART only
    labels = jax.random.randint(k_lab, (B, L), 0, V, dtype=jnp.int32)

    # Parameters (nn.Embedding + nn.Linear shapes from __init__)
    emb_table = jax.random.normal(k_emb, (V, D), dtype=jnp.float32) * 0.02
    emb_table = emb_table.at[PAD].set(0.0)               # padding_idx row zeroed
    w = jax.random.normal(k_w, (H, NBEST * D), dtype=jnp.float32) * 0.02  # (out,in)
    w_t = jnp.asarray(w.T)                                # (nBest*D, H)
    bias = jax.random.normal(k_b, (H,), dtype=jnp.float32) * 0.02

    # Run the Pallas kernel
    proj_embedding = nbest_embed_proj(input_id, emb_table, w_t, bias)
    masked_labels = mask_labels(labels)
    jax.block_until_ready((proj_embedding, masked_labels))

    # Pure-JAX reference (same bf16 rounding, f32 accumulation)
    e = emb_table.astype(jnp.bfloat16)[input_id].astype(jnp.float32)
    ref_proj = (e.reshape(B, L, NBEST * D)
                @ w_t.astype(jnp.bfloat16).astype(jnp.float32)) + bias
    ref_lab = jnp.where(labels == 0, -100, labels)

    assert proj_embedding.shape == (B, L, H)
    assert jnp.allclose(proj_embedding, ref_proj, rtol=2e-2, atol=2e-2)
    assert jnp.array_equal(masked_labels, ref_lab)

    # TODO(synk): BartForConditionalGeneration loss / generate not reproduced.
    print("KERNEL_OK")
</pallas_src>

<mosaic_0001>
module attributes {stable_mosaic.version = 11 : i64} {
  func.func @kernel(%arg0: i32, %arg1: memref<512xi32, #tpu.memory_space<smem>>, %arg2: memref<512x256xbf16, #tpu.memory_space<vmem>>, %arg3: memref<1x256xf32, #tpu.memory_space<vmem>>, %arg4: memref<512x128xf32, #tpu.memory_space<any>>, %arg5: memref<32x256xf32, #tpu.memory_space<vmem>>, %arg6: memref<4x32x128xf32, #tpu.memory_space<vmem>>, %arg7: memref<8x!tpu.dma_semaphore, #tpu.memory_space<semaphore_mem>>) attributes {dimension_semantics = [#tpu.dimension_semantics<parallel>], iteration_bounds = array<i64: 4>, scalar_prefetch = 1 : i64, scratch_operands = 2 : i64, tpu.core_type = #tpu.core_type<tc>, window_params = [{pipeline_mode = #tpu.pipeline_mode<synchronous>, transform_indices = @transform_0, window_bounds = array<i64: 512, 256>}, {pipeline_mode = #tpu.pipeline_mode<synchronous>, transform_indices = @transform_1, window_bounds = array<i64: 1, 256>}, {}, {transform_indices = @transform_3, window_bounds = array<i64: 32, 256>}]} {
    %c128_i32 = arith.constant 128 : i32
    %0 = arith.muli %arg0, %c128_i32 : i32
    %c0_i32 = arith.constant 0 : i32
    %1 = arith.addi %0, %c0_i32 : i32
    %c0_i32_0 = arith.constant 0 : i32
    %2 = arith.addi %1, %c0_i32_0 : i32
    %3 = arith.index_cast %2 : i32 to index
    %4 = memref.load %arg1[%3] : memref<512xi32, #tpu.memory_space<smem>>
    %c0_i32_1 = arith.constant 0 : i32
    %c0_i32_2 = arith.constant 0 : i32
    %c0_i32_3 = arith.constant 0 : i32
    %5 = tpu.memref_slice %arg4[%4, %c0_i32_3] : memref<512x128xf32, #tpu.memory_space<any>> -> memref<1x128xf32, #tpu.memory_space<any>>
    %c0_i32_4 = arith.constant 0 : i32
    %c0_i32_5 = arith.constant 0 : i32
    %6 = tpu.memref_slice %arg6[%c0_i32_1, %c0_i32_4, %c0_i32_5] : memref<4x32x128xf32, #tpu.memory_space<vmem>> -> memref<1x1x128xf32, #tpu.memory_space<vmem>>
    %7 = tpu.memref_squeeze %6 : memref<1x1x128xf32, #tpu.memory_space<vmem>> -> memref<1x128xf32, #tpu.memory_space<vmem>>
    %8 = tpu.memref_slice %arg7[%c0_i32_2] : memref<8x!tpu.dma_semaphore, #tpu.memory_space<semaphore_mem>> -> memref<1x!tpu.dma_semaphore, #tpu.memory_space<semaphore_mem>>
    %9 = tpu.memref_squeeze %8 : memref<1x!tpu.dma_semaphore, #tpu.memory_space<semaphore_mem>> -> memref<!tpu.dma_semaphore, #tpu.memory_space<semaphore_mem>>
    tpu.enqueue_dma source(%5 : memref<1x128xf32, #tpu.memory_space<any>>) target(%7 : memref<1x128xf32, #tpu.memory_space<vmem>>) target_semaphore(%9 : memref<!tpu.dma_semaphore, #tpu.memory_space<semaphore_mem>>)
    %c0_i32_6 = arith.constant 0 : i32
    %10 = arith.addi %0, %c0_i32_6 : i32
    %c1_i32 = arith.constant 1 : i32
    %11 = arith.addi %10, %c1_i32 : i32
    %12 = arith.index_cast %11 : i32 to index
    %13 = memref.load %arg1[%12] : memref<512xi32, #tpu.memory_space<smem>>
    %c1_i32_7 = arith.constant 1 : i32
    %c0_i32_8 = arith.constant 0 : i32
    %c0_i32_9 = arith.constant 0 : i32
    %14 = tpu.memref_slice %arg4[%13, %c0_i32_9] : memref<512x128xf32, #tpu.memory_space<any>> -> memref<1x128xf32, #tpu.memory_space<any>>
    %c0_i32_10 = arith.constant 0 : i32
    %c0_i32_11 = arith.constant 0 : i32
    %15 = tpu.memref_slice %arg6[%c1_i32_7, %c0_i32_10, %c0_i32_11] : memref<4x32x128xf32, #tpu.memory_space<vmem>> -> memref<1x1x128xf32, #tpu.memory_space<vmem>>
    %16 = tpu.memref_squeeze %15 : memref<1x1x128xf32, #tpu.memory_space<vmem>> -> memref<1x128xf32, #tpu.memory_space<vmem>>
    %17 = tpu.memref_slice %arg7[%c0_i32_8] : memref<8x!tpu.dma_semaphore, #tpu.memory_space<semaphore_mem>> -> memref<1x!tpu.dma_semaphore, #tpu.memory_space<semaphore_mem>>
    %18 = tpu.memref_squeeze %17 : memref<1x!tpu.dma_semaphore, #tpu.memory_space<semaphore_mem>> -> memref<!tpu.dma_semaphore, #tpu.memory_space<semaphore_mem>>
    tpu.enqueue_dma source(%14 : memref<1x128xf32, #tpu.memory_space<any>>) target(%16 : memref<1x128xf32, #tpu.memory_space<vmem>>) target_semaphore(%18 : memref<!tpu.dma_semaphore, #tpu.memory_space<semaphore_mem>>)
    %c0_i32_12 = arith.constant 0 : i32
    %19 = arith.addi %0, %c0_i32_12 : i32
    %c2_i32 = arith.constant 2 : i32
    %20 = arith.addi %19, %c2_i32 : i32
    %21 = arith.index_cast %20 : i32 to index
    %22 = memref.load %arg1[%21] : memref<512xi32, #tpu.memory_space<smem>>
    %c2_i32_13 = arith.constant 2 : i32
    %c0_i32_14 = arith.constant 0 : i32
    %c0_i32_15 = arith.constant 0 : i32
    %23 = tpu.memref_slice %arg4[%22, %c0_i32_15] : memref<512x128xf32, #tpu.memory_space<any>> -> memref<1x128xf32, #tpu.memory_space<any>>
    %c0_i32_16 = arith.constant 0 : i32
    %c0_i32_17 = arith.constant 0 : i32
    %24 = tpu.memref_slice %arg6[%c2_i32_13, %c0_i32_16, %c0_i32_17] : memref<4x32x128xf32, #tpu.memory_space<vmem>> -> memref<1x1x128xf32, #tpu.memory_space<vmem>>
    %25 = tpu.memref_squeeze %24 : memref<1x1x128xf32, #tpu.memory_space<vmem>> -> memref<1x128xf32, #tpu.memory_space<vmem>>
    %26 = tpu.memref_slice %arg7[%c0_i32_14] : memref<8x!tpu.dma_semaphore, #tpu.memory_space<semaphore_mem>> -> memref<1x!tpu.dma_semaphore, #tpu.memory_space<semaphore_mem>>
    %27 = tpu.memref_squeeze %26 : memref<1x!tpu.dma_semaphore, #tpu.memory_space<semaphore_mem>> -> memref<!tpu.dma_semaphore, #tpu.memory_space<semaphore_mem>>
    tpu.enqueue_dma source(%23 : memref<1x128xf32, #tpu.memory_space<any>>) target(%25 : memref<1x128xf32, #tpu.memory_space<vmem>>) target_semaphore(%27 : memref<!tpu.dma_semaphore, #tpu.memory_space<semaphore_mem>>)
    %c0_i32_18 = arith.constant 0 : i32
    %28 = arith.addi %0, %c0_i32_18 : i32
    %c3_i32 = arith.constant 3 : i32
    %29 = arith.addi %28, %c3_i32 : i32
    %30 = arith.index_cast %29 : i32 to index
    %31 = memref.load %arg1[%30] : memref<512xi32, #tpu.memory_space<smem>>
    %c3_i32_19 = arith.constant 3 : i32
    %c0_i32_20 = arith.constant 0 : i32
    %c0_i32_21 = arith.constant 0 : i32
    %32 = tpu.memref_slice %arg4[%31, %c0_i32_21] : memref<512x128xf32, #tpu.memory_space<any>> -> memref<1x128xf32, #tpu.memory_space<any>>
    %c0_i32_22 = arith.constant 0 : i32
    %c0_i32_23 = arith.constant 0 : i32
    %33 = tpu.memref_slice %arg6[%c3_i32_19, %c0_i32_22, %c0_i32_23] : memref<4x32x128xf32, #tpu.memory_space<vmem>> -> memref<1x1x128xf32, #tpu.memory_space<vmem>>
    %34 = tpu.memref_squeeze %33 : memref<1x1x128xf32, #tpu.memory_space<vmem>> -> memref<1x128xf32, #tpu.memory_space<vmem>>
    %35 = tpu.memref_slice %arg7[%c0_i32_20] : memref<8x!tpu.dma_semaphore, #tpu.memory_space<semaphore_mem>> -> memref<1x!tpu.dma_semaphore, #tpu.memory_space<semaphore_mem>>
    %36 = tpu.memref_squeeze %35 : memref<1x!tpu.dma_semaphore, #tpu.memory_space<semaphore_mem>> -> memref<!tpu.dma_semaphore, #tpu.memory_space<semaphore_mem>>
    tpu.enqueue_dma source(%32 : memref<1x128xf32, #tpu.memory_space<any>>) target(%34 : memref<1x128xf32, #tpu.memory_space<vmem>>) target_semaphore(%36 : memref<!tpu.dma_semaphore, #tpu.memory_space<semaphore_mem>>)
    %c4_i32 = arith.constant 4 : i32
    %37 = arith.addi %0, %c4_i32 : i32
    %c0_i32_24 = arith.constant 0 : i32
    %38 = arith.addi %37, %c0_i32_24 : i32
    %39 = arith.index_cast %38 : i32 to index
    %40 = memref.load %arg1[%39] : memref<512xi32, #tpu.memory_space<smem>>
    %c0_i32_25 = arith.constant 0 : i32
    %c1_i32_26 = arith.constant 1 : i32
    %c0_i32_27 = arith.constant 0 : i32
    %41 = tpu.memref_slice %arg4[%40, %c0_i32_27] : memref<512x128xf32, #tpu.memory_space<any>> -> memref<1x128xf32, #tpu.memory_space<any>>
    %c1_i32_28 = arith.constant 1 : i32
    %c0_i32_29 = arith.constant 0 : i32
    %42 = tpu.memref_slice %arg6[%c0_i32_25, %c1_i32_28, %c0_i32_29] : memref<4x32x128xf32, #tpu.memory_space<vmem>> -> memref<1x1x128xf32, #tpu.memory_space<vmem>>
    %43 = tpu.memref_squeeze %42 : memref<1x1x128xf32, #tpu.memory_space<vmem>> -> memref<1x128xf32, #tpu.memory_space<vmem>>
    %44 = tpu.memref_slice %arg7[%c1_i32_26] : memref<8x!tpu.dma_semaphore, #tpu.memory_space<semaphore_mem>> -> memref<1x!tpu.dma_semaphore, #tpu.memory_space<semaphore_mem>>
    %45 = tpu.memref_squeeze %44 : memref<1x!tpu.dma_semaphore, #tpu.memory_space<semaphore_mem>> -> memref<!tpu.dma_semaphore, #tpu.memory_space<semaphore_mem>>
    tpu.enqueue_dma source(%41 : memref<1x128xf32, #tpu.memory_space<any>>) target(%43 : memref<1x128xf32, #tpu.memory_space<vmem>>) target_semaphore(%45 : memref<!tpu.dma_semaphore, #tpu.memory_space<semaphore_mem>>)
    %c4_i32_30 = arith.constant 4 : i32
    %46 = arith.addi %0, %c4_i32_30 : i32
    %c1_i32_31 = arith.constant 1 : i32
    %47 = arith.addi %46, %c1_i32_31 : i32
    %48 = arith.index_cast %47 : i32 to index
    %49 = memref.load %arg1[%48] : memref<512xi32, #tpu.memory_space<smem>>
    %c1_i32_32 = arith.constant 1 : i32
    %c1_i32_33 = arith.constant 1 : i32
    %c0_i32_34 = arith.constant 0 : i32
    %50 = tpu.memref_slice %arg4[%49, %c0_i32_34] : memref<512x128xf32, #tpu.memory_space<any>> -> memref<1x128xf32, #tpu.memory_space<any>>
    %c1_i32_35 = arith.constant 1 : i32
    %c0_i32_36 = arith.constant 0 : i32
    %51 = tpu.memref_slice %arg6[%c1_i32_32, %c1_i32_35, %c0_i32_36] : memref<4x32x128xf32, #tpu.memory_space<vmem>> -> memref<1x1x128xf32, #tpu.memory_space<vmem>>
    %52 = tpu.memref_squeeze %51 : memref<1x1x128xf32, #tpu.memory_space<vmem>> -> memref<1x128xf32, #tpu.memory_space<vmem>>
    %53 = tpu.memref_slice %arg7[%c1_i32_33] : memref<8x!tpu.dma_semaphore, #tpu.memory_space<semaphore_mem>> -> memref<1x!tpu.dma_semaphore, #tpu.memory_space<semaphore_mem>>
    %54 = tpu.memref_squeeze %53 : memref<1x!tpu.dma_semaphore, #tpu.memory_space<semaphore_mem>> -> memref<!tpu.dma_semaphore, #tpu.memory_space<semaphore_mem>>
    tpu.enqueue_dma source(%50 : memref<1x128xf32, #tpu.memory_space<any>>) target(%52 : memref<1x128xf32, #tpu.memory_space<vmem>>) target_semaphore(%54 : memref<!tpu.dma_semaphore, #tpu.memory_space<semaphore_mem>>)
    %c4_i32_37 = arith.constant 4 : i32
    %55 = arith.addi %0, %c4_i32_37 : i32
    %c2_i32_38 = arith.constant 2 : i32
    %56 = arith.addi %55, %c2_i32_38 : i32
    %57 = arith.index_cast %56 : i32 to index
    %58 = memref.load %arg1[%57] : memref<512xi32, #tpu.memory_space<smem>>
    %c2_i32_39 = arith.constant 2 : i32
    %c1_i32_40 = arith.constant 1 : i32
    %c0_i32_41 = arith.constant 0 : i32
    %59 = tpu.memref_slice %arg4[%58, %c0_i32_41] : memref<512x128xf32, #tpu.memory_space<any>> -> memref<1x128xf32, #tpu.memory_space<any>>
    %c1_i32_42 = arith.constant 1 : i32
    %c0_i32_43 = arith.constant 0 : i32
    %60 = tpu.memref_slice %arg6[%c2_i32_39, %c1_i32_42, %c0_i32_43] : memref<4x32x128xf32, #tpu.memory_space<vmem>> -> memref<1x1x128xf32, #tpu.memory_space<vmem>>
    %61 = tpu.memref_squeeze %60 : memref<1x1x128xf32, #tpu.memory_space<vmem>> -> memref<1x128xf32, #tpu.memory_space<vmem>>
    %62 = tpu.memref_slice %arg7[%c1_i32_40] : memref<8x!tpu.dma_semaphore, #tpu.memory_space<semaphore_mem>> -> memref<1x!tpu.dma_semaphore, #tpu.memory_space<semaphore_mem>>
    %63 = tpu.memref_squeeze %62 : memref<1x!tpu.dma_semaphore, #tpu.memory_space<semaphore_mem>> -> memref<!tpu.dma_semaphore, #tpu.memory_space<semaphore_mem>>
    tpu.enqueue_dma source(%59 : memref<1x128xf32, #tpu.memory_space<any>>) target(%61 : memref<1x128xf32, #tpu.memory_space<vmem>>) target_semaphore(%63 : memref<!tpu.dma_semaphore, #tpu.memory_space<semaphore_mem>>)
    %c4_i32_44 = arith.constant 4 : i32
    %64 = arith.addi %0, %c4_i32_44 : i32
    %c3_i32_45 = arith.constant 3 : i32
    %65 = arith.addi %64, %c3_i32_45 : i32
    %66 = arith.index_cast %65 : i32 to index
    %67 = memref.load %arg1[%66] : memref<512xi32, #tpu.memory_space<smem>>
    %c3_i32_46 = arith.constant 3 : i32
    %c1_i32_47 = arith.constant 1 : i32
    %c0_i32_48 = arith.constant 0 : i32
    %68 = tpu.memref_slice %arg4[%67, %c0_i32_48] : memref<512x128xf32, #tpu.memory_space<any>> -> memref<1x128xf32, #tpu.memory_space<any>>
    %c1_i32_49 = arith.constant 1 : i32
    %c0_i32_50 = arith.constant 0 : i32
    %69 = tpu.memref_slice %arg6[%c3_i32_46, %c1_i32_49, %c0_i32_50] : memref<4x32x128xf32, #tpu.memory_space<vmem>> -> memref<1x1x128xf32, #tpu.memory_space<vmem>>
    %70 = tpu.memref_squeeze %69 : memref<1x1x128xf32, #tpu.memory_space<vmem>> -> memref<1x128xf32, #tpu.memory_space<vmem>>
    %71 = tpu.memref_slice %arg7[%c1_i32_47] : memref<8x!tpu.dma_semaphore, #tpu.memory_space<semaphore_mem>> -> memref<1x!tpu.dma_semaphore, #tpu.memory_space<semaphore_mem>>
    %72 = tpu.memref_squeeze %71 : memref<1x!tpu.dma_semaphore, #tpu.memory_space<semaphore_mem>> -> memref<!tpu.dma_semaphore, #tpu.memory_space<semaphore_mem>>
    tpu.enqueue_dma source(%68 : memref<1x128xf32, #tpu.memory_space<any>>) target(%70 : memref<1x128xf32, #tpu.memory_space<vmem>>) target_semaphore(%72 : memref<!tpu.dma_semaphore, #tpu.memory_space<semaphore_mem>>)
    %c8_i32 = arith.constant 8 : i32
    %73 = arith.addi %0, %c8_i32 : i32
    %c0_i32_51 = arith.constant 0 : i32
    %74 = arith.addi %73, %c0_i32_51 : i32
    %75 = arith.index_cast %74 : i32 to index
    %76 = memref.load %arg1[%75] : memref<512xi32, #tpu.memory_space<smem>>
    %c0_i32_52 = arith.constant 0 : i32
    %c2_i32_53 = arith.constant 2 : i32
    %c0_i32_54 = arith.constant 0 : i32
    %77 = tpu.memref_slice %arg4[%76, %c0_i32_54] : memref<512x128xf32, #tpu.memory_space<any>> -> memref<1x128xf32, #tpu.memory_space<any>>
    %c2_i32_55 = arith.constant 2 : i32
    %c0_i32_56 = arith.constant 0 : i32
    %78 = tpu.memref_slice %arg6[%c0_i32_52, %c2_i32_55, %c0_i32_56] : memref<4x32x128xf32, #tpu.memory_space<vmem>> -> memref<1x1x128xf32, #tpu.memory_space<vmem>>
    %79 = tpu.memref_squeeze %78 : memref<1x1x128xf32, #tpu.memory_space<vmem>> -> memref<1x128xf32, #tpu.memory_space<vmem>>
    %80 = tpu.memref_slice %arg7[%c2_i32_53] : memref<8x!tpu.dma_semaphore, #tpu.memory_space<semaphore_mem>> -> memref<1x!tpu.dma_semaphore, #tpu.memory_space<semaphore_mem>>
    %81 = tpu.memref_squeeze %80 : memref<1x!tpu.dma_semaphore, #tpu.memory_space<semaphore_mem>> -> memref<!tpu.dma_semaphore, #tpu.memory_space<semaphore_mem>>
    tpu.enqueue_dma source(%77 : memref<1x128xf32, #tpu.memory_space<any>>) target(%79 : memref<1x128xf32, #tpu.memory_space<vmem>>) target_semaphore(%81 : memref<!tpu.dma_semaphore, #tpu.memory_space<semaphore_mem>>)
    %c8_i32_57 = arith.constant 8 : i32
    %82 = arith.addi %0, %c8_i32_57 : i32
    %c1_i32_58 = arith.constant 1 : i32
    %83 = arith.addi %82, %c1_i32_58 : i32
    %84 = arith.index_cast %83 : i32 to index
    %85 = memref.load %arg1[%84] : memref<512xi32, #tpu.memory_space<smem>>
    %c1_i32_59 = arith.constant 1 : i32
    %c2_i32_60 = arith.constant 2 : i32
    %c0_i32_61 = arith.constant 0 : i32
    %86 = tpu.memref_slice %arg4[%85, %c0_i32_61] : memref<512x128xf32, #tpu.memory_space<any>> -> memref<1x128xf32, #tpu.memory_space<any>>
    %c2_i32_62 = arith.constant 2 : i32
    %c0_i32_63 = arith.constant 0 : i32
    %87 = tpu.memref_slice %arg6[%c1_i32_59, %c2_i32_62, %c0_i32_63] : memref<4x32x128xf32, #tpu.memory_space<vmem>> -> memref<1x1x128xf32, #tpu.memory_space<vmem>>
    %88 = tpu.memref_squeeze %87 : memref<1x1x128xf32, #tpu.memory_space<vmem>> -> memref<1x128xf32, #tpu.memory_space<vmem>>
    %89 = tpu.memref_slice %arg7[%c2_i32_60] : memref<8x!tpu.dma_semaphore, #tpu.memory_space<semaphore_mem>> -> memref<1x!tpu.dma_semaphore, #tpu.memory_space<semaphore_mem>>
    %90 = tpu.memref_squeeze %89 : memref<1x!tpu.dma_semaphore, #tpu.memory_space<semaphore_mem>> -> memref<!tpu.dma_semaphore, #tpu.memory_space<semaphore_mem>>
    tpu.enqueue_dma source(%86 : memref<1x128xf32, #tpu.memory_space<any>>) target(%88 : memref<1x128xf32, #tpu.memory_space<vmem>>) target_semaphore(%90 : memref<!tpu.dma_semaphore, #tpu.memory_space<semaphore_mem>>)
    %c8_i32_64 = arith.constant 8 : i32
    %91 = arith.addi %0, %c8_i32_64 : i32
    %c2_i32_65 = arith.constant 2 : i32
    %92 = arith.addi %91, %c2_i32_65 : i32
    %93 = arith.index_cast %92 : i32 to index
    %94 = memref.load %arg1[%93] : memref<512xi32, #tpu.memory_space<smem>>
    %c2_i32_66 = arith.constant 2 : i32
    %c2_i32_67 = arith.constant 2 : i32
    %c0_i32_68 = arith.constant 0 : i32
    %95 = tpu.memref_slice %arg4[%94, %c0_i32_68] : memref<512x128xf32, #tpu.memory_space<any>> -> memref<1x128xf32, #tpu.memory_space<any>>
    %c2_i32_69 = arith.constant 2 : i32
    %c0_i32_70 = arith.constant 0 : i32
    %96 = tpu.memref_slice %arg6[%c2_i32_66, %c2_i32_69, %c0_i32_70] : memref<4x32x128xf32, #tpu.memory_space<vmem>> -> memref<1x1x128xf32, #tpu.memory_space<vmem>>
    %97 = tpu.memref_squeeze %96 : memref<1x1x128xf32, #tpu.memory_space<vmem>> -> memref<1x128xf32, #tpu.memory_space<vmem>>
    %98 = tpu.memref_slice %arg7[%c2_i32_67] : memref<8x!tpu.dma_semaphore, #tpu.memory_space<semaphore_mem>> -> memref<1x!tpu.dma_semaphore, #tpu.memory_space<semaphore_mem>>
    %99 = tpu.memref_squeeze %98 : memref<1x!tpu.dma_semaphore, #tpu.memory_space<semaphore_mem>> -> memref<!tpu.dma_semaphore, #tpu.memory_space<semaphore_mem>>
    tpu.enqueue_dma source(%95 : memref<1x128xf32, #tpu.memory_space<any>>) target(%97 : memref<1x128xf32, #tpu.memory_space<vmem>>) target_semaphore(%99 : memref<!tpu.dma_semaphore, #tpu.memory_space<semaphore_mem>>)
    %c8_i32_71 = arith.constant 8 : i32
    %100 = arith.addi %0, %c8_i32_71 : i32
    %c3_i32_72 = arith.constant 3 : i32
    %101 = arith.addi %100, %c3_i32_72 : i32
    %102 = arith.index_cast %101 : i32 to index
    %103 = memref.load %arg1[%102] : memref<512xi32, #tpu.memory_space<smem>>
    %c3_i32_73 = arith.constant 3 : i32
    %c2_i32_74 = arith.constant 2 : i32
    %c0_i32_75 = arith.constant 0 : i32
    %104 = tpu.memref_slice %arg4[%103, %c0_i32_75] : memref<512x128xf32, #tpu.memory_space<any>> -> memref<1x128xf32, #tpu.memory_space<any>>
    %c2_i32_76 = arith.constant 2 : i32
    %c0_i32_77 = arith.constant 0 : i32
    %105 = tpu.memref_slice %arg6[%c3_i32_73, %c2_i32_76, %c0_i32_77] : memref<4x32x128xf32, #tpu.memory_space<vmem>> -> memref<1x1x128xf32, #tpu.memory_space<vmem>>
    %106 = tpu.memref_squeeze %105 : memref<1x1x128xf32, #tpu.memory_space<vmem>> -> memref<1x128xf32, #tpu.memory_space<vmem>>
    %107 = tpu.memref_slice %arg7[%c2_i32_74] : memref<8x!tpu.dma_semaphore, #tpu.memory_space<semaphore_mem>> -> memref<1x!tpu.dma_semaphore, #tpu.memory_space<semaphore_mem>>
    %108 = tpu.memref_squeeze %107 : memref<1x!tpu.dma_semaphore, #tpu.memory_space<semaphore_mem>> -> memref<!tpu.dma_semaphore, #tpu.memory_space<semaphore_mem>>
    tpu.enqueue_dma source(%104 : memref<1x128xf32, #tpu.memory_space<any>>) target(%106 : memref<1x128xf32, #tpu.memory_space<vmem>>) target_semaphore(%108 : memref<!tpu.dma_semaphore, #tpu.memory_space<semaphore_mem>>)
    %c12_i32 = arith.constant 12 : i32
    %109 = arith.addi %0, %c12_i32 : i32
    %c0_i32_78 = arith.constant 0 : i32
    %110 = arith.addi %109, %c0_i32_78 : i32
    %111 = arith.index_cast %110 : i32 to index
    %112 = memref.load %arg1[%111] : memref<512xi32, #tpu.memory_space<smem>>
    %c0_i32_79 = arith.constant 0 : i32
    %c3_i32_80 = arith.constant 3 : i32
    %c0_i32_81 = arith.constant 0 : i32
    %113 = tpu.memref_slice %arg4[%112, %c0_i32_81] : memref<512x128xf32, #tpu.memory_space<any>> -> memref<1x128xf32, #tpu.memory_space<any>>
    %c3_i32_82 = arith.constant 3 : i32
    %c0_i32_83 = arith.constant 0 : i32
    %114 = tpu.memref_slice %arg6[%c0_i32_79, %c3_i32_82, %c0_i32_83] : memref<4x32x128xf32, #tpu.memory_space<vmem>> -> memref<1x1x128xf32, #tpu.memory_space<vmem>>
    %115 = tpu.memref_squeeze %114 : memref<1x1x128xf32, #tpu.memory_space<vmem>> -> memref<1x128xf32, #tpu.memory_space<vmem>>
    %116 = tpu.memref_slice %arg7[%c3_i32_80] : memref<8x!tpu.dma_semaphore, #tpu.memory_space<semaphore_mem>> -> memref<1x!tpu.dma_semaphore, #tpu.memory_space<semaphore_mem>>
    %117 = tpu.memref_squeeze %116 : memref<1x!tpu.dma_semaphore, #tpu.memory_space<semaphore_mem>> -> memref<!tpu.dma_semaphore, #tpu.memory_space<semaphore_mem>>
    tpu.enqueue_dma source(%113 : memref<1x128xf32, #tpu.memory_space<any>>) target(%115 : memref<1x128xf32, #tpu.memory_space<vmem>>) target_semaphore(%117 : memref<!tpu.dma_semaphore, #tpu.memory_space<semaphore_mem>>)
    %c12_i32_84 = arith.constant 12 : i32
    %118 = arith.addi %0, %c12_i32_84 : i32
    %c1_i32_85 = arith.constant 1 : i32
    %119 = arith.addi %118, %c1_i32_85 : i32
    %120 = arith.index_cast %119 : i32 to index
    %121 = memref.load %arg1[%120] : memref<512xi32, #tpu.memory_space<smem>>
    %c1_i32_86 = arith.constant 1 : i32
    %c3_i32_87 = arith.constant 3 : i32
    %c0_i32_88 = arith.constant 0 : i32
    %122 = tpu.memref_slice %arg4[%121, %c0_i32_88] : memref<512x128xf32, #tpu.memory_space<any>> -> memref<1x128xf32, #tpu.memory_space<any>>
    %c3_i32_89 = arith.constant 3 : i32
    %c0_i32_90 = arith.constant 0 : i32
    %123 = tpu.memref_slice %arg6[%c1_i32_86, %c3_i32_89, %c0_i32_90] : memref<4x32x128xf32, #tpu.memory_space<vmem>> -> memref<1x1x128xf32, #tpu.memory_space<vmem>>
    %124 = tpu.memref_squeeze %123 : memref<1x1x128xf32, #tpu.memory_space<vmem>> -> memref<1x128xf32, #tpu.memory_space<vmem>>
    %125 = tpu.memref_slice %arg7[%c3_i32_87] : memref<8x!tpu.dma_semaphore, #tpu.memory_space<semaphore_mem>> -> memref<1x!tpu.dma_semaphore, #tpu.memory_space<semaphore_mem>>
    %126 = tpu.memref_squeeze %125 : memref<1x!tpu.dma_semaphore, #tpu.memory_space<semaphore_mem>> -> memref<!tpu.dma_semaphore, #tpu.memory_space<semaphore_mem>>
    tpu.enqueue_dma source(%122 : memref<1x128xf32, #tpu.memory_space<any>>) target(%124 : memref<1x128xf32, #tpu.memory_space<vmem>>) target_semaphore(%126 : memref<!tpu.dma_semaphore, #tpu.memory_space<semaphore_mem>>)
    %c12_i32_91 = arith.constant 12 : i32
    %127 = arith.addi %0, %c12_i32_91 : i32
    %c2_i32_92 = arith.constant 2 : i32
    %128 = arith.addi %127, %c2_i32_92 : i32
    %129 = arith.index_cast %128 : i32 to index
    %130 = memref.load %arg1[%129] : memref<512xi32, #tpu.memory_space<smem>>
    %c2_i32_93 = arith.constant 2 : i32
    %c3_i32_94 = arith.constant 3 : i32
    %c0_i32_95 = arith.constant 0 : i32
    %131 = tpu.memref_slice %arg4[%130, %c0_i32_95] : memref<512x128xf32, #tpu.memory_space<any>> -> memref<1x128xf32, #tpu.memory_space<any>>
    %c3_i32_96 = arith.constant 3 : i32
    %c0_i32_97 = arith.constant 0 : i32
    %132 = tpu.memref_slice %arg6[%c2_i32_93, %c3_i32_96, %c0_i32_97] : memref<4x32x128xf32, #tpu.memory_space<vmem>> -> memref<1x1x128xf32, #tpu.memory_space<vmem>>
    %133 = tpu.memref_squeeze %132 : memref<1x1x128xf32, #tpu.memory_space<vmem>> -> memref<1x128xf32, #tpu.memory_space<vmem>>
    %134 = tpu.memref_slice %arg7[%c3_i32_94] : memref<8x!tpu.dma_semaphore, #tpu.memory_space<semaphore_mem>> -> memref<1x!tpu.dma_semaphore, #tpu.memory_space<semaphore_mem>>
    %135 = tpu.memref_squeeze %134 : memref<1x!tpu.dma_semaphore, #tpu.memory_space<semaphore_mem>> -> memref<!tpu.dma_semaphore, #tpu.memory_space<semaphore_mem>>
    tpu.enqueue_dma source(%131 : memref<1x128xf32, #tpu.memory_space<any>>) target(%133 : memref<1x128xf32, #tpu.memory_space<vmem>>) target_semaphore(%135 : memref<!tpu.dma_semaphore, #tpu.memory_space<semaphore_mem>>)
    %c12_i32_98 = arith.constant 12 : i32
    %136 = arith.addi %0, %c12_i32_98 : i32
    %c3_i32_99 = arith.constant 3 : i32
    %137 = arith.addi %136, %c3_i32_99 : i32
    %138 = arith.index_cast %137 : i32 to index
    %139 = memref.load %arg1[%138] : memref<512xi32, #tpu.memory_space<smem>>
    %c3_i32_100 = arith.constant 3 : i32
    %c3_i32_101 = arith.constant 3 : i32
    %c0_i32_102 = arith.constant 0 : i32
    %140 = tpu.memref_slice %arg4[%139, %c0_i32_102] : memref<512x128xf32, #tpu.memory_space<any>> -> memref<1x128xf32, #tpu.memory_space<any>>
    %c3_i32_103 = arith.constant 3 : i32
    %c0_i32_104 = arith.constant 0 : i32
    %141 = tpu.memref_slice %arg6[%c3_i32_100, %c3_i32_103, %c0_i32_104] : memref<4x32x128xf32, #tpu.memory_space<vmem>> -> memref<1x1x128xf32, #tpu.memory_space<vmem>>
    %142 = tpu.memref_squeeze %141 : memref<1x1x128xf32, #tpu.memory_space<vmem>> -> memref<1x128xf32, #tpu.memory_space<vmem>>
    %143 = tpu.memref_slice %arg7[%c3_i32_101] : memref<8x!tpu.dma_semaphore, #tpu.memory_space<semaphore_mem>> -> memref<1x!tpu.dma_semaphore, #tpu.memory_space<semaphore_mem>>
    %144 = tpu.memref_squeeze %143 : memref<1x!tpu.dma_semaphore, #tpu.memory_space<semaphore_mem>> -> memref<!tpu.dma_semaphore, #tpu.memory_space<semaphore_mem>>
    tpu.enqueue_dma source(%140 : memref<1x128xf32, #tpu.memory_space<any>>) target(%142 : memref<1x128xf32, #tpu.memory_space<vmem>>) target_semaphore(%144 : memref<!tpu.dma_semaphore, #tpu.memory_space<semaphore_mem>>)
    %c16_i32 = arith.constant 16 : i32
    %145 = arith.addi %0, %c16_i32 : i32
    %c0_i32_105 = arith.constant 0 : i32
    %146 = arith.addi %145, %c0_i32_105 : i32
    %147 = arith.index_cast %146 : i32 to index
    %148 = memref.load %arg1[%147] : memref<512xi32, #tpu.memory_space<smem>>
    %c0_i32_106 = arith.constant 0 : i32
    %c4_i32_107 = arith.constant 4 : i32
    %c0_i32_108 = arith.constant 0 : i32
    %149 = tpu.memref_slice %arg4[%148, %c0_i32_108] : memref<512x128xf32, #tpu.memory_space<any>> -> memref<1x128xf32, #tpu.memory_space<any>>
    %c4_i32_109 = arith.constant 4 : i32
    %c0_i32_110 = arith.constant 0 : i32
    %150 = tpu.memref_slice %arg6[%c0_i32_106, %c4_i32_109, %c0_i32_110] : memref<4x32x128xf32, #tpu.memory_space<vmem>> -> memref<1x1x128xf32, #tpu.memory_space<vmem>>
    %151 = tpu.memref_squeeze %150 : memref<1x1x128xf32, #tpu.memory_space<vmem>> -> memref<1x128xf32, #tpu.memory_space<vmem>>
    %152 = tpu.memref_slice %arg7[%c4_i32_107] : memref<8x!tpu.dma_semaphore, #tpu.memory_space<semaphore_mem>> -> memref<1x!tpu.dma_semaphore, #tpu.memory_space<semaphore_mem>>
    %153 = tpu.memref_squeeze %152 : memref<1x!tpu.dma_semaphore, #tpu.memory_space<semaphore_mem>> -> memref<!tpu.dma_semaphore, #tpu.memory_space<semaphore_mem>>
    tpu.enqueue_dma source(%149 : memref<1x128xf32, #tpu.memory_space<any>>) target(%151 : memref<1x128xf32, #tpu.memory_space<vmem>>) target_semaphore(%153 : memref<!tpu.dma_semaphore, #tpu.memory_space<semaphore_mem>>)
    %c16_i32_111 = arith.constant 16 : i32
    %154 = arith.addi %0, %c16_i32_111 : i32
    %c1_i32_112 = arith.constant 1 : i32
    %155 = arith.addi %154, %c1_i32_112 : i32
    %156 = arith.index_cast %155 : i32 to index
    %157 = memref.load %arg1[%156] : memref<512xi32, #tpu.memory_space<smem>>
    %c1_i32_113 = arith.constant 1 : i32
    %c4_i32_114 = arith.constant 4 : i32
    %c0_i32_115 = arith.constant 0 : i32
    %158 = tpu.memref_slice %arg4[%157, %c0_i32_115] : memref<512x128xf32, #tpu.memory_space<any>> -> memref<1x128xf32, #tpu.memory_space<any>>
    %c4_i32_116 = arith.constant 4 : i32
    %c0_i32_117 = arith.constant 0 : i32
    %159 = tpu.memref_slice %arg6[%c1_i32_113, %c4_i32_116, %c0_i32_117] : memref<4x32x128xf32, #tpu.memory_space<vmem>> -> memref<1x1x128xf32, #tpu.memory_space<vmem>>
    %160 = tpu.memref_squeeze %159 : memref<1x1x128xf32, #tpu.memory_space<vmem>> -> memref<1x128xf32, #tpu.memory_space<vmem>>
    %161 = tpu.memref_slice %arg7[%c4_i32_114] : memref<8x!tpu.dma_semaphore, #tpu.memory_space<semaphore_mem>> -> memref<1x!tpu.dma_semaphore, #tpu.memory_space<semaphore_mem>>
    %162 = tpu.memref_squeeze %161 : memref<1x!tpu.dma_semaphore, #tpu.memory_space<semaphore_mem>> -> memref<!tpu.dma_semaphore, #tpu.memory_space<semaphore_mem>>
    tpu.enqueue_dma source(%158 : memref<1x128xf32, #tpu.memory_space<any>>) target(%160 : memref<1x128xf32, #tpu.memory_space<vmem>>) target_semaphore(%162 : memref<!tpu.dma_semaphore, #tpu.memory_space<semaphore_mem>>)
    %c16_i32_118 = arith.constant 16 : i32
    %163 = arith.addi %0, %c16_i32_118 : i32
    %c2_i32_119 = arith.constant 2 : i32
    %164 = arith.addi %163, %c2_i32_119 : i32
    %165 = arith.index_cast %164 : i32 to index
    %166 = memref.load %arg1[%165] : memref<512xi32, #tpu.memory_space<smem>>
    %c2_i32_120 = arith.constant 2 : i32
    %c4_i32_121 = arith.constant 4 : i32
    %c0_i32_122 = arith.constant 0 : i32
    %167 = tpu.memref_slice %arg4[%166, %c0_i32_122] : memref<512x128xf32, #tpu.memory_space<any>> -> memref<1x128xf32, #tpu.memory_space<any>>
    %c4_i32_123 = arith.constant 4 : i32
    %c0_i32_124 = arith.constant 0 : i32
    %168 = tpu.memref_slice %arg6[%c2_i32_120, %c4_i32_123, %c0_i32_124] : memref<4x32x128xf32, #tpu.memory_space<vmem>> -> memref<1x1x128xf32, #tpu.memory_space<vmem>>
    %169 = tpu.memref_squeeze %168 : memref<1x1x128xf32, #tpu.memory_space<vmem>> -> memref<1x128xf32, #tpu.memory_space<vmem>>
    %170 = tpu.memref_slice %arg7[%c4_i32_121] : memref<8x!tpu.dma_semaphore, #tpu.memory_space<semaphore_mem>> -> memref<1x!tpu.dma_semaphore, #tpu.memory_space<semaphore_mem>>
    %171 = tpu.memref_squeeze %170 : memref<1x!tpu.dma_semaphore, #tpu.memory_space<semaphore_mem>> -> memref<!tpu.dma_semaphore, #tpu.memory_space<semaphore_mem>>
    tpu.enqueue_dma source(%167 : memref<1x128xf32, #tpu.memory_space<any>>) target(%169 : memref<1x128xf32, #tpu.memory_space<vmem>>) target_semaphore(%171 : memref<!tpu.dma_semaphore, #tpu.memory_space<semaphore_mem>>)
    %c16_i32_125 = arith.constant 16 : i32
    %172 = arith.addi %0, %c16_i32_125 : i32
    %c3_i32_126 = arith.constant 3 : i32
    %173 = arith.addi %172, %c3_i32_126 : i32
    %174 = arith.index_cast %173 : i32 to index
    %175 = memref.load %arg1[%174] : memref<512xi32, #tpu.memory_space<smem>>
    %c3_i32_127 = arith.constant 3 : i32
    %c4_i32_128 = arith.constant 4 : i32
    %c0_i32_129 = arith.constant 0 : i32
    %176 = tpu.memref_slice %arg4[%175, %c0_i32_129] : memref<512x128xf32, #tpu.memory_space<any>> -> memref<1x128xf32, #tpu.memory_space<any>>
    %c4_i32_130 = arith.constant 4 : i32
    %c0_i32_131 = arith.constant 0 : i32
    %177 = tpu.memref_slice %arg6[%c3_i32_127, %c4_i32_130, %c0_i32_131] : memref<4x32x128xf32, #tpu.memory_space<vmem>> -> memref<1x1x128xf32, #tpu.memory_space<vmem>>
    %178 = tpu.memref_squeeze %177 : memref<1x1x128xf32, #tpu.memory_space<vmem>> -> memref<1x128xf32, #tpu.memory_space<vmem>>
    %179 = tpu.memref_slice %arg7[%c4_i32_128] : memref<8x!tpu.dma_semaphore, #tpu.memory_space<semaphore_mem>> -> memref<1x!tpu.dma_semaphore, #tpu.memory_space<semaphore_mem>>
    %180 = tpu.memref_squeeze %179 : memref<1x!tpu.dma_semaphore, #tpu.memory_space<semaphore_mem>> -> memref<!tpu.dma_semaphore, #tpu.memory_space<semaphore_mem>>
    tpu.enqueue_dma source(%176 : memref<1x128xf32, #tpu.memory_space<any>>) target(%178 : memref<1x128xf32, #tpu.memory_space<vmem>>) target_semaphore(%180 : memref<!tpu.dma_semaphore, #tpu.memory_space<semaphore_mem>>)
    %c20_i32 = arith.constant 20 : i32
    %181 = arith.addi %0, %c20_i32 : i32
    %c0_i32_132 = arith.constant 0 : i32
    %182 = arith.addi %181, %c0_i32_132 : i32
    %183 = arith.index_cast %182 : i32 to index
    %184 = memref.load %arg1[%183] : memref<512xi32, #tpu.memory_space<smem>>
    %c0_i32_133 = arith.constant 0 : i32
    %c5_i32 = arith.constant 5 : i32
    %c0_i32_134 = arith.constant 0 : i32
    %185 = tpu.memref_slice %arg4[%184, %c0_i32_134] : memref<512x128xf32, #tpu.memory_space<any>> -> memref<1x128xf32, #tpu.memory_space<any>>
    %c5_i32_135 = arith.constant 5 : i32
    %c0_i32_136 = arith.constant 0 : i32
    %186 = tpu.memref_slice %arg6[%c0_i32_133, %c5_i32_135, %c0_i32_136] : memref<4x32x128xf32, #tpu.memory_space<vmem>> -> memref<1x1x128xf32, #tpu.memory_space<vmem>>
    %187 = tpu.memref_squeeze %186 : memref<1x1x128xf32, #tpu.memory_space<vmem>> -> memref<1x128xf32, #tpu.memory_space<vmem>>
    %188 = tpu.memref_slice %arg7[%c5_i32] : memref<8x!tpu.dma_semaphore, #tpu.memory_space<semaphore_mem>> -> memref<1x!tpu.dma_semaphore, #tpu.memory_space<semaphore_mem>>
    %189 = tpu.memref_squeeze %188 : memref<1x!tpu.dma_semaphore, #tpu.memory_space<semaphore_mem>> -> memref<!tpu.dma_semaphore, #tpu.memory_space<semaphore_mem>>
    tpu.enqueue_dma source(%185 : memref<1x128xf32, #tpu.memory_space<any>>) target(%187 : memref<1x128xf32, #tpu.memory_space<vmem>>) target_semaphore(%189 : memref<!tpu.dma_semaphore, #tpu.memory_space<semaphore_mem>>)
    %c20_i32_137 = arith.constant 20 : i32
    %190 = arith.addi %0, %c20_i32_137 : i32
    %c1_i32_138 = arith.constant 1 : i32
    %191 = arith.addi %190, %c1_i32_138 : i32
    %192 = arith.index_cast %191 : i32 to index
    %193 = memref.load %arg1[%192] : memref<512xi32, #tpu.memory_space<smem>>
    %c1_i32_139 = arith.constant 1 : i32
    %c5_i32_140 = arith.constant 5 : i32
    %c0_i32_141 = arith.constant 0 : i32
    %194 = tpu.memref_slice %arg4[%193, %c0_i32_141] : memref<512x128xf32, #tpu.memory_space<any>> -> memref<1x128xf32, #tpu.memory_space<any>>
    %c5_i32_142 = arith.constant 5 : i32
    %c0_i32_143 = arith.constant 0 : i32
    %195 = tpu.memref_slice %arg6[%c1_i32_139, %c5_i32_142, %c0_i32_143] : memref<4x32x128xf32, #tpu.memory_space<vmem>> -> memref<1x1x128xf32, #tpu.memory_space<vmem>>
    %196 = tpu.memref_squeeze %195 : memref<1x1x128xf32, #tpu.memory_space<vmem>> -> memref<1x128xf32, #tpu.memory_space<vmem>>
    %197 = tpu.memref_slice %arg7[%c5_i32_140] : memref<8x!tpu.dma_semaphore, #tpu.memory_space<semaphore_mem>> -> memref<1x!tpu.dma_semaphore, #tpu.memory_space<semaphore_mem>>
    %198 = tpu.memref_squeeze %197 : memref<1x!tpu.dma_semaphore, #tpu.memory_space<semaphore_mem>> -> memref<!tpu.dma_semaphore, #tpu.memory_space<semaphore_mem>>
    tpu.enqueue_dma source(%194 : memref<1x128xf32, #tpu.memory_space<any>>) target(%196 : memref<1x128xf32, #tpu.memory_space<vmem>>) target_semaphore(%198 : memref<!tpu.dma_semaphore, #tpu.memory_space<semaphore_mem>>)
    %c20_i32_144 = arith.constant 20 : i32
    %199 = arith.addi %0, %c20_i32_144 : i32
    %c2_i32_145 = arith.constant 2 : i32
    %200 = arith.addi %199, %c2_i32_145 : i32
    %201 = arith.index_cast %200 : i32 to index
    %202 = memref.load %arg1[%201] : memref<512xi32, #tpu.memory_space<smem>>
    %c2_i32_146 = arith.constant 2 : i32
    %c5_i32_147 = arith.constant 5 : i32
    %c0_i32_148 = arith.constant 0 : i32
    %203 = tpu.memref_slice %arg4[%202, %c0_i32_148] : memref<512x128xf32, #tpu.memory_space<any>> -> memref<1x128xf32, #tpu.memory_space<any>>
    %c5_i32_149 = arith.constant 5 : i32
    %c0_i32_150 = arith.constant 0 : i32
    %204 = tpu.memref_slice %arg6[%c2_i32_146, %c5_i32_149, %c0_i32_150] : memref<4x32x128xf32, #tpu.memory_space<vmem>> -> memref<1x1x128xf32, #tpu.memory_space<vmem>>
    %205 = tpu.memref_squeeze %204 : memref<1x1x128xf32, #tpu.memory_space<vmem>> -> memref<1x128xf32, #tpu.memory_space<vmem>>
    %206 = tpu.memref_slice %arg7[%c5_i32_147] : memref<8x!tpu.dma_semaphore, #tpu.memory_space<semaphore_mem>> -> memref<1x!tpu.dma_semaphore, #tpu.memory_space<semaphore_mem>>
    %207 = tpu.memref_squeeze %206 : memref<1x!tpu.dma_semaphore, #tpu.memory_space<semaphore_mem>> -> memref<!tpu.dma_semaphore, #tpu.memory_space<semaphore_mem>>
    tpu.enqueue_dma source(%203 : memref<1x128xf32, #tpu.memory_space<any>>) target(%205 : memref<1x128xf32, #tpu.memory_space<vmem>>) target_semaphore(%207 : memref<!tpu.dma_semaphore, #tpu.memory_space<semaphore_mem>>)
    %c20_i32_151 = arith.constant 20 : i32
    %208 = arith.addi %0, %c20_i32_151 : i32
    %c3_i32_152 = arith.constant 3 : i32
    %209 = arith.addi %208, %c3_i32_152 : i32
    %210 = arith.index_cast %209 : i32 to index
    %211 = memref.load %arg1[%210] : memref<512xi32, #tpu.memory_space<smem>>
    %c3_i32_153 = arith.constant 3 : i32
    %c5_i32_154 = arith.constant 5 : i32
    %c0_i32_155 = arith.constant 0 : i32
    %212 = tpu.memref_slice %arg4[%211, %c0_i32_155] : memref<512x128xf32, #tpu.memory_space<any>> -> memref<1x128xf32, #tpu.memory_space<any>>
    %c5_i32_156 = arith.constant 5 : i32
    %c0_i32_157 = arith.constant 0 : i32
    %213 = tpu.memref_slice %arg6[%c3_i32_153, %c5_i32_156, %c0_i32_157] : memref<4x32x128xf32, #tpu.memory_space<vmem>> -> memref<1x1x128xf32, #tpu.memory_space<vmem>>
    %214 = tpu.memref_squeeze %213 : memref<1x1x128xf32, #tpu.memory_space<vmem>> -> memref<1x128xf32, #tpu.memory_space<vmem>>
    %215 = tpu.memref_slice %arg7[%c5_i32_154] : memref<8x!tpu.dma_semaphore, #tpu.memory_space<semaphore_mem>> -> memref<1x!tpu.dma_semaphore, #tpu.memory_space<semaphore_mem>>
    %216 = tpu.memref_squeeze %215 : memref<1x!tpu.dma_semaphore, #tpu.memory_space<semaphore_mem>> -> memref<!tpu.dma_semaphore, #tpu.memory_space<semaphore_mem>>
    tpu.enqueue_dma source(%212 : memref<1x128xf32, #tpu.memory_space<any>>) target(%214 : memref<1x128xf32, #tpu.memory_space<vmem>>) target_semaphore(%216 : memref<!tpu.dma_semaphore, #tpu.memory_space<semaphore_mem>>)
    %c24_i32 = arith.constant 24 : i32
    %217 = arith.addi %0, %c24_i32 : i32
    %c0_i32_158 = arith.constant 0 : i32
    %218 = arith.addi %217, %c0_i32_158 : i32
    %219 = arith.index_cast %218 : i32 to index
    %220 = memref.load %arg1[%219] : memref<512xi32, #tpu.memory_space<smem>>
    %c0_i32_159 = arith.constant 0 : i32
    %c6_i32 = arith.constant 6 : i32
    %c0_i32_160 = arith.constant 0 : i32
    %221 = tpu.memref_slice %arg4[%220, %c0_i32_160] : memref<512x128xf32, #tpu.memory_space<any>> -> memref<1x128xf32, #tpu.memory_space<any>>
    %c6_i32_161 = arith.constant 6 : i32
    %c0_i32_162 = arith.constant 0 : i32
    %222 = tpu.memref_slice %arg6[%c0_i32_159, %c6_i32_161, %c0_i32_162] : memref<4x32x128xf32, #tpu.memory_space<vmem>> -> memref<1x1x128xf32, #tpu.memory_space<vmem>>
    %223 = tpu.memref_squeeze %222 : memref<1x1x128xf32, #tpu.memory_space<vmem>> -> memref<1x128xf32, #tpu.memory_space<vmem>>
    %224 = tpu.memref_slice %arg7[%c6_i32] : memref<8x!tpu.dma_semaphore, #tpu.memory_space<semaphore_mem>> -> memref<1x!tpu.dma_semaphore, #tpu.memory_space<semaphore_mem>>
    %225 = tpu.memref_squeeze %224 : memref<1x!tpu.dma_semaphore, #tpu.memory_space<semaphore_mem>> -> memref<!tpu.dma_semaphore, #tpu.memory_space<semaphore_mem>>
    tpu.enqueue_dma source(%221 : memref<1x128xf32, #tpu.memory_space<any>>) target(%223 : memref<1x128xf32, #tpu.memory_space<vmem>>) target_semaphore(%225 : memref<!tpu.dma_semaphore, #tpu.memory_space<semaphore_mem>>)
    %c24_i32_163 = arith.constant 24 : i32
    %226 = arith.addi %0, %c24_i32_163 : i32
    %c1_i32_164 = arith.constant 1 : i32
    %227 = arith.addi %226, %c1_i32_164 : i32
    %228 = arith.index_cast %227 : i32 to index
    %229 = memref.load %arg1[%228] : memref<512xi32, #tpu.memory_space<smem>>
    %c1_i32_165 = arith.constant 1 : i32
    %c6_i32_166 = arith.constant 6 : i32
    %c0_i32_167 = arith.constant 0 : i32
    %230 = tpu.memref_slice %arg4[%229, %c0_i32_167] : memref<512x128xf32, #tpu.memory_space<any>> -> memref<1x128xf32, #tpu.memory_space<any>>
    %c6_i32_168 = arith.constant 6 : i32
    %c0_i32_169 = arith.constant 0 : i32
    %231 = tpu.memref_slice %arg6[%c1_i32_165, %c6_i32_168, %c0_i32_169] : memref<4x32x128xf32, #tpu.memory_space<vmem>> -> memref<1x1x128xf32, #tpu.memory_space<vmem>>
    %232 = tpu.memref_squeeze %231 : memref<1x1x128xf32, #tpu.memory_space<vmem>> -> memref<1x128xf32, #tpu.memory_space<vmem>>
    %233 = tpu.memref_slice %arg7[%c6_i32_166] : memref<8x!tpu.dma_semaphore, #tpu.memory_space<semaphore_mem>> -> memref<1x!tpu.dma_semaphore, #tpu.memory_space<semaphore_mem>>
    %234 = tpu.memref_squeeze %233 : memref<1x!tpu.dma_semaphore, #tpu.memory_space<semaphore_mem>> -> memref<!tpu.dma_semaphore, #tpu.memory_space<semaphore_mem>>
    tpu.enqueue_dma source(%230 : memref<1x128xf32, #tpu.memory_space<any>>) target(%232 : memref<1x128xf32, #tpu.memory_space<vmem>>) target_semaphore(%234 : memref<!tpu.dma_semaphore, #tpu.memory_space<semaphore_mem>>)
    %c24_i32_170 = arith.constant 24 : i32
    %235 = arith.addi %0, %c24_i32_170 : i32
    %c2_i32_171 = arith.constant 2 : i32
    %236 = arith.addi %235, %c2_i32_171 : i32
    %237 = arith.index_cast %236 : i32 to index
    %238 = memref.load %arg1[%237] : memref<512xi32, #tpu.memory_space<smem>>
    %c2_i32_172 = arith.constant 2 : i32
    %c6_i32_173 = arith.constant 6 : i32
    %c0_i32_174 = arith.constant 0 : i32
    %239 = tpu.memref_slice %arg4[%238, %c0_i32_174] : memref<512x128xf32, #tpu.memory_space<any>> -> memref<1x128xf32, #tpu.memory_space<any>>
    %c6_i32_175 = arith.constant 6 : i32
    %c0_i32_176 = arith.constant 0 : i32
    %240 = tpu.memref_slice %arg6[%c2_i32_172, %c6_i32_175, %c0_i32_176] : memref<4x32x128xf32, #tpu.memory_space<vmem>> -> memref<1x1x128xf32, #tpu.memory_space<vmem>>
    %241 = tpu.memref_squeeze %240 : memref<1x1x128xf32, #tpu.memory_space<vmem>> -> memref<1x128xf32, #tpu.memory_space<vmem>>
    %242 = tpu.memref_slice %arg7[%c6_i32_173] : memref<8x!tpu.dma_semaphore, #tpu.memory_space<semaphore_mem>> -> memref<1x!tpu.dma_semaphore, #tpu.memory_space<semaphore_mem>>
    %243 = tpu.memref_squeeze %242 : memref<1x!tpu.dma_semaphore, #tpu.memory_space<semaphore_mem>> -> memref<!tpu.dma_semaphore, #tpu.memory_space<semaphore_mem>>
    tpu.enqueue_dma source(%239 : memref<1x128xf32, #tpu.memory_space<any>>) target(%241 : memref<1x128xf32, #tpu.memory_space<vmem>>) target_semaphore(%243 : memref<!tpu.dma_semaphore, #tpu.memory_space<semaphore_mem>>)
    %c24_i32_177 = arith.constant 24 : i32
    %244 = arith.addi %0, %c24_i32_177 : i32
    %c3_i32_178 = arith.constant 3 : i32
    %245 = arith.addi %244, %c3_i32_178 : i32
    %246 = arith.index_cast %245 : i32 to index
    %247 = memref.load %arg1[%246] : memref<512xi32, #tpu.memory_space<smem>>
    %c3_i32_179 = arith.constant 3 : i32
    %c6_i32_180 = arith.constant 6 : i32
    %c0_i32_181 = arith.constant 0 : i32
    %248 = tpu.memref_slice %arg4[%247, %c0_i32_181] : memref<512x128xf32, #tpu.memory_space<any>> -> memref<1x128xf32, #tpu.memory_space<any>>
    %c6_i32_182 = arith.constant 6 : i32
    %c0_i32_183 = arith.constant 0 : i32
    %249 = tpu.memref_slice %arg6[%c3_i32_179, %c6_i32_182, %c0_i32_183] : memref<4x32x128xf32, #tpu.memory_space<vmem>> -> memref<1x1x128xf32, #tpu.memory_space<vmem>>
    %250 = tpu.memref_squeeze %249 : memref<1x1x128xf32, #tpu.memory_space<vmem>> -> memref<1x128xf32, #tpu.memory_space<vmem>>
    %251 = tpu.memref_slice %arg7[%c6_i32_180] : memref<8x!tpu.dma_semaphore, #tpu.memory_space<semaphore_mem>> -> memref<1x!tpu.dma_semaphore, #tpu.memory_space<semaphore_mem>>
    %252 = tpu.memref_squeeze %251 : memref<1x!tpu.dma_semaphore, #tpu.memory_space<semaphore_mem>> -> memref<!tpu.dma_semaphore, #tpu.memory_space<semaphore_mem>>
    tpu.enqueue_dma source(%248 : memref<1x128xf32, #tpu.memory_space<any>>) target(%250 : memref<1x128xf32, #tpu.memory_space<vmem>>) target_semaphore(%252 : memref<!tpu.dma_semaphore, #tpu.memory_space<semaphore_mem>>)
    %c28_i32 = arith.constant 28 : i32
    %253 = arith.addi %0, %c28_i32 : i32
    %c0_i32_184 = arith.constant 0 : i32
    %254 = arith.addi %253, %c0_i32_184 : i32
    %255 = arith.index_cast %254 : i32 to index
    %256 = memref.load %arg1[%255] : memref<512xi32, #tpu.memory_space<smem>>
    %c0_i32_185 = arith.constant 0 : i32
    %c7_i32 = arith.constant 7 : i32
    %c0_i32_186 = arith.constant 0 : i32
    %257 = tpu.memref_slice %arg4[%256, %c0_i32_186] : memref<512x128xf32, #tpu.memory_space<any>> -> memref<1x128xf32, #tpu.memory_space<any>>
    %c7_i32_187 = arith.constant 7 : i32
    %c0_i32_188 = arith.constant 0 : i32
    %258 = tpu.memref_slice %arg6[%c0_i32_185, %c7_i32_187, %c0_i32_188] : memref<4x32x128xf32, #tpu.memory_space<vmem>> -> memref<1x1x128xf32, #tpu.memory_space<vmem>>
    %259 = tpu.memref_squeeze %258 : memref<1x1x128xf32, #tpu.memory_space<vmem>> -> memref<1x128xf32, #tpu.memory_space<vmem>>
    %260 = tpu.memref_slice %arg7[%c7_i32] : memref<8x!tpu.dma_semaphore, #tpu.memory_space<semaphore_mem>> -> memref<1x!tpu.dma_semaphore, #tpu.memory_space<semaphore_mem>>
    %261 = tpu.memref_squeeze %260 : memref<1x!tpu.dma_semaphore, #tpu.memory_space<semaphore_mem>> -> memref<!tpu.dma_semaphore, #tpu.memory_space<semaphore_mem>>
    tpu.enqueue_dma source(%257 : memref<1x128xf32, #tpu.memory_space<any>>) target(%259 : memref<1x128xf32, #tpu.memory_space<vmem>>) target_semaphore(%261 : memref<!tpu.dma_semaphore, #tpu.memory_space<semaphore_mem>>)
    %c28_i32_189 = arith.constant 28 : i32
    %262 = arith.addi %0, %c28_i32_189 : i32
    %c1_i32_190 = arith.constant 1 : i32
    %263 = arith.addi %262, %c1_i32_190 : i32
    %264 = arith.index_cast %263 : i32 to index
    %265 = memref.load %arg1[%264] : memref<512xi32, #tpu.memory_space<smem>>
    %c1_i32_191 = arith.constant 1 : i32
    %c7_i32_192 = arith.constant 7 : i32
    %c0_i32_193 = arith.constant 0 : i32
    %266 = tpu.memref_slice %arg4[%265, %c0_i32_193] : memref<512x128xf32, #tpu.memory_space<any>> -> memref<1x128xf32, #tpu.memory_space<any>>
    %c7_i32_194 = arith.constant 7 : i32
    %c0_i32_195 = arith.constant 0 : i32
    %267 = tpu.memref_slice %arg6[%c1_i32_191, %c7_i32_194, %c0_i32_195] : memref<4x32x128xf32, #tpu.memory_space<vmem>> -> memref<1x1x128xf32, #tpu.memory_space<vmem>>
    %268 = tpu.memref_squeeze %267 : memref<1x1x128xf32, #tpu.memory_space<vmem>> -> memref<1x128xf32, #tpu.memory_space<vmem>>
    %269 = tpu.memref_slice %arg7[%c7_i32_192] : memref<8x!tpu.dma_semaphore, #tpu.memory_space<semaphore_mem>> -> memref<1x!tpu.dma_semaphore, #tpu.memory_space<semaphore_mem>>
    %270 = tpu.memref_squeeze %269 : memref<1x!tpu.dma_semaphore, #tpu.memory_space<semaphore_mem>> -> memref<!tpu.dma_semaphore, #tpu.memory_space<semaphore_mem>>
    tpu.enqueue_dma source(%266 : memref<1x128xf32, #tpu.memory_space<any>>) target(%268 : memref<1x128xf32, #tpu.memory_space<vmem>>) target_semaphore(%270 : memref<!tpu.dma_semaphore, #tpu.memory_space<semaphore_mem>>)
    %c28_i32_196 = arith.constant 28 : i32
    %271 = arith.addi %0, %c28_i32_196 : i32
    %c2_i32_197 = arith.constant 2 : i32
    %272 = arith.addi %271, %c2_i32_197 : i32
    %273 = arith.index_cast %272 : i32 to index
    %274 = memref.load %arg1[%273] : memref<512xi32, #tpu.memory_space<smem>>
    %c2_i32_198 = arith.constant 2 : i32
    %c7_i32_199 = arith.constant 7 : i32
    %c0_i32_200 = arith.constant 0 : i32
    %275 = tpu.memref_slice %arg4[%274, %c0_i32_200] : memref<512x128xf32, #tpu.memory_space<any>> -> memref<1x128xf32, #tpu.memory_space<any>>
    %c7_i32_201 = arith.constant 7 : i32
    %c0_i32_202 = arith.constant 0 : i32
    %276 = tpu.memref_slice %arg6[%c2_i32_198, %c7_i32_201, %c0_i32_202] : memref<4x32x128xf32, #tpu.memory_space<vmem>> -> memref<1x1x128xf32, #tpu.memory_space<vmem>>
    %277 = tpu.memref_squeeze %276 : memref<1x1x128xf32, #tpu.memory_space<vmem>> -> memref<1x128xf32, #tpu.memory_space<vmem>>
    %278 = tpu.memref_slice %arg7[%c7_i32_199] : memref<8x!tpu.dma_semaphore, #tpu.memory_space<semaphore_mem>> -> memref<1x!tpu.dma_semaphore, #tpu.memory_space<semaphore_mem>>
    %279 = tpu.memref_squeeze %278 : memref<1x!tpu.dma_semaphore, #tpu.memory_space<semaphore_mem>> -> memref<!tpu.dma_semaphore, #tpu.memory_space<semaphore_mem>>
    tpu.enqueue_dma source(%275 : memref<1x128xf32, #tpu.memory_space<any>>) target(%277 : memref<1x128xf32, #tpu.memory_space<vmem>>) target_semaphore(%279 : memref<!tpu.dma_semaphore, #tpu.memory_space<semaphore_mem>>)
    %c28_i32_203 = arith.constant 28 : i32
    %280 = arith.addi %0, %c28_i32_203 : i32
    %c3_i32_204 = arith.constant 3 : i32
    %281 = arith.addi %280, %c3_i32_204 : i32
    %282 = arith.index_cast %281 : i32 to index
    %283 = memref.load %arg1[%282] : memref<512xi32, #tpu.memory_space<smem>>
    %c3_i32_205 = arith.constant 3 : i32
    %c7_i32_206 = arith.constant 7 : i32
    %c0_i32_207 = arith.constant 0 : i32
    %284 = tpu.memref_slice %arg4[%283, %c0_i32_207] : memref<512x128xf32, #tpu.memory_space<any>> -> memref<1x128xf32, #tpu.memory_space<any>>
    %c7_i32_208 = arith.constant 7 : i32
    %c0_i32_209 = arith.constant 0 : i32
    %285 = tpu.memref_slice %arg6[%c3_i32_205, %c7_i32_208, %c0_i32_209] : memref<4x32x128xf32, #tpu.memory_space<vmem>> -> memref<1x1x128xf32, #tpu.memory_space<vmem>>
    %286 = tpu.memref_squeeze %285 : memref<1x1x128xf32, #tpu.memory_space<vmem>> -> memref<1x128xf32, #tpu.memory_space<vmem>>
    %287 = tpu.memref_slice %arg7[%c7_i32_206] : memref<8x!tpu.dma_semaphore, #tpu.memory_space<semaphore_mem>> -> memref<1x!tpu.dma_semaphore, #tpu.memory_space<semaphore_mem>>
    %288 = tpu.memref_squeeze %287 : memref<1x!tpu.dma_semaphore, #tpu.memory_space<semaphore_mem>> -> memref<!tpu.dma_semaphore, #tpu.memory_space<semaphore_mem>>
    tpu.enqueue_dma source(%284 : memref<1x128xf32, #tpu.memory_space<any>>) target(%286 : memref<1x128xf32, #tpu.memory_space<vmem>>) target_semaphore(%288 : memref<!tpu.dma_semaphore, #tpu.memory_space<semaphore_mem>>)
    %c0_i32_210 = arith.constant 0 : i32
    %c32_i32 = arith.constant 32 : i32
    %289 = arith.addi %c0_i32_210, %c32_i32 : i32
    %c1_i32_211 = arith.constant 1 : i32
    scf.for %arg8 = %c0_i32_210 to %289 step %c1_i32_211  : i32 {
      %c1_i32_234 = arith.constant 1 : i32
      %319 = arith.muli %arg8, %c1_i32_234 : i32
      %c0_i32_235 = arith.constant 0 : i32
      %320 = arith.addi %c0_i32_235, %319 : i32
      %c7_i32_236 = arith.constant 7 : i32
      %321 = arith.andi %320, %c7_i32_236 : i32
      %c0_i32_237 = arith.constant 0 : i32
      %c0_i32_238 = arith.constant 0 : i32
      %c0_i32_239 = arith.constant 0 : i32
      %322 = tpu.memref_slice %arg4[%c0_i32_238, %c0_i32_239] : memref<512x128xf32, #tpu.memory_space<any>> -> memref<1x128xf32, #tpu.memory_space<any>>
      %c0_i32_240 = arith.constant 0 : i32
      %323 = tpu.memref_slice %arg6[%c0_i32_237, %320, %c0_i32_240] : memref<4x32x128xf32, #tpu.memory_space<vmem>> -> memref<1x1x128xf32, #tpu.memory_space<vmem>>
      %324 = tpu.memref_squeeze %323 : memref<1x1x128xf32, #tpu.memory_space<vmem>> -> memref<1x128xf32, #tpu.memory_space<vmem>>
      %325 = tpu.memref_slice %arg7[%321] : memref<8x!tpu.dma_semaphore, #tpu.memory_space<semaphore_mem>> -> memref<1x!tpu.dma_semaphore, #tpu.memory_space<semaphore_mem>>
      %326 = tpu.memref_squeeze %325 : memref<1x!tpu.dma_semaphore, #tpu.memory_space<semaphore_mem>> -> memref<!tpu.dma_semaphore, #tpu.memory_space<semaphore_mem>>
      tpu.wait_dma2 semaphore(%326 : memref<!tpu.dma_semaphore, #tpu.memory_space<semaphore_mem>>) src(%322 : memref<1x128xf32, #tpu.memory_space<any>>) dst(%324 : memref<1x128xf32, #tpu.memory_space<vmem>>)
      %c1_i32_241 = arith.constant 1 : i32
      %c0_i32_242 = arith.constant 0 : i32
      %c0_i32_243 = arith.constant 0 : i32
      %327 = tpu.memref_slice %arg4[%c0_i32_242, %c0_i32_243] : memref<512x128xf32, #tpu.memory_space<any>> -> memref<1x128xf32, #tpu.memory_space<any>>
      %c0_i32_244 = arith.constant 0 : i32
      %328 = tpu.memref_slice %arg6[%c1_i32_241, %320, %c0_i32_244] : memref<4x32x128xf32, #tpu.memory_space<vmem>> -> memref<1x1x128xf32, #tpu.memory_space<vmem>>
      %329 = tpu.memref_squeeze %328 : memref<1x1x128xf32, #tpu.memory_space<vmem>> -> memref<1x128xf32, #tpu.memory_space<vmem>>
      %330 = tpu.memref_slice %arg7[%321] : memref<8x!tpu.dma_semaphore, #tpu.memory_space<semaphore_mem>> -> memref<1x!tpu.dma_semaphore, #tpu.memory_space<semaphore_mem>>
      %331 = tpu.memref_squeeze %330 : memref<1x!tpu.dma_semaphore, #tpu.memory_space<semaphore_mem>> -> memref<!tpu.dma_semaphore, #tpu.memory_space<semaphore_mem>>
      tpu.wait_dma2 semaphore(%331 : memref<!tpu.dma_semaphore, #tpu.memory_space<semaphore_mem>>) src(%327 : memref<1x128xf32, #tpu.memory_space<any>>) dst(%329 : memref<1x128xf32, #tpu.memory_space<vmem>>)
      %c2_i32_245 = arith.constant 2 : i32
      %c0_i32_246 = arith.constant 0 : i32
      %c0_i32_247 = arith.constant 0 : i32
      %332 = tpu.memref_slice %arg4[%c0_i32_246, %c0_i32_247] : memref<512x128xf32, #tpu.memory_space<any>> -> memref<1x128xf32, #tpu.memory_space<any>>
      %c0_i32_248 = arith.constant 0 : i32
      %333 = tpu.memref_slice %arg6[%c2_i32_245, %320, %c0_i32_248] : memref<4x32x128xf32, #tpu.memory_space<vmem>> -> memref<1x1x128xf32, #tpu.memory_space<vmem>>
      %334 = tpu.memref_squeeze %333 : memref<1x1x128xf32, #tpu.memory_space<vmem>> -> memref<1x128xf32, #tpu.memory_space<vmem>>
      %335 = tpu.memref_slice %arg7[%321] : memref<8x!tpu.dma_semaphore, #tpu.memory_space<semaphore_mem>> -> memref<1x!tpu.dma_semaphore, #tpu.memory_space<semaphore_mem>>
      %336 = tpu.memref_squeeze %335 : memref<1x!tpu.dma_semaphore, #tpu.memory_space<semaphore_mem>> -> memref<!tpu.dma_semaphore, #tpu.memory_space<semaphore_mem>>
      tpu.wait_dma2 semaphore(%336 : memref<!tpu.dma_semaphore, #tpu.memory_space<semaphore_mem>>) src(%332 : memref<1x128xf32, #tpu.memory_space<any>>) dst(%334 : memref<1x128xf32, #tpu.memory_space<vmem>>)
      %c3_i32_249 = arith.constant 3 : i32
      %c0_i32_250 = arith.constant 0 : i32
      %c0_i32_251 = arith.constant 0 : i32
      %337 = tpu.memref_slice %arg4[%c0_i32_250, %c0_i32_251] : memref<512x128xf32, #tpu.memory_space<any>> -> memref<1x128xf32, #tpu.memory_space<any>>
      %c0_i32_252 = arith.constant 0 : i32
      %338 = tpu.memref_slice %arg6[%c3_i32_249, %320, %c0_i32_252] : memref<4x32x128xf32, #tpu.memory_space<vmem>> -> memref<1x1x128xf32, #tpu.memory_space<vmem>>
      %339 = tpu.memref_squeeze %338 : memref<1x1x128xf32, #tpu.memory_space<vmem>> -> memref<1x128xf32, #tpu.memory_space<vmem>>
      %340 = tpu.memref_slice %arg7[%321] : memref<8x!tpu.dma_semaphore, #tpu.memory_space<semaphore_mem>> -> memref<1x!tpu.dma_semaphore, #tpu.memory_space<semaphore_mem>>
      %341 = tpu.memref_squeeze %340 : memref<1x!tpu.dma_semaphore, #tpu.memory_space<semaphore_mem>> -> memref<!tpu.dma_semaphore, #tpu.memory_space<semaphore_mem>>
      tpu.wait_dma2 semaphore(%341 : memref<!tpu.dma_semaphore, #tpu.memory_space<semaphore_mem>>) src(%337 : memref<1x128xf32, #tpu.memory_space<any>>) dst(%339 : memref<1x128xf32, #tpu.memory_space<vmem>>)
      %c8_i32_253 = arith.constant 8 : i32
      %342 = arith.addi %320, %c8_i32_253 : i32
      %c32_i32_254 = arith.constant 32 : i32
      %343 = arith.cmpi slt, %342, %c32_i32_254 : i32
      %344 = arith.extui %343 : i1 to i32
      %c0_i32_255 = arith.constant 0 : i32
      %345 = arith.cmpi ne, %344, %c0_i32_255 : i32
      scf.if %345 {
        %c8_i32_256 = arith.constant 8 : i32
        %346 = arith.addi %320, %c8_i32_256 : i32
        %c7_i32_257 = arith.constant 7 : i32
        %347 = arith.andi %346, %c7_i32_257 : i32
        %c4_i32_258 = arith.constant 4 : i32
        %348 = arith.muli %346, %c4_i32_258 : i32
        %349 = arith.addi %0, %348 : i32
        %c0_i32_259 = arith.constant 0 : i32
        %350 = arith.addi %349, %c0_i32_259 : i32
        %351 = arith.index_cast %350 : i32 to index
        %352 = memref.load %arg1[%351] : memref<512xi32, #tpu.memory_space<smem>>
        %c0_i32_260 = arith.constant 0 : i32
        %c0_i32_261 = arith.constant 0 : i32
        %353 = tpu.memref_slice %arg4[%352, %c0_i32_261] : memref<512x128xf32, #tpu.memory_space<any>> -> memref<1x128xf32, #tpu.memory_space<any>>
        %c0_i32_262 = arith.constant 0 : i32
        %354 = tpu.memref_slice %arg6[%c0_i32_260, %346, %c0_i32_262] : memref<4x32x128xf32, #tpu.memory_space<vmem>> -> memref<1x1x128xf32, #tpu.memory_space<vmem>>
        %355 = tpu.memref_squeeze %354 : memref<1x1x128xf32, #tpu.memory_space<vmem>> -> memref<1x128xf32, #tpu.memory_space<vmem>>
        %356 = tpu.memref_slice %arg7[%347] : memref<8x!tpu.dma_semaphore, #tpu.memory_space<semaphore_mem>> -> memref<1x!tpu.dma_semaphore, #tpu.memory_space<semaphore_mem>>
        %357 = tpu.memref_squeeze %356 : memref<1x!tpu.dma_semaphore, #tpu.memory_space<semaphore_mem>> -> memref<!tpu.dma_semaphore, #tpu.memory_space<semaphore_mem>>
        tpu.enqueue_dma source(%353 : memref<1x128xf32, #tpu.memory_space<any>>) target(%355 : memref<1x128xf32, #tpu.memory_space<vmem>>) target_semaphore(%357 : memref<!tpu.dma_semaphore, #tpu.memory_space<semaphore_mem>>)
        %c4_i32_263 = arith.constant 4 : i32
        %358 = arith.muli %346, %c4_i32_263 : i32
        %359 = arith.addi %0, %358 : i32
        %c1_i32_264 = arith.constant 1 : i32
        %360 = arith.addi %359, %c1_i32_264 : i32
        %361 = arith.index_cast %360 : i32 to index
        %362 = memref.load %arg1[%361] : memref<512xi32, #tpu.memory_space<smem>>
        %c1_i32_265 = arith.constant 1 : i32
        %c0_i32_266 = arith.constant 0 : i32
        %363 = tpu.memref_slice %arg4[%362, %c0_i32_266] : memref<512x128xf32, #tpu.memory_space<any>> -> memref<1x128xf32, #tpu.memory_space<any>>
        %c0_i32_267 = arith.constant 0 : i32
        %364 = tpu.memref_slice %arg6[%c1_i32_265, %346, %c0_i32_267] : memref<4x32x128xf32, #tpu.memory_space<vmem>> -> memref<1x1x128xf32, #tpu.memory_space<vmem>>
        %365 = tpu.memref_squeeze %364 : memref<1x1x128xf32, #tpu.memory_space<vmem>> -> memref<1x128xf32, #tpu.memory_space<vmem>>
        %366 = tpu.memref_slice %arg7[%347] : memref<8x!tpu.dma_semaphore, #tpu.memory_space<semaphore_mem>> -> memref<1x!tpu.dma_semaphore, #tpu.memory_space<semaphore_mem>>
        %367 = tpu.memref_squeeze %366 : memref<1x!tpu.dma_semaphore, #tpu.memory_space<semaphore_mem>> -> memref<!tpu.dma_semaphore, #tpu.memory_space<semaphore_mem>>
        tpu.enqueue_dma source(%363 : memref<1x128xf32, #tpu.memory_space<any>>) target(%365 : memref<1x128xf32, #tpu.memory_space<vmem>>) target_semaphore(%367 : memref<!tpu.dma_semaphore, #tpu.memory_space<semaphore_mem>>)
        %c4_i32_268 = arith.constant 4 : i32
        %368 = arith.muli %346, %c4_i32_268 : i32
        %369 = arith.addi %0, %368 : i32
        %c2_i32_269 = arith.constant 2 : i32
        %370 = arith.addi %369, %c2_i32_269 : i32
        %371 = arith.index_cast %370 : i32 to index
        %372 = memref.load %arg1[%371] : memref<512xi32, #tpu.memory_space<smem>>
        %c2_i32_270 = arith.constant 2 : i32
        %c0_i32_271 = arith.constant 0 : i32
        %373 = tpu.memref_slice %arg4[%372, %c0_i32_271] : memref<512x128xf32, #tpu.memory_space<any>> -> memref<1x128xf32, #tpu.memory_space<any>>
        %c0_i32_272 = arith.constant 0 : i32
        %374 = tpu.memref_slice %arg6[%c2_i32_270, %346, %c0_i32_272] : memref<4x32x128xf32, #tpu.memory_space<vmem>> -> memref<1x1x128xf32, #tpu.memory_space<vmem>>
        %375 = tpu.memref_squeeze %374 : memref<1x1x128xf32, #tpu.memory_space<vmem>> -> memref<1x128xf32, #tpu.memory_space<vmem>>
        %376 = tpu.memref_slice %arg7[%347] : memref<8x!tpu.dma_semaphore, #tpu.memory_space<semaphore_mem>> -> memref<1x!tpu.dma_semaphore, #tpu.memory_space<semaphore_mem>>
        %377 = tpu.memref_squeeze %376 : memref<1x!tpu.dma_semaphore, #tpu.memory_space<semaphore_mem>> -> memref<!tpu.dma_semaphore, #tpu.memory_space<semaphore_mem>>
        tpu.enqueue_dma source(%373 : memref<1x128xf32, #tpu.memory_space<any>>) target(%375 : memref<1x128xf32, #tpu.memory_space<vmem>>) target_semaphore(%377 : memref<!tpu.dma_semaphore, #tpu.memory_space<semaphore_mem>>)
        %c4_i32_273 = arith.constant 4 : i32
        %378 = arith.muli %346, %c4_i32_273 : i32
        %379 = arith.addi %0, %378 : i32
        %c3_i32_274 = arith.constant 3 : i32
        %380 = arith.addi %379, %c3_i32_274 : i32
        %381 = arith.index_cast %380 : i32 to index
        %382 = memref.load %arg1[%381] : memref<512xi32, #tpu.memory_space<smem>>
        %c3_i32_275 = arith.constant 3 : i32
        %c0_i32_276 = arith.constant 0 : i32
        %383 = tpu.memref_slice %arg4[%382, %c0_i32_276] : memref<512x128xf32, #tpu.memory_space<any>> -> memref<1x128xf32, #tpu.memory_space<any>>
        %c0_i32_277 = arith.constant 0 : i32
        %384 = tpu.memref_slice %arg6[%c3_i32_275, %346, %c0_i32_277] : memref<4x32x128xf32, #tpu.memory_space<vmem>> -> memref<1x1x128xf32, #tpu.memory_space<vmem>>
        %385 = tpu.memref_squeeze %384 : memref<1x1x128xf32, #tpu.memory_space<vmem>> -> memref<1x128xf32, #tpu.memory_space<vmem>>
        %386 = tpu.memref_slice %arg7[%347] : memref<8x!tpu.dma_semaphore, #tpu.memory_space<semaphore_mem>> -> memref<1x!tpu.dma_semaphore, #tpu.memory_space<semaphore_mem>>
        %387 = tpu.memref_squeeze %386 : memref<1x!tpu.dma_semaphore, #tpu.memory_space<semaphore_mem>> -> memref<!tpu.dma_semaphore, #tpu.memory_space<semaphore_mem>>
        tpu.enqueue_dma source(%383 : memref<1x128xf32, #tpu.memory_space<any>>) target(%385 : memref<1x128xf32, #tpu.memory_space<vmem>>) target_semaphore(%387 : memref<!tpu.dma_semaphore, #tpu.memory_space<semaphore_mem>>)
      } else {
      }
    }
    %c32_i32_212 = arith.constant 32 : i32
    %cst = arith.constant 0.000000e+00 : f32
    %290 = vector.broadcast %cst : f32 to vector<32x256xf32>
    %c0 = arith.constant 0 : index
    %c0_213 = arith.constant 0 : index
    %c0_214 = arith.constant 0 : index
    %291 = vector.load %arg6[%c0, %c0_213, %c0_214] : memref<4x32x128xf32, #tpu.memory_space<vmem>>, vector<1x32x128xf32>
    %292 = vector.shape_cast %291 : vector<1x32x128xf32> to vector<32x128xf32>
    %293 = arith.truncf %292 : vector<32x128xf32> to vector<32x128xbf16>
    %c0_215 = arith.constant 0 : index
    %c0_216 = arith.constant 0 : index
    %294 = vector.load %arg2[%c0_215, %c0_216] : memref<512x256xbf16, #tpu.memory_space<vmem>>, vector<128x256xbf16>
    %cst_217 = arith.constant dense<0.000000e+00> : vector<32x256xf32>
    %295 = tpu.matmul %293, %294, %cst_217 {dimension_numbers = #tpu.dot_dimension_numbers<[1], [0], [0], [1], [0, 0, 1, 1], [], []>} : vector<32x128xbf16>, vector<128x256xbf16>, vector<32x256xf32> -> vector<32x256xf32>
    %296 = arith.addf %290, %295 : vector<32x256xf32>
    %c1 = arith.constant 1 : index
    %c0_218 = arith.constant 0 : index
    %c0_219 = arith.constant 0 : index
    %297 = vector.load %arg6[%c1, %c0_218, %c0_219] : memref<4x32x128xf32, #tpu.memory_space<vmem>>, vector<1x32x128xf32>
    %298 = vector.shape_cast %297 : vector<1x32x128xf32> to vector<32x128xf32>
    %299 = arith.truncf %298 : vector<32x128xf32> to vector<32x128xbf16>
    %c128 = arith.constant 128 : index
    %c0_220 = arith.constant 0 : index
    %300 = vector.load %arg2[%c128, %c0_220] : memref<512x256xbf16, #tpu.memory_space<vmem>>, vector<128x256xbf16>
    %cst_221 = arith.constant dense<0.000000e+00> : vector<32x256xf32>
    %301 = tpu.matmul %299, %300, %cst_221 {dimension_numbers = #tpu.dot_dimension_numbers<[1], [0], [0], [1], [0, 0, 1, 1], [], []>} : vector<32x128xbf16>, vector<128x256xbf16>, vector<32x256xf32> -> vector<32x256xf32>
    %302 = arith.addf %296, %301 : vector<32x256xf32>
    %c2 = arith.constant 2 : index
    %c0_222 = arith.constant 0 : index
    %c0_223 = arith.constant 0 : index
    %303 = vector.load %arg6[%c2, %c0_222, %c0_223] : memref<4x32x128xf32, #tpu.memory_space<vmem>>, vector<1x32x128xf32>
    %304 = vector.shape_cast %303 : vector<1x32x128xf32> to vector<32x128xf32>
    %305 = arith.truncf %304 : vector<32x128xf32> to vector<32x128xbf16>
    %c256 = arith.constant 256 : index
    %c0_224 = arith.constant 0 : index
    %306 = vector.load %arg2[%c256, %c0_224] : memref<512x256xbf16, #tpu.memory_space<vmem>>, vector<128x256xbf16>
    %cst_225 = arith.constant dense<0.000000e+00> : vector<32x256xf32>
    %307 = tpu.matmul %305, %306, %cst_225 {dimension_numbers = #tpu.dot_dimension_numbers<[1], [0], [0], [1], [0, 0, 1, 1], [], []>} : vector<32x128xbf16>, vector<128x256xbf16>, vector<32x256xf32> -> vector<32x256xf32>
    %308 = arith.addf %302, %307 : vector<32x256xf32>
    %c3 = arith.constant 3 : index
    %c0_226 = arith.constant 0 : index
    %c0_227 = arith.constant 0 : index
    %309 = vector.load %arg6[%c3, %c0_226, %c0_227] : memref<4x32x128xf32, #tpu.memory_space<vmem>>, vector<1x32x128xf32>
    %310 = vector.shape_cast %309 : vector<1x32x128xf32> to vector<32x128xf32>
    %311 = arith.truncf %310 : vector<32x128xf32> to vector<32x128xbf16>
    %c384 = arith.constant 384 : index
    %c0_228 = arith.constant 0 : index
    %312 = vector.load %arg2[%c384, %c0_228] : memref<512x256xbf16, #tpu.memory_space<vmem>>, vector<128x256xbf16>
    %cst_229 = arith.constant dense<0.000000e+00> : vector<32x256xf32>
    %313 = tpu.matmul %311, %312, %cst_229 {dimension_numbers = #tpu.dot_dimension_numbers<[1], [0], [0], [1], [0, 0, 1, 1], [], []>} : vector<32x128xbf16>, vector<128x256xbf16>, vector<32x256xf32> -> vector<32x256xf32>
    %314 = arith.addf %308, %313 : vector<32x256xf32>
    %c0_230 = arith.constant 0 : index
    %c0_231 = arith.constant 0 : index
    %315 = vector.load %arg3[%c0_230, %c0_231] : memref<1x256xf32, #tpu.memory_space<vmem>>, vector<1x256xf32>
    %316 = vector.broadcast %315 : vector<1x256xf32> to vector<32x256xf32>
    %317 = arith.addf %314, %316 : vector<32x256xf32>
    %c0_232 = arith.constant 0 : index
    %c0_233 = arith.constant 0 : index
    %318 = vector.load %arg5[%c0_232, %c0_233] : memref<32x256xf32, #tpu.memory_space<vmem>>, vector<32x256xf32>
    tpu.vector_store %arg5[%c0_232, %c0_233], %317 {strides = array<i32>} : memref<32x256xf32, #tpu.memory_space<vmem>>, vector<32x256xf32>,
    return
  }
  func.func @transform_0(%arg0: i32, %arg1: memref<512xi32, #tpu.memory_space<smem>>) -> (i32, i32) {
    %c0_i32 = arith.constant 0 : i32
    %c0_i32_0 = arith.constant 0 : i32
    %c0_i32_1 = arith.constant 0 : i32
    return %c0_i32, %c0_i32_0 : i32, i32
  }
  func.func @transform_1(%arg0: i32, %arg1: memref<512xi32, #tpu.memory_space<smem>>) -> (i32, i32) {
    %c0_i32 = arith.constant 0 : i32
    %c0_i32_0 = arith.constant 0 : i32
    %c0_i32_1 = arith.constant 0 : i32
    return %c0_i32, %c0_i32_0 : i32, i32
  }
  func.func @transform_3(%arg0: i32, %arg1: memref<512xi32, #tpu.memory_space<smem>>) -> (i32, i32) {
    %c0_i32 = arith.constant 0 : i32
    %c0_i32_0 = arith.constant 0 : i32
    return %arg0, %c0_i32 : i32, i32
  }
}

</mosaic_0001>

<bundles_post_ra>
// kernel: tpu_custom_call.1
= control target key start
LH: loop header
LB: loop body
LE: loop exit
PB: predicated region body
PF: predicated region fallthrough
CT: control target
= control target key end

     0   :  { %s3920_s0 = inlined_call_operand.hbm [shape: s32[512], index: 0, kind: input, shape index: {}]   ;;  %s3921_s1 = inlined_call_operand.hbm [shape: bf16[512,256], index: 1, kind: input, shape index: {}]   ;;  %s3922_s2 = inlined_call_operand.vmem [shape: f32[1,256], index: 2, kind: input, shape index: {}]   ;;  %s3923_s3 = inlined_call_operand.hbm [shape: f32[512,128], index: 3, kind: input, shape index: {}]   ;;  %s3924_s4 = inlined_call_operand.hbm [shape: f32[128,256], index: 4, kind: output, shape index: {}]  }
   0x1   :  { %3936 = sst [smem:[#allocation99_spill]] %s3921_s1  ;;  %s1995_s17 = scalar_lea.hbm %s3920_s0, 64 }
   0x2   :  { %p1996_p0 = scmp.ne.s32.totalorder %s3920_s0, %s1995_s17  ;;  %p1999_p1 = scmp.lt.u32.totalorder %s1995_s17, %s3920_s0 }
   0x4   :  { %p2001_p2 = pnand %p1999_p1, %p1996_p0 }
   0x6   :  { %2004 = shalt.err (!%p2001_p2)  }
   0x7   :  { %s2993_s22 = smov [#allocation5]  }
   0x8   :  { %10 = dma.hbm_to_smem %s3920_s0, 64, %s2993_s22, [#allocation4] }
   0x9   :  { %2961 = dma.done.wait [#allocation4], 64 }
   0xa   :  { %2962 = vsyncadd [#allocation4], 4294967232 }
   0xb   :  { %12 = sfence }
   0xc   :  { %13 = vsyncpa [#allocation7], 0 }
   0xd   :  { %14 = vsyncpa [#allocation8], 0 }
   0xe   :  { %16 = vsyncpa [#allocation8 + $0x1], 0  ;;  %s3070_s25 = smov 0   ;;  %s3072_s26 = smov 0  }
   0xf   :  { %s3074_s27 = smov 0   ;;  %s3076_s28 = smov 0  }
  0x10 LB: > { %3937 = sst [smem:[#allocation92_spill]] %s2975_s25  ;;  %s3091_s0 = sadd.s32 4294967295, %s2987_s28   ;;  %s2987_s28 = sphi %s3076_s28, %s3960_s28   ;;  %s2983_s27 = sphi %s3074_s27, %s3962_s27   ;;  %s2979_s26 = sphi %s3072_s26, %s3964_s26   ;;  %s2975_s25 = sphi %s3070_s25, %s3963_s25  }
  0x11   : > { %3938 = sst [smem:[#allocation93_spill]] %s2983_s27  ;;  %s1638_s29 = sadd.s32 4294967294, %s2987_s28  }
  0x12   : > { %3939 = sst [smem:[#allocation94_spill]] %s2987_s28  ;;  %s3095_s30 = sadd.s32 1, %s2987_s28  }
  0x13   : > { %3940 = sst [smem:[#allocation95_spill]] %s3095_s30  ;;  %s71_s5 = sadd.s32 1, %s2983_s27 }
  0x14   : > { %s68_s6 = ssub.s32 %s2987_s28, %s3095_s30  ;;  %p81_p3 = scmp.ne.s32.totalorder %s2983_s27, %s2979_s26 }
  0x15   : > { %p69_p4 = scmp.eq.s32.totalorder %s68_s6, 0  ;;  %p82_p5 = scmp.eq.s32.totalorder %s3091_s0, 3 }
  0x16   : > { %p87_p6 = scmp.ne.s32.totalorder %s2979_s26, %s2975_s25  ;;  %p88_p7 = scmp.eq.s32.totalorder %s1638_s29, 3 }
  0x17   : > { %s3106_s7 = scalar_select %p69_p4, %s2983_s27, %s71_s5  }
  0x18   : > { %p3108_p8 = por %p82_p5, %p81_p3  ;;  %p3112_p9 = por %p88_p7, %p87_p6 }
  0x19   : > { %3941 = sst [smem:[#allocation96_spill]] %s3106_s7  ;;  %p1639_p10 = scmp.ge.s32.totalorder %s2987_s28, 1 }
  0x1a   : > { %s3942_s8 = scalar_select %p3108_p8, 1, 0 }
  0x1b   : > { %s3943_s9 = scalar_select %p3112_p9, 1, 0 }
  0x1c   : > { %p95_p11 = scmp.lt.s32.totalorder %s2987_s28, 5  ;;  %p3925_p12 = scmp.eq.s32.totalorder %s3091_s0, 0 }
  0x1d   : > { %3944 = sst [smem:[#allocation97_spill]] %s3943_s9  ;;  %s2994_s11 = smov [#allocation6]  }
  0x1e   : > { %p3119_p13 = pnand %p1639_p10, %p95_p11  ;;  %s107_s12 = sshll.u32 %s2994_s11, 4  ;;  %s108_s12 = int_to_ptr.vmem [resolvable:$true] %s107_s12 }
  0x1f   : > { %s3947_s1 = sld [smem:[#allocation99_spill]] }
  0x20   : > { %s3945_s10 = scalar_select %p3119_p13, 1, 0 }
  0x21   : > { %p1808_p0 = pneg %p3119_p13 }
  0x23   : > { %p3127_p1 = pnand %p3925_p12, %p1808_p0 }
  0x25   : > { %s2005_s16 = scalar_lea.hbm %s3947_s1, 8192  ;;  %p2007_p3 = pneg %p3127_p1 }
  0x26   : > { %p2006_p2 = scmp.ne.s32.totalorder %s3947_s1, %s2005_s16  ;;  %p2012_p6 = scmp.lt.u32.totalorder %s2005_s16, %s3947_s1 }
  0x28   : > { %p2008_p4 = pnand %p2007_p3, %p2006_p2 }
  0x2a   : > { %p2009_p5 = pneg %p2008_p4 }
  0x2c   : > { %p2014_p7 = pnand %p2012_p6, %p2009_p5 }
  0x2e   : > { %2017 = shalt.err (!%p2014_p7)
}
  0x2f   : > { %s2018_s21 = scalar_lea.vmem %s108_s12, 8192  ;;  %p2026_p12 = scmp.lt.s32.totalorder %s108_s12, %s108_s12 }
  0x30   : > { %p2019_p10 = scmp.ne.s32.totalorder %s108_s12, %s2018_s21  ;;  %p2027_p9 = scmp.lt.s32.totalorder %s2018_s21, %s2018_s21 }
  0x32   : > { %p2021_p11 = pnand %p2019_p10, %p2007_p3  ;;  %p2028_p8 = por %p2027_p9, %p2026_p12 }
  0x34   : > { %p2022_p0 = pneg %p2021_p11 }
  0x36   : > { %p2029_p13 = pnand %p2028_p8, %p2022_p0 }
  0x38   : > { %2032 = shalt.err (!%p2029_p13)
}
  0x39   : > { %s2995_s22 = smov 128   ;;  %s2996_s23 = smov 8  }
  0x3a   : > { %1811 = dma.hbm_to_vmem [thread:$0]  (!%p3127_p1), %s3947_s1, 8192, %s108_s12, [#allocation7], %s2995_s22, %s2995_s22, %s2996_s23  }
  0x3b   : > { %p3948_p2 = scmp.ne.s32.totalorder %s3945_s10, 0 }
  0x3d   : > { %126 = sbr.rel (%p3948_p2) target bundleno = 1219 (0x4c3), region = 28 }
  0x44   : > { %p3949_p4 = scmp.eq.s32.totalorder %s3091_s0, 0 }
  0x46   : > { %2964 = dma.done.wait (%p3949_p4), [#allocation7], 8192   ;;  %p3950_p3 = pmov %p3949_p4 }
  0x47   : > { %s3928_s5 = sand.u32 1, %s2979_s26   ;;  %s3155_s6 = sshll.u32 %s3091_s0, 7 }
  0x48   : > { %2966 = vsyncadd (%p3950_p3), [#allocation7], 4294959104  ;;  %3951 = sst [smem:[#allocation98_spill]] %s3155_s6  ;;  %s3159_s11 = sshll.u32 %s3928_s5, 6 }
  0x49   : > { %s146_s10 = sld [smem:[#allocation5 + %s3155_s6]]  ;;  %s2997_s12 = smov [#allocation2]  }
  0x4a   : > { %s156_s13 = sshll.u32 %s2997_s12, 4  ;;  %s160_s14 = sadd.s32 1, %s3155_s6  ;;  %s3163_s13 = int_to_ptr.vmem [resolvable:$true] %s156_s13 }
  0x4b   : > { %s3165_s15 = sld [smem:[#allocation5 + %s160_s14]]  ;;  %s176_s16 = sadd.s32 2, %s3155_s6 }
  0x4c   : > { %s2998_s17 = smov [#allocation2 + $0x20]   ;;  %s3168_s19 = sld [smem:[#allocation5 + %s176_s16]] }
  0x4d   : > { %s172_s18 = sshll.u32 %s2998_s17, 4  ;;  %s3178_s5 = scalar_lea.hbm %s3923_s3, 8192  ;;  %s3170_s18 = int_to_ptr.vmem [resolvable:$true] %s172_s18 }
  0x4f   : > { %s1645_s20 = sshll.u32 %s146_s10, 4 }
  0x50   : > { %s148_s23 = scalar_lea.hbm %s3923_s3, %s1645_s20 }
  0x51   : > { %s2033_s24 = scalar_lea.hbm %s148_s23, 16  ;;  %p2036_p9 = scmp.lt.u32.totalorder %s148_s23, %s3923_s3 }
  0x52   : > { %p2034_p8 = scmp.ne.s32.totalorder %s148_s23, %s2033_s24  ;;  %p2037_p12 = scmp.lt.u32.totalorder %s3178_s5, %s2033_s24 }
  0x53   : > { %p2039_p1 = scmp.lt.u32.totalorder %s2033_s24, %s148_s23 }
  0x54   : > { %p2038_p13 = por %p2037_p12, %p2036_p9 }
  0x56   : > { %p2040_p5 = por %p2039_p1, %p2038_p13 }
  0x58   : > { %p2041_p6 = pnand %p2040_p5, %p2034_p8 }
  0x5a   : > { %2044 = shalt.err (!%p2041_p6)  }
  0x5b   : > { %s2045_s10 = scalar_lea.vmem %s3163_s13, 16  ;;  %s3187_s16 = scalar_lea.vmem %s3163_s13, 2048 }
  0x5c   : > { %p2046_p7 = scmp.ne.s32.totalorder %s3163_s13, %s2045_s10  ;;  %p2050_p10 = scmp.lt.s32.totalorder %s3163_s13, %s3163_s13 }
  0x5d   : > { %p2051_p11 = scmp.lt.s32.totalorder %s3187_s16, %s2045_s10 }
  0x5f   : > { %p2052_p0 = por %p2051_p11, %p2050_p10 }
  0x61   : > { %p2053_p2 = pnand %p2052_p0, %p2046_p7 }
  0x63   : > { %2056 = shalt.err (!%p2053_p2)  }
  0x64   : > { %159 = dma.hbm_to_vmem [thread:$0]  %s148_s23, 16, %s3163_s13, [#allocation3] }
  0x65   : > { %s1646_s1 = sshll.u32 %s3165_s15, 4  ;;  %s2999_s17 = smov [#allocation2 + $0x40]  }
  0x66   : > { %s188_s20 = sshll.u32 %s2999_s17, 4  ;;  %s163_s24 = scalar_lea.hbm %s3923_s3, %s1646_s1  ;;  %s3197_s20 = int_to_ptr.vmem [resolvable:$true] %s188_s20 }
  0x67   : > { %s2057_s29 = scalar_lea.hbm %s163_s24, 16  ;;  %p2060_p3 = scmp.lt.u32.totalorder %s163_s24, %s3923_s3 }
  0x68   : > { %p2058_p4 = scmp.ne.s32.totalorder %s163_s24, %s2057_s29  ;;  %p2061_p8 = scmp.lt.u32.totalorder %s3178_s5, %s2057_s29 }
  0x69   : > { %p2063_p12 = scmp.lt.u32.totalorder %s2057_s29, %s163_s24 }
  0x6a   : > { %p2062_p9 = por %p2061_p8, %p2060_p3 }
  0x6c   : > { %p2064_p13 = por %p2063_p12, %p2062_p9 }
  0x6e   : > { %p2065_p1 = pnand %p2064_p13, %p2058_p4 }
  0x70   : > { %2068 = shalt.err (!%p2065_p1)  }
  0x71   : > { %s2069_s15 = scalar_lea.vmem %s3170_s18, 16  ;;  %p2074_p6 = scmp.lt.s32.totalorder %s3170_s18, %s3163_s13 }
  0x72   : > { %p2070_p5 = scmp.ne.s32.totalorder %s3170_s18, %s2069_s15  ;;  %p2075_p7 = scmp.lt.s32.totalorder %s3187_s16, %s2069_s15 }
  0x74   : > { %p2076_p10 = por %p2075_p7, %p2074_p6 }
  0x76   : > { %p2077_p11 = pnand %p2076_p10, %p2070_p5 }
  0x78   : > { %2080 = shalt.err (!%p2077_p11)  }
  0x79   : > { %175 = dma.hbm_to_vmem [thread:$0]  %s163_s24, 16, %s3170_s18, [#allocation3] }
  0x7a   : > { %s1647_s23 = sshll.u32 %s3168_s19, 4  ;;  %s192_s10 = sadd.s32 3, %s3155_s6 }
  0x7b   : > { %s179_s21 = scalar_lea.hbm %s3923_s3, %s1647_s23  ;;  %s3214_s22 = sld [smem:[#allocation5 + %s192_s10]] }
  0x7c   : > { %s2081_s29 = scalar_lea.hbm %s179_s21, 16  ;;  %p2084_p2 = scmp.lt.u32.totalorder %s179_s21, %s3923_s3 }
  0x7d   : > { %p2082_p0 = scmp.ne.s32.totalorder %s179_s21, %s2081_s29  ;;  %p2085_p4 = scmp.lt.u32.totalorder %s3178_s5, %s2081_s29 }
  0x7e   : > { %p2087_p8 = scmp.lt.u32.totalorder %s2081_s29, %s179_s21 }
  0x7f   : > { %p2086_p3 = por %p2085_p4, %p2084_p2 }
  0x81   : > { %p2088_p9 = por %p2087_p8, %p2086_p3 }
  0x83   : > { %p2089_p12 = pnand %p2088_p9, %p2082_p0 }
  0x85   : > { %2092 = shalt.err (!%p2089_p12)  }
  0x86   : > { %s2093_s18 = scalar_lea.vmem %s3197_s20, 16  ;;  %p2098_p1 = scmp.lt.s32.totalorder %s3197_s20, %s3163_s13 }
  0x87   : > { %p2094_p13 = scmp.ne.s32.totalorder %s3197_s20, %s2093_s18  ;;  %p2099_p5 = scmp.lt.s32.totalorder %s3187_s16, %s2093_s18 }
  0x89   : > { %p2100_p6 = por %p2099_p5, %p2098_p1 }
  0x8b   : > { %p2101_p7 = pnand %p2100_p6, %p2094_p13 }
  0x8d   : > { %2104 = shalt.err (!%p2101_p7)  }
  0x8e   : > { %191 = dma.hbm_to_vmem [thread:$0]  %s179_s21, 16, %s3197_s20, [#allocation3] }
  0x8f   : > { %s208_s19 = sadd.s32 4, %s3155_s6  ;;  %s3000_s24 = smov [#allocation2 + $0x60]  }
  0x90   : > { %s204_s15 = sshll.u32 %s3000_s24, 4  ;;  %s209_s23 = sld [smem:[#allocation5 + %s208_s19]]  ;;  %s205_s15 = int_to_ptr.vmem [resolvable:$true] %s204_s15 }
  0x91   : > { %s3001_s10 = smov [#allocation2 + $0x1]   ;;  %s225_s17 = sadd.s32 5, %s3155_s6 }
  0x92   : > { %s221_s1 = sshll.u32 %s3001_s10, 4  ;;  %s1648_s29 = sshll.u32 %s3214_s22, 4  ;;  %s3229_s1 = int_to_ptr.vmem [resolvable:$true] %s221_s1 }
  0x93   : > { %s195_s18 = scalar_lea.hbm %s3923_s3, %s1648_s29  ;;  %s3234_s7 = sld [smem:[#allocation5 + %s225_s17]] }
  0x94   : > { %s2105_s27 = scalar_lea.hbm %s195_s18, 16  ;;  %p2108_p11 = scmp.lt.u32.totalorder %s195_s18, %s3923_s3 }
  0x95   : > { %p2106_p10 = scmp.ne.s32.totalorder %s195_s18, %s2105_s27  ;;  %p2109_p0 = scmp.lt.u32.totalorder %s3178_s5, %s2105_s27 }
  0x96   : > { %p2111_p4 = scmp.lt.u32.totalorder %s2105_s27, %s195_s18 }
  0x97   : > { %p2110_p2 = por %p2109_p0, %p2108_p11 }
  0x99   : > { %p2112_p3 = por %p2111_p4, %p2110_p2 }
  0x9b   : > { %p2113_p8 = pnand %p2112_p3, %p2106_p10 }
  0x9d   : > { %2116 = shalt.err (!%p2113_p8)  }
  0x9e   : > { %s2117_s22 = scalar_lea.vmem %s205_s15, 16  ;;  %p2122_p12 = scmp.lt.s32.totalorder %s205_s15, %s3163_s13 }
  0x9f   : > { %p2118_p9 = scmp.ne.s32.totalorder %s205_s15, %s2117_s22  ;;  %p2123_p13 = scmp.lt.s32.totalorder %s3187_s16, %s2117_s22 }
  0xa1   : > { %p2124_p1 = por %p2123_p13, %p2122_p12 }
  0xa3   : > { %p2125_p5 = pnand %p2124_p1, %p2118_p9 }
  0xa5   : > { %2128 = shalt.err (!%p2125_p5)  }
  0xa6   : > { %207 = dma.hbm_to_vmem [thread:$0]  %s195_s18, 16, %s205_s15, [#allocation3] }
  0xa7   : > { %s1649_s19 = sshll.u32 %s209_s23, 4  ;;  %s3002_s27 = smov [#allocation2 + $0x21]  }
  0xa8   : > { %s211_s17 = scalar_lea.hbm %s3923_s3, %s1649_s19  ;;  %s237_s29 = sshll.u32 %s3002_s27, 4  ;;  %s238_s29 = int_to_ptr.vmem [resolvable:$true] %s237_s29 }
  0xa9   : > { %s2129_s12 = scalar_lea.hbm %s211_s17, 16  ;;  %p2132_p7 = scmp.lt.u32.totalorder %s211_s17, %s3923_s3 }
  0xaa   : > { %p2130_p6 = scmp.ne.s32.totalorder %s211_s17, %s2129_s12  ;;  %p2133_p10 = scmp.lt.u32.totalorder %s3178_s5, %s2129_s12 }
  0xab   : > { %p2135_p0 = scmp.lt.u32.totalorder %s2129_s12, %s211_s17 }
  0xac   : > { %p2134_p11 = por %p2133_p10, %p2132_p7 }
  0xae   : > { %p2136_p2 = por %p2135_p0, %p2134_p11 }
  0xb0   : > { %p2137_p4 = pnand %p2136_p2, %p2130_p6 }
  0xb2   : > { %2140 = shalt.err (!%p2137_p4)  }
  0xb3   : > { %s2141_s15 = scalar_lea.vmem %s3229_s1, 16  ;;  %p2146_p8 = scmp.lt.s32.totalorder %s3229_s1, %s3163_s13 }
  0xb4   : > { %p2142_p3 = scmp.ne.s32.totalorder %s3229_s1, %s2141_s15  ;;  %p2147_p9 = scmp.lt.s32.totalorder %s3187_s16, %s2141_s15 }
  0xb6   : > { %p2148_p12 = por %p2147_p9, %p2146_p8 }
  0xb8   : > { %p2149_p13 = pnand %p2148_p12, %p2142_p3 }
  0xba   : > { %2152 = shalt.err (!%p2149_p13)  }
  0xbb   : > { %224 = dma.hbm_to_vmem [thread:$0]  %s211_s17, 16, %s3229_s1, [#allocation3 + $0x1] }
  0xbc   : > { %s241_s23 = sadd.s32 6, %s3155_s6  ;;  %s1650_s18 = sshll.u32 %s3234_s7, 4 }
  0xbd   : > { %s3257_s21 = sld [smem:[#allocation5 + %s241_s23]]  ;;  %s228_s24 = scalar_lea.hbm %s3923_s3, %s1650_s18 }
  0xbe   : > { %s2153_s10 = scalar_lea.hbm %s228_s24, 16  ;;  %p2156_p5 = scmp.lt.u32.totalorder %s228_s24, %s3923_s3 }
  0xbf   : > { %p2154_p1 = scmp.ne.s32.totalorder %s228_s24, %s2153_s10  ;;  %p2157_p6 = scmp.lt.u32.totalorder %s3178_s5, %s2153_s10 }
  0xc0   : > { %p2159_p10 = scmp.lt.u32.totalorder %s2153_s10, %s228_s24 }
  0xc1   : > { %p2158_p7 = por %p2157_p6, %p2156_p5 }
  0xc3   : > { %p2160_p11 = por %p2159_p10, %p2158_p7 }
  0xc5   : > { %p2161_p0 = pnand %p2160_p11, %p2154_p1 }
  0xc7   : > { %2164 = shalt.err (!%p2161_p0)  }
  0xc8   : > { %s2165_s1 = scalar_lea.vmem %s238_s29, 16  ;;  %p2170_p4 = scmp.lt.s32.totalorder %s238_s29, %s3163_s13 }
  0xc9   : > { %p2166_p2 = scmp.ne.s32.totalorder %s238_s29, %s2165_s1  ;;  %p2171_p3 = scmp.lt.s32.totalorder %s3187_s16, %s2165_s1 }
  0xcb   : > { %p2172_p8 = por %p2171_p3, %p2170_p4 }
  0xcd   : > { %p2173_p9 = pnand %p2172_p8, %p2166_p2 }
  0xcf   : > { %2176 = shalt.err (!%p2173_p9)  }
  0xd0   : > { %240 = dma.hbm_to_vmem [thread:$0]  %s228_s24, 16, %s238_s29, [#allocation3 + $0x1] }
  0xd1   : > { %s3003_s7 = smov [#allocation2 + $0x41]   ;;  %s257_s14 = sadd.s32 7, %s3155_s6 }
  0xd2   : > { %s253_s17 = sshll.u32 %s3003_s7, 4  ;;  %s3269_s20 = sld [smem:[#allocation5 + %s257_s14]]  ;;  %s254_s17 = int_to_ptr.vmem [resolvable:$true] %s253_s17 }
  0xd3   : > { %s273_s15 = sadd.s32 8, %s3155_s6  ;;  %s1651_s23 = sshll.u32 %s3257_s21, 4 }
  0xd4   : > { %s3004_s18 = smov [#allocation2 + $0x61]   ;;  %s244_s27 = scalar_lea.hbm %s3923_s3, %s1651_s23 }
  0xd5   : > { %s269_s22 = sshll.u32 %s3004_s18, 4  ;;  %s2177_s29 = scalar_lea.hbm %s244_s27, 16  ;;  %s3276_s22 = int_to_ptr.vmem [resolvable:$true] %s269_s22 }
  0xd6   : > { %p2178_p12 = scmp.ne.s32.totalorder %s244_s27, %s2177_s29  ;;  %p2180_p13 = scmp.lt.u32.totalorder %s244_s27, %s3923_s3 }
  0xd7   : > { %p2181_p1 = scmp.lt.u32.totalorder %s3178_s5, %s2177_s29  ;;  %p2183_p6 = scmp.lt.u32.totalorder %s2177_s29, %s244_s27 }
  0xd9   : > { %p2182_p5 = por %p2181_p1, %p2180_p13 }
  0xdb   : > { %p2184_p7 = por %p2183_p6, %p2182_p5 }
  0xdd   : > { %p2185_p10 = pnand %p2184_p7, %p2178_p12 }
  0xdf   : > { %2188 = shalt.err (!%p2185_p10)  }
  0xe0   : > { %s2189_s21 = scalar_lea.vmem %s254_s17, 16  ;;  %p2194_p0 = scmp.lt.s32.totalorder %s254_s17, %s3163_s13 }
  0xe1   : > { %p2190_p11 = scmp.ne.s32.totalorder %s254_s17, %s2189_s21  ;;  %p2195_p2 = scmp.lt.s32.totalorder %s3187_s16, %s2189_s21 }
  0xe3   : > { %p2196_p4 = por %p2195_p2, %p2194_p0 }
  0xe5   : > { %p2197_p3 = pnand %p2196_p4, %p2190_p11 }
  0xe7   : > { %2200 = shalt.err (!%p2197_p3)  }
  0xe8   : > { %256 = dma.hbm_to_vmem [thread:$0]  %s244_s27, 16, %s254_s17, [#allocation3 + $0x1] }
  0xe9   : > { %s3284_s1 = sld [smem:[#allocation5 + %s273_s15]]  ;;  %s1652_s7 = sshll.u32 %s3269_s20, 4 }
  0xea   : > { %s3005_s14 = smov [#allocation2 + $0x2]   ;;  %s260_s10 = scalar_lea.hbm %s3923_s3, %s1652_s7 }
  0xeb   : > { %s286_s23 = sshll.u32 %s3005_s14, 4  ;;  %s2201_s29 = scalar_lea.hbm %s260_s10, 16  ;;  %s3290_s23 = int_to_ptr.vmem [resolvable:$true] %s286_s23 }
  0xec   : > { %p2202_p8 = scmp.ne.s32.totalorder %s260_s10, %s2201_s29  ;;  %p2204_p9 = scmp.lt.u32.totalorder %s260_s10, %s3923_s3 }
  0xed   : > { %p2205_p12 = scmp.lt.u32.totalorder %s3178_s5, %s2201_s29  ;;  %p2207_p1 = scmp.lt.u32.totalorder %s2201_s29, %s260_s10 }
  0xef   : > { %p2206_p13 = por %p2205_p12, %p2204_p9 }
  0xf1   : > { %p2208_p5 = por %p2207_p1, %p2206_p13 }
  0xf3   : > { %p2209_p6 = pnand %p2208_p5, %p2202_p8 }
  0xf5   : > { %2212 = shalt.err (!%p2209_p6)  }
  0xf6   : > { %s2213_s17 = scalar_lea.vmem %s3276_s22, 16  ;;  %p2218_p10 = scmp.lt.s32.totalorder %s3276_s22, %s3163_s13 }
  0xf7   : > { %p2214_p7 = scmp.ne.s32.totalorder %s3276_s22, %s2213_s17  ;;  %p2219_p11 = scmp.lt.s32.totalorder %s3187_s16, %s2213_s17 }
  0xf9   : > { %p2220_p0 = por %p2219_p11, %p2218_p10 }
  0xfb   : > { %p2221_p2 = pnand %p2220_p0, %p2214_p7 }
  0xfd   : > { %2224 = shalt.err (!%p2221_p2)  }
  0xfe   : > { %272 = dma.hbm_to_vmem [thread:$0]  %s260_s10, 16, %s3276_s22, [#allocation3 + $0x1] }
  0xff   : > { %s290_s20 = sadd.s32 9, %s3155_s6  ;;  %s3006_s27 = smov [#allocation2 + $0x22]  }
 0x100   : > { %s3303_s15 = sld [smem:[#allocation5 + %s290_s20]]  ;;  %s302_s21 = sshll.u32 %s3006_s27, 4  ;;  %s3306_s21 = int_to_ptr.vmem [resolvable:$true] %s302_s21 }
 0x101   : > { %s1653_s7 = sshll.u32 %s3284_s1, 4  ;;  %s306_s29 = sadd.s32 10, %s3155_s6 }
 0x102   : > { %s276_s19 = scalar_lea.hbm %s3923_s3, %s1653_s7 }
 0x103   : > { %s2225_s24 = scalar_lea.hbm %s276_s19, 16  ;;  %p2228_p3 = scmp.lt.u32.totalorder %s276_s19, %s3923_s3 }
 0x104   : > { %p2226_p4 = scmp.ne.s32.totalorder %s276_s19, %s2225_s24  ;;  %p2229_p8 = scmp.lt.u32.totalorder %s3178_s5, %s2225_s24 }
 0x105   : > { %p2231_p12 = scmp.lt.u32.totalorder %s2225_s24, %s276_s19 }
 0x106   : > { %p2230_p9 = por %p2229_p8, %p2228_p3 }
 0x108   : > { %p2232_p13 = por %p2231_p12, %p2230_p9 }
 0x10a   : > { %p2233_p1 = pnand %p2232_p13, %p2226_p4 }
 0x10c   : > { %2236 = shalt.err (!%p2233_p1)  }
 0x10d   : > { %s2237_s22 = scalar_lea.vmem %s3290_s23, 16  ;;  %p2242_p6 = scmp.lt.s32.totalorder %s3290_s23, %s3163_s13 }
 0x10e   : > { %p2238_p5 = scmp.ne.s32.totalorder %s3290_s23, %s2237_s22  ;;  %p2243_p7 = scmp.lt.s32.totalorder %s3187_s16, %s2237_s22 }
 0x110   : > { %p2244_p10 = por %p2243_p7, %p2242_p6 }
 0x112   : > { %p2245_p11 = pnand %p2244_p10, %p2238_p5 }
 0x114   : > { %2248 = shalt.err (!%p2245_p11)  }
 0x115   : > { %289 = dma.hbm_to_vmem [thread:$0]  %s276_s19, 16, %s3290_s23, [#allocation3 + $0x2] }
 0x116   : > { %s3322_s1 = sld [smem:[#allocation5 + %s306_s29]]  ;;  %s3007_s10 = smov [#allocation2 + $0x42]  }
 0x117   : > { %s318_s20 = sshll.u32 %s3007_s10, 4  ;;  %s322_s27 = sadd.s32 11, %s3155_s6  ;;  %s3326_s20 = int_to_ptr.vmem [resolvable:$true] %s318_s20 }
 0x118   : > { %s1654_s7 = sshll.u32 %s3303_s15, 4  ;;  %s3331_s12 = sld [smem:[#allocation5 + %s322_s27]] }
 0x119   : > { %s293_s24 = scalar_lea.hbm %s3923_s3, %s1654_s7 }
 0x11a   : > { %s2249_s17 = scalar_lea.hbm %s293_s24, 16  ;;  %p2252_p2 = scmp.lt.u32.totalorder %s293_s24, %s3923_s3 }
 0x11b   : > { %p2250_p0 = scmp.ne.s32.totalorder %s293_s24, %s2249_s17  ;;  %p2253_p4 = scmp.lt.u32.totalorder %s3178_s5, %s2249_s17 }
 0x11c   : > { %p2255_p8 = scmp.lt.u32.totalorder %s2249_s17, %s293_s24 }
 0x11d   : > { %p2254_p3 = por %p2253_p4, %p2252_p2 }
 0x11f   : > { %p2256_p9 = por %p2255_p8, %p2254_p3 }
 0x121   : > { %p2257_p12 = pnand %p2256_p9, %p2250_p0 }
 0x123   : > { %2260 = shalt.err (!%p2257_p12)  }
 0x124   : > { %s2261_s23 = scalar_lea.vmem %s3306_s21, 16  ;;  %p2266_p1 = scmp.lt.s32.totalorder %s3306_s21, %s3163_s13 }
 0x125   : > { %p2262_p13 = scmp.ne.s32.totalorder %s3306_s21, %s2261_s23  ;;  %p2267_p5 = scmp.lt.s32.totalorder %s3187_s16, %s2261_s23 }
 0x127   : > { %p2268_p6 = por %p2267_p5, %p2266_p1 }
 0x129   : > { %p2269_p7 = pnand %p2268_p6, %p2262_p13 }
 0x12b   : > { %2272 = shalt.err (!%p2269_p7)  }
 0x12c   : > { %305 = dma.hbm_to_vmem [thread:$0]  %s293_s24, 16, %s3306_s21, [#allocation3 + $0x2] }
 0x12d   : > { %s338_s30 = sadd.s32 12, %s3155_s6  ;;  %s1655_s15 = sshll.u32 %s3322_s1, 4 }
 0x12e   : > { %s3008_s19 = smov [#allocation2 + $0x62]   ;;  %s309_s7 = scalar_lea.hbm %s3923_s3, %s1655_s15 }
 0x12f   : > { %s334_s29 = sshll.u32 %s3008_s19, 4  ;;  %s2273_s14 = scalar_lea.hbm %s309_s7, 16  ;;  %s3348_s29 = int_to_ptr.vmem [resolvable:$true] %s334_s29 }
 0x130   : > { %p2274_p10 = scmp.ne.s32.totalorder %s309_s7, %s2273_s14  ;;  %p2276_p11 = scmp.lt.u32.totalorder %s309_s7, %s3923_s3 }
 0x131   : > { %p2277_p0 = scmp.lt.u32.totalorder %s3178_s5, %s2273_s14  ;;  %p2279_p4 = scmp.lt.u32.totalorder %s2273_s14, %s309_s7 }
 0x133   : > { %p2278_p2 = por %p2277_p0, %p2276_p11 }
 0x135   : > { %p2280_p3 = por %p2279_p4, %p2278_p2 }
 0x137   : > { %p2281_p8 = pnand %p2280_p3, %p2274_p10 }
 0x139   : > { %2284 = shalt.err (!%p2281_p8)  }
 0x13a   : > { %s2285_s21 = scalar_lea.vmem %s3326_s20, 16  ;;  %p2290_p12 = scmp.lt.s32.totalorder %s3326_s20, %s3163_s13 }
 0x13b   : > { %p2286_p9 = scmp.ne.s32.totalorder %s3326_s20, %s2285_s21  ;;  %p2291_p13 = scmp.lt.s32.totalorder %s3187_s16, %s2285_s21 }
 0x13d   : > { %p2292_p1 = por %p2291_p13, %p2290_p12 }
 0x13f   : > { %p2293_p5 = pnand %p2292_p1, %p2286_p9 }
 0x141   : > { %2296 = shalt.err (!%p2293_p5)  }
 0x142   : > { %321 = dma.hbm_to_vmem [thread:$0]  %s309_s7, 16, %s3326_s20, [#allocation3 + $0x2] }
 0x143   : > { %s1656_s1 = sshll.u32 %s3331_s12, 4  ;;  %s3361_s24 = sld [smem:[#allocation5 + %s338_s30]] }
 0x144   : > { %s325_s15 = scalar_lea.hbm %s3923_s3, %s1656_s1 }
 0x145   : > { %s2297_s19 = scalar_lea.hbm %s325_s15, 16  ;;  %p2300_p7 = scmp.lt.u32.totalorder %s325_s15, %s3923_s3 }
 0x146   : > { %p2298_p6 = scmp.ne.s32.totalorder %s325_s15, %s2297_s19  ;;  %p2301_p10 = scmp.lt.u32.totalorder %s3178_s5, %s2297_s19 }
 0x147   : > { %p2303_p0 = scmp.lt.u32.totalorder %s2297_s19, %s325_s15 }
 0x148   : > { %p2302_p11 = por %p2301_p10, %p2300_p7 }
 0x14a   : > { %p2304_p2 = por %p2303_p0, %p2302_p11 }
 0x14c   : > { %p2305_p4 = pnand %p2304_p2, %p2298_p6 }
 0x14e   : > { %2308 = shalt.err (!%p2305_p4)  }
 0x14f   : > { %s2309_s20 = scalar_lea.vmem %s3348_s29, 16  ;;  %p2314_p8 = scmp.lt.s32.totalorder %s3348_s29, %s3163_s13 }
 0x150   : > { %p2310_p3 = scmp.ne.s32.totalorder %s3348_s29, %s2309_s20  ;;  %p2315_p9 = scmp.lt.s32.totalorder %s3187_s16, %s2309_s20 }
 0x152   : > { %p2316_p12 = por %p2315_p9, %p2314_p8 }
 0x154   : > { %p2317_p13 = pnand %p2316_p12, %p2310_p3 }
 0x156   : > { %2320 = shalt.err (!%p2317_p13)  }
 0x157   : > { %337 = dma.hbm_to_vmem [thread:$0]  %s325_s15, 16, %s3348_s29, [#allocation3 + $0x2] }
 0x158   : > { %s3009_s12 = smov [#allocation2 + $0x3]   ;;  %s355_s7 = sadd.s32 13, %s3155_s6 }
 0x159   : > { %s351_s30 = sshll.u32 %s3009_s12, 4  ;;  %s3377_s14 = sld [smem:[#allocation5 + %s355_s7]]  ;;  %s352_s30 = int_to_ptr.vmem [resolvable:$true] %s351_s30 }
 0x15a   : > { %s371_s18 = sadd.s32 14, %s3155_s6  ;;  %s1657_s17 = sshll.u32 %s3361_s24, 4 }
 0x15b   : > { %s3010_s21 = smov [#allocation2 + $0x23]   ;;  %s341_s19 = scalar_lea.hbm %s3923_s3, %s1657_s17 }
 0x15c   : > { %s367_s1 = sshll.u32 %s3010_s21, 4  ;;  %s2321_s10 = scalar_lea.hbm %s341_s19, 16  ;;  %s3384_s1 = int_to_ptr.vmem [resolvable:$true] %s367_s1 }
 0x15d   : > { %p2322_p1 = scmp.ne.s32.totalorder %s341_s19, %s2321_s10  ;;  %p2324_p5 = scmp.lt.u32.totalorder %s341_s19, %s3923_s3 }
 0x15e   : > { %p2325_p6 = scmp.lt.u32.totalorder %s3178_s5, %s2321_s10  ;;  %p2327_p10 = scmp.lt.u32.totalorder %s2321_s10, %s341_s19 }
 0x160   : > { %p2326_p7 = por %p2325_p6, %p2324_p5 }
 0x162   : > { %p2328_p11 = por %p2327_p10, %p2326_p7 }
 0x164   : > { %p2329_p0 = pnand %p2328_p11, %p2322_p1 }
 0x166   : > { %2332 = shalt.err (!%p2329_p0)  }
 0x167   : > { %s2333_s24 = scalar_lea.vmem %s352_s30, 16  ;;  %p2338_p4 = scmp.lt.s32.totalorder %s352_s30, %s3163_s13 }
 0x168   : > { %p2334_p2 = scmp.ne.s32.totalorder %s352_s30, %s2333_s24  ;;  %p2339_p3 = scmp.lt.s32.totalorder %s3187_s16, %s2333_s24 }
 0x16a   : > { %p2340_p8 = por %p2339_p3, %p2338_p4 }
 0x16c   : > { %p2341_p9 = pnand %p2340_p8, %p2334_p2 }
 0x16e   : > { %2344 = shalt.err (!%p2341_p9)  }
 0x16f   : > { %354 = dma.hbm_to_vmem [thread:$0]  %s341_s19, 16, %s352_s30, [#allocation3 + $0x3] }
 0x170   : > { %s3392_s15 = sld [smem:[#allocation5 + %s371_s18]]  ;;  %s1658_s20 = sshll.u32 %s3377_s14, 4 }
 0x171   : > { %s3011_s12 = smov [#allocation2 + $0x43]   ;;  %s358_s22 = scalar_lea.hbm %s3923_s3, %s1658_s20 }
 0x172   : > { %s383_s7 = sshll.u32 %s3011_s12, 4  ;;  %s2345_s23 = scalar_lea.hbm %s358_s22, 16  ;;  %s3398_s7 = int_to_ptr.vmem [resolvable:$true] %s383_s7 }
 0x173   : > { %p2346_p12 = scmp.ne.s32.totalorder %s358_s22, %s2345_s23  ;;  %p2348_p13 = scmp.lt.u32.totalorder %s358_s22, %s3923_s3 }
 0x174   : > { %p2349_p1 = scmp.lt.u32.totalorder %s3178_s5, %s2345_s23  ;;  %p2351_p6 = scmp.lt.u32.totalorder %s2345_s23, %s358_s22 }
 0x176   : > { %p2350_p5 = por %p2349_p1, %p2348_p13 }
 0x178   : > { %p2352_p7 = por %p2351_p6, %p2350_p5 }
 0x17a   : > { %p2353_p10 = pnand %p2352_p7, %p2346_p12 }
 0x17c   : > { %2356 = shalt.err (!%p2353_p10)  }
 0x17d   : > { %s2357_s30 = scalar_lea.vmem %s3384_s1, 16  ;;  %p2362_p0 = scmp.lt.s32.totalorder %s3384_s1, %s3163_s13 }
 0x17e   : > { %p2358_p11 = scmp.ne.s32.totalorder %s3384_s1, %s2357_s30  ;;  %p2363_p2 = scmp.lt.s32.totalorder %s3187_s16, %s2357_s30 }
 0x180   : > { %p2364_p4 = por %p2363_p2, %p2362_p0 }
 0x182   : > { %p2365_p3 = pnand %p2364_p4, %p2358_p11 }
 0x184   : > { %2368 = shalt.err (!%p2365_p3)  }
 0x185   : > { %370 = dma.hbm_to_vmem [thread:$0]  %s358_s22, 16, %s3384_s1, [#allocation3 + $0x3] }
 0x186   : > { %s387_s14 = sadd.s32 15, %s3155_s6  ;;  %s3012_s19 = smov [#allocation2 + $0x63]  }
 0x187   : > { %s3411_s18 = sld [smem:[#allocation5 + %s387_s14]]  ;;  %s399_s29 = sshll.u32 %s3012_s19, 4  ;;  %s3414_s29 = int_to_ptr.vmem [resolvable:$true] %s399_s29 }
 0x188   : > { %s1659_s24 = sshll.u32 %s3392_s15, 4  ;;  %s403_s21 = sadd.s32 16, %s3155_s6 }
 0x189   : > { %s374_s17 = scalar_lea.hbm %s3923_s3, %s1659_s24 }
 0x18a   : > { %s2369_s23 = scalar_lea.hbm %s374_s17, 16  ;;  %p2372_p9 = scmp.lt.u32.totalorder %s374_s17, %s3923_s3 }
 0x18b   : > { %p2370_p8 = scmp.ne.s32.totalorder %s374_s17, %s2369_s23  ;;  %p2373_p12 = scmp.lt.u32.totalorder %s3178_s5, %s2369_s23 }
 0x18c   : > { %p2375_p1 = scmp.lt.u32.totalorder %s2369_s23, %s374_s17 }
 0x18d   : > { %p2374_p13 = por %p2373_p12, %p2372_p9 }
 0x18f   : > { %p2376_p5 = por %p2375_p1, %p2374_p13 }
 0x191   : > { %p2377_p6 = pnand %p2376_p5, %p2370_p8 }
 0x193   : > { %2380 = shalt.err (!%p2377_p6)  }
 0x194   : > { %s2381_s1 = scalar_lea.vmem %s3398_s7, 16  ;;  %p2386_p10 = scmp.lt.s32.totalorder %s3398_s7, %s3163_s13 }
 0x195   : > { %p2382_p7 = scmp.ne.s32.totalorder %s3398_s7, %s2381_s1  ;;  %p2387_p11 = scmp.lt.s32.totalorder %s3187_s16, %s2381_s1 }
 0x197   : > { %p2388_p0 = por %p2387_p11, %p2386_p10 }
 0x199   : > { %p2389_p2 = pnand %p2388_p0, %p2382_p7 }
 0x19b   : > { %2392 = shalt.err (!%p2389_p2)  }
 0x19c   : > { %386 = dma.hbm_to_vmem [thread:$0]  %s374_s17, 16, %s3398_s7, [#allocation3 + $0x3] }
 0x19d   : > { %s3430_s15 = sld [smem:[#allocation5 + %s403_s21]]  ;;  %s3013_s22 = smov [#allocation2 + $0x4]  }
 0x19e   : > { %s416_s30 = sshll.u32 %s3013_s22, 4  ;;  %s420_s14 = sadd.s32 17, %s3155_s6  ;;  %s3434_s30 = int_to_ptr.vmem [resolvable:$true] %s416_s30 }
 0x19f   : > { %s1660_s19 = sshll.u32 %s3411_s18, 4  ;;  %s3439_s23 = sld [smem:[#allocation5 + %s420_s14]] }
 0x1a0   : > { %s390_s12 = scalar_lea.hbm %s3923_s3, %s1660_s19 }
 0x1a1   : > { %s2393_s10 = scalar_lea.hbm %s390_s12, 16  ;;  %p2396_p3 = scmp.lt.u32.totalorder %s390_s12, %s3923_s3 }
 0x1a2   : > { %p2394_p4 = scmp.ne.s32.totalorder %s390_s12, %s2393_s10  ;;  %p2397_p8 = scmp.lt.u32.totalorder %s3178_s5, %s2393_s10 }
 0x1a3   : > { %p2399_p12 = scmp.lt.u32.totalorder %s2393_s10, %s390_s12 }
 0x1a4   : > { %p2398_p9 = por %p2397_p8, %p2396_p3 }
 0x1a6   : > { %p2400_p13 = por %p2399_p12, %p2398_p9 }
 0x1a8   : > { %p2401_p1 = pnand %p2400_p13, %p2394_p4 }
 0x1aa   : > { %2404 = shalt.err (!%p2401_p1)  }
 0x1ab   : > { %s2405_s7 = scalar_lea.vmem %s3414_s29, 16  ;;  %p2410_p6 = scmp.lt.s32.totalorder %s3414_s29, %s3163_s13 }
 0x1ac   : > { %p2406_p5 = scmp.ne.s32.totalorder %s3414_s29, %s2405_s7  ;;  %p2411_p7 = scmp.lt.s32.totalorder %s3187_s16, %s2405_s7 }
 0x1ae   : > { %p2412_p10 = por %p2411_p7, %p2410_p6 }
 0x1b0   : > { %p2413_p11 = pnand %p2412_p10, %p2406_p5 }
 0x1b2   : > { %2416 = shalt.err (!%p2413_p11)  }
 0x1b3   : > { %402 = dma.hbm_to_vmem [thread:$0]  %s390_s12, 16, %s3414_s29, [#allocation3 + $0x3] }
 0x1b4   : > { %s436_s18 = sadd.s32 18, %s3155_s6  ;;  %s1661_s17 = sshll.u32 %s3430_s15, 4 }
 0x1b5   : > { %s3014_s21 = smov [#allocation2 + $0x24]   ;;  %s406_s24 = scalar_lea.hbm %s3923_s3, %s1661_s17 }
 0x1b6   : > { %s432_s22 = sshll.u32 %s3014_s21, 4  ;;  %s2417_s20 = scalar_lea.hbm %s406_s24, 16  ;;  %s3456_s22 = int_to_ptr.vmem [resolvable:$true] %s432_s22 }
 0x1b7   : > { %p2418_p0 = scmp.ne.s32.totalorder %s406_s24, %s2417_s20  ;;  %p2420_p2 = scmp.lt.u32.totalorder %s406_s24, %s3923_s3 }
 0x1b8   : > { %p2421_p4 = scmp.lt.u32.totalorder %s3178_s5, %s2417_s20  ;;  %p2423_p8 = scmp.lt.u32.totalorder %s2417_s20, %s406_s24 }
 0x1ba   : > { %p2422_p3 = por %p2421_p4, %p2420_p2 }
 0x1bc   : > { %p2424_p9 = por %p2423_p8, %p2422_p3 }
 0x1be   : > { %p2425_p12 = pnand %p2424_p9, %p2418_p0 }
 0x1c0   : > { %2428 = shalt.err (!%p2425_p12)  }
 0x1c1   : > { %s2429_s29 = scalar_lea.vmem %s3434_s30, 16  ;;  %p2434_p1 = scmp.lt.s32.totalorder %s3434_s30, %s3163_s13 }
 0x1c2   : > { %p2430_p13 = scmp.ne.s32.totalorder %s3434_s30, %s2429_s29  ;;  %p2435_p5 = scmp.lt.s32.totalorder %s3187_s16, %s2429_s29 }
 0x1c4   : > { %p2436_p6 = por %p2435_p5, %p2434_p1 }
 0x1c6   : > { %p2437_p7 = pnand %p2436_p6, %p2430_p13 }
 0x1c8   : > { %2440 = shalt.err (!%p2437_p7)  }
 0x1c9   : > { %419 = dma.hbm_to_vmem [thread:$0]  %s406_s24, 16, %s3434_s30, [#allocation3 + $0x4] }
 0x1ca   : > { %s1662_s15 = sshll.u32 %s3439_s23, 4  ;;  %s3469_s12 = sld [smem:[#allocation5 + %s436_s18]] }
 0x1cb   : > { %s423_s17 = scalar_lea.hbm %s3923_s3, %s1662_s15 }
 0x1cc   : > { %s2441_s21 = scalar_lea.hbm %s423_s17, 16  ;;  %p2444_p11 = scmp.lt.u32.totalorder %s423_s17, %s3923_s3 }
 0x1cd   : > { %p2442_p10 = scmp.ne.s32.totalorder %s423_s17, %s2441_s21  ;;  %p2445_p0 = scmp.lt.u32.totalorder %s3178_s5, %s2441_s21 }
 0x1ce   : > { %p2447_p4 = scmp.lt.u32.totalorder %s2441_s21, %s423_s17 }
 0x1cf   : > { %p2446_p2 = por %p2445_p0, %p2444_p11 }
 0x1d1   : > { %p2448_p3 = por %p2447_p4, %p2446_p2 }
 0x1d3   : > { %p2449_p8 = pnand %p2448_p3, %p2442_p10 }
 0x1d5   : > { %2452 = shalt.err (!%p2449_p8)  }
 0x1d6   : > { %s2453_s30 = scalar_lea.vmem %s3456_s22, 16  ;;  %p2458_p12 = scmp.lt.s32.totalorder %s3456_s22, %s3163_s13 }
 0x1d7   : > { %p2454_p9 = scmp.ne.s32.totalorder %s3456_s22, %s2453_s30  ;;  %p2459_p13 = scmp.lt.s32.totalorder %s3187_s16, %s2453_s30 }
 0x1d9   : > { %p2460_p1 = por %p2459_p13, %p2458_p12 }
 0x1db   : > { %p2461_p5 = pnand %p2460_p1, %p2454_p9 }
 0x1dd   : > { %2464 = shalt.err (!%p2461_p5)  }
 0x1de   : > { %435 = dma.hbm_to_vmem [thread:$0]  %s423_s17, 16, %s3456_s22, [#allocation3 + $0x4] }
 0x1df   : > { %s3015_s23 = smov [#allocation2 + $0x44]   ;;  %s452_s24 = sadd.s32 19, %s3155_s6 }
 0x1e0   : > { %s448_s18 = sshll.u32 %s3015_s23, 4  ;;  %s3485_s20 = sld [smem:[#allocation5 + %s452_s24]]  ;;  %s449_s18 = int_to_ptr.vmem [resolvable:$true] %s448_s18 }
 0x1e1   : > { %s468_s10 = sadd.s32 20, %s3155_s6  ;;  %s1663_s27 = sshll.u32 %s3469_s12, 4 }
 0x1e2   : > { %s3016_s29 = smov [#allocation2 + $0x64]   ;;  %s439_s21 = scalar_lea.hbm %s3923_s3, %s1663_s27 }
 0x1e3   : > { %s464_s15 = sshll.u32 %s3016_s29, 4  ;;  %s2465_s14 = scalar_lea.hbm %s439_s21, 16  ;;  %s3492_s15 = int_to_ptr.vmem [resolvable:$true] %s464_s15 }
 0x1e4   : > { %p2466_p6 = scmp.ne.s32.totalorder %s439_s21, %s2465_s14  ;;  %p2468_p7 = scmp.lt.u32.totalorder %s439_s21, %s3923_s3 }
 0x1e5   : > { %p2469_p10 = scmp.lt.u32.totalorder %s3178_s5, %s2465_s14  ;;  %p2471_p0 = scmp.lt.u32.totalorder %s2465_s14, %s439_s21 }
 0x1e7   : > { %p2470_p11 = por %p2469_p10, %p2468_p7 }
 0x1e9   : > { %p2472_p2 = por %p2471_p0, %p2470_p11 }
 0x1eb   : > { %p2473_p4 = pnand %p2472_p2, %p2466_p6 }
 0x1ed   : > { %2476 = shalt.err (!%p2473_p4)  }
 0x1ee   : > { %s2477_s12 = scalar_lea.vmem %s449_s18, 16  ;;  %p2482_p8 = scmp.lt.s32.totalorder %s449_s18, %s3163_s13 }
 0x1ef   : > { %p2478_p3 = scmp.ne.s32.totalorder %s449_s18, %s2477_s12  ;;  %p2483_p9 = scmp.lt.s32.totalorder %s3187_s16, %s2477_s12 }
 0x1f1   : > { %p2484_p12 = por %p2483_p9, %p2482_p8 }
 0x1f3   : > { %p2485_p13 = pnand %p2484_p12, %p2478_p3 }
 0x1f5   : > { %2488 = shalt.err (!%p2485_p13)  }
 0x1f6   : > { %451 = dma.hbm_to_vmem [thread:$0]  %s439_s21, 16, %s449_s18, [#allocation3 + $0x4] }
 0x1f7   : > { %s3500_s17 = sld [smem:[#allocation5 + %s468_s10]]  ;;  %s1664_s30 = sshll.u32 %s3485_s20, 4 }
 0x1f8   : > { %s3017_s23 = smov [#allocation2 + $0x5]   ;;  %s455_s1 = scalar_lea.hbm %s3923_s3, %s1664_s30 }
 0x1f9   : > { %s481_s24 = sshll.u32 %s3017_s23, 4  ;;  %s2489_s7 = scalar_lea.hbm %s455_s1, 16  ;;  %s3506_s24 = int_to_ptr.vmem [resolvable:$true] %s481_s24 }
 0x1fa   : > { %p2490_p1 = scmp.ne.s32.totalorder %s455_s1, %s2489_s7  ;;  %p2492_p5 = scmp.lt.u32.totalorder %s455_s1, %s3923_s3 }
 0x1fb   : > { %p2493_p6 = scmp.lt.u32.totalorder %s3178_s5, %s2489_s7  ;;  %p2495_p10 = scmp.lt.u32.totalorder %s2489_s7, %s455_s1 }
 0x1fd   : > { %p2494_p7 = por %p2493_p6, %p2492_p5 }
 0x1ff   : > { %p2496_p11 = por %p2495_p10, %p2494_p7 }
 0x201   : > { %p2497_p0 = pnand %p2496_p11, %p2490_p1 }
 0x203   : > { %2500 = shalt.err (!%p2497_p0)  }
 0x204   : > { %s2501_s18 = scalar_lea.vmem %s3492_s15, 16  ;;  %p2506_p4 = scmp.lt.s32.totalorder %s3492_s15, %s3163_s13 }
 0x205   : > { %p2502_p2 = scmp.ne.s32.totalorder %s3492_s15, %s2501_s18  ;;  %p2507_p3 = scmp.lt.s32.totalorder %s3187_s16, %s2501_s18 }
 0x207   : > { %p2508_p8 = por %p2507_p3, %p2506_p4 }
 0x209   : > { %p2509_p9 = pnand %p2508_p8, %p2502_p2 }
 0x20b   : > { %2512 = shalt.err (!%p2509_p9)  }
 0x20c   : > { %467 = dma.hbm_to_vmem [thread:$0]  %s455_s1, 16, %s3492_s15, [#allocation3 + $0x4] }
 0x20d   : > { %s485_s20 = sadd.s32 21, %s3155_s6  ;;  %s3018_s21 = smov [#allocation2 + $0x25]  }
 0x20e   : > { %s3519_s10 = sld [smem:[#allocation5 + %s485_s20]]  ;;  %s497_s22 = sshll.u32 %s3018_s21, 4  ;;  %s3522_s22 = int_to_ptr.vmem [resolvable:$true] %s497_s22 }
 0x20f   : > { %s1665_s12 = sshll.u32 %s3500_s17, 4  ;;  %s501_s29 = sadd.s32 22, %s3155_s6 }
 0x210   : > { %s471_s27 = scalar_lea.hbm %s3923_s3, %s1665_s12 }
 0x211   : > { %s2513_s7 = scalar_lea.hbm %s471_s27, 16  ;;  %p2516_p13 = scmp.lt.u32.totalorder %s471_s27, %s3923_s3 }
 0x212   : > { %p2514_p12 = scmp.ne.s32.totalorder %s471_s27, %s2513_s7  ;;  %p2517_p1 = scmp.lt.u32.totalorder %s3178_s5, %s2513_s7 }
 0x213   : > { %p2519_p6 = scmp.lt.u32.totalorder %s2513_s7, %s471_s27 }
 0x214   : > { %p2518_p5 = por %p2517_p1, %p2516_p13 }
 0x216   : > { %p2520_p7 = por %p2519_p6, %p2518_p5 }
 0x218   : > { %p2521_p10 = pnand %p2520_p7, %p2514_p12 }
 0x21a   : > { %2524 = shalt.err (!%p2521_p10)  }
 0x21b   : > { %s2525_s15 = scalar_lea.vmem %s3506_s24, 16  ;;  %p2530_p0 = scmp.lt.s32.totalorder %s3506_s24, %s3163_s13 }
 0x21c   : > { %p2526_p11 = scmp.ne.s32.totalorder %s3506_s24, %s2525_s15  ;;  %p2531_p2 = scmp.lt.s32.totalorder %s3187_s16, %s2525_s15 }
 0x21e   : > { %p2532_p4 = por %p2531_p2, %p2530_p0 }
 0x220   : > { %p2533_p3 = pnand %p2532_p4, %p2526_p11 }
 0x222   : > { %2536 = shalt.err (!%p2533_p3)  }
 0x223   : > { %484 = dma.hbm_to_vmem [thread:$0]  %s471_s27, 16, %s3506_s24, [#allocation3 + $0x5] }
 0x224   : > { %s3538_s17 = sld [smem:[#allocation5 + %s501_s29]]  ;;  %s3019_s1 = smov [#allocation2 + $0x45]  }
 0x225   : > { %s513_s18 = sshll.u32 %s3019_s1, 4  ;;  %s517_s20 = sadd.s32 23, %s3155_s6  ;;  %s3542_s18 = int_to_ptr.vmem [resolvable:$true] %s513_s18 }
 0x226   : > { %s1666_s21 = sshll.u32 %s3519_s10, 4  ;;  %s3547_s7 = sld [smem:[#allocation5 + %s517_s20]] }
 0x227   : > { %s488_s23 = scalar_lea.hbm %s3923_s3, %s1666_s21 }
 0x228   : > { %s2537_s14 = scalar_lea.hbm %s488_s23, 16  ;;  %p2540_p9 = scmp.lt.u32.totalorder %s488_s23, %s3923_s3 }
 0x229   : > { %p2538_p8 = scmp.ne.s32.totalorder %s488_s23, %s2537_s14  ;;  %p2541_p12 = scmp.lt.u32.totalorder %s3178_s5, %s2537_s14 }
 0x22a   : > { %p2543_p1 = scmp.lt.u32.totalorder %s2537_s14, %s488_s23 }
 0x22b   : > { %p2542_p13 = por %p2541_p12, %p2540_p9 }
 0x22d   : > { %p2544_p5 = por %p2543_p1, %p2542_p13 }
 0x22f   : > { %p2545_p6 = pnand %p2544_p5, %p2538_p8 }
 0x231   : > { %2548 = shalt.err (!%p2545_p6)  }
 0x232   : > { %s2549_s24 = scalar_lea.vmem %s3522_s22, 16  ;;  %p2554_p10 = scmp.lt.s32.totalorder %s3522_s22, %s3163_s13 }
 0x233   : > { %p2550_p7 = scmp.ne.s32.totalorder %s3522_s22, %s2549_s24  ;;  %p2555_p11 = scmp.lt.s32.totalorder %s3187_s16, %s2549_s24 }
 0x235   : > { %p2556_p0 = por %p2555_p11, %p2554_p10 }
 0x237   : > { %p2557_p2 = pnand %p2556_p0, %p2550_p7 }
 0x239   : > { %2560 = shalt.err (!%p2557_p2)  }
 0x23a   : > { %500 = dma.hbm_to_vmem [thread:$0]  %s488_s23, 16, %s3522_s22, [#allocation3 + $0x5] }
 0x23b   : > { %s533_s10 = sadd.s32 24, %s3155_s6  ;;  %s1667_s27 = sshll.u32 %s3538_s17, 4 }
 0x23c   : > { %s3020_s29 = smov [#allocation2 + $0x65]   ;;  %s504_s12 = scalar_lea.hbm %s3923_s3, %s1667_s27 }
 0x23d   : > { %s529_s1 = sshll.u32 %s3020_s29, 4  ;;  %s2561_s30 = scalar_lea.hbm %s504_s12, 16  ;;  %s3564_s1 = int_to_ptr.vmem [resolvable:$true] %s529_s1 }
 0x23e   : > { %p2562_p4 = scmp.ne.s32.totalorder %s504_s12, %s2561_s30  ;;  %p2564_p3 = scmp.lt.u32.totalorder %s504_s12, %s3923_s3 }
 0x23f   : > { %p2565_p8 = scmp.lt.u32.totalorder %s3178_s5, %s2561_s30  ;;  %p2567_p12 = scmp.lt.u32.totalorder %s2561_s30, %s504_s12 }
 0x241   : > { %p2566_p9 = por %p2565_p8, %p2564_p3 }
 0x243   : > { %p2568_p13 = por %p2567_p12, %p2566_p9 }
 0x245   : > { %p2569_p1 = pnand %p2568_p13, %p2562_p4 }
 0x247   : > { %2572 = shalt.err (!%p2569_p1)  }
 0x248   : > { %s2573_s22 = scalar_lea.vmem %s3542_s18, 16  ;;  %p2578_p6 = scmp.lt.s32.totalorder %s3542_s18, %s3163_s13 }
 0x249   : > { %p2574_p5 = scmp.ne.s32.totalorder %s3542_s18, %s2573_s22  ;;  %p2579_p7 = scmp.lt.s32.totalorder %s3187_s16, %s2573_s22 }
 0x24b   : > { %p2580_p10 = por %p2579_p7, %p2578_p6 }
 0x24d   : > { %p2581_p11 = pnand %p2580_p10, %p2574_p5 }
 0x24f   : > { %2584 = shalt.err (!%p2581_p11)  }
 0x250   : > { %516 = dma.hbm_to_vmem [thread:$0]  %s504_s12, 16, %s3542_s18, [#allocation3 + $0x5] }
 0x251   : > { %s1668_s17 = sshll.u32 %s3547_s7, 4  ;;  %s3577_s23 = sld [smem:[#allocation5 + %s533_s10]] }
 0x252   : > { %s520_s27 = scalar_lea.hbm %s3923_s3, %s1668_s17 }
 0x253   : > { %s2585_s29 = scalar_lea.hbm %s520_s27, 16  ;;  %p2588_p2 = scmp.lt.u32.totalorder %s520_s27, %s3923_s3 }
 0x254   : > { %p2586_p0 = scmp.ne.s32.totalorder %s520_s27, %s2585_s29  ;;  %p2589_p4 = scmp.lt.u32.totalorder %s3178_s5, %s2585_s29 }
 0x255   : > { %p2591_p8 = scmp.lt.u32.totalorder %s2585_s29, %s520_s27 }
 0x256   : > { %p2590_p3 = por %p2589_p4, %p2588_p2 }
 0x258   : > { %p2592_p9 = por %p2591_p8, %p2590_p3 }
 0x25a   : > { %p2593_p12 = pnand %p2592_p9, %p2586_p0 }
 0x25c   : > { %2596 = shalt.err (!%p2593_p12)  }
 0x25d   : > { %s2597_s18 = scalar_lea.vmem %s3564_s1, 16  ;;  %p2602_p1 = scmp.lt.s32.totalorder %s3564_s1, %s3163_s13 }
 0x25e   : > { %p2598_p13 = scmp.ne.s32.totalorder %s3564_s1, %s2597_s18  ;;  %p2603_p5 = scmp.lt.s32.totalorder %s3187_s16, %s2597_s18 }
 0x260   : > { %p2604_p6 = por %p2603_p5, %p2602_p1 }
 0x262   : > { %p2605_p7 = pnand %p2604_p6, %p2598_p13 }
 0x264   : > { %2608 = shalt.err (!%p2605_p7)  }
 0x265   : > { %532 = dma.hbm_to_vmem [thread:$0]  %s520_s27, 16, %s3564_s1, [#allocation3 + $0x5] }
 0x266   : > { %s3021_s7 = smov [#allocation2 + $0x6]   ;;  %s550_s12 = sadd.s32 25, %s3155_s6 }
 0x267   : > { %s546_s10 = sshll.u32 %s3021_s7, 4  ;;  %s3593_s30 = sld [smem:[#allocation5 + %s550_s12]]  ;;  %s547_s10 = int_to_ptr.vmem [resolvable:$true] %s546_s10 }
 0x268   : > { %s566_s14 = sadd.s32 26, %s3155_s6  ;;  %s1669_s19 = sshll.u32 %s3577_s23, 4 }
 0x269   : > { %s3022_s22 = smov [#allocation2 + $0x26]   ;;  %s536_s29 = scalar_lea.hbm %s3923_s3, %s1669_s19 }
 0x26a   : > { %s562_s17 = sshll.u32 %s3022_s22, 4  ;;  %s2609_s20 = scalar_lea.hbm %s536_s29, 16  ;;  %s3600_s17 = int_to_ptr.vmem [resolvable:$true] %s562_s17 }
 0x26b   : > { %p2610_p10 = scmp.ne.s32.totalorder %s536_s29, %s2609_s20  ;;  %p2612_p11 = scmp.lt.u32.totalorder %s536_s29, %s3923_s3 }
 0x26c   : > { %p2613_p0 = scmp.lt.u32.totalorder %s3178_s5, %s2609_s20  ;;  %p2615_p4 = scmp.lt.u32.totalorder %s2609_s20, %s536_s29 }
 0x26e   : > { %p2614_p2 = por %p2613_p0, %p2612_p11 }
 0x270   : > { %p2616_p3 = por %p2615_p4, %p2614_p2 }
 0x272   : > { %p2617_p8 = pnand %p2616_p3, %p2610_p10 }
 0x274   : > { %2620 = shalt.err (!%p2617_p8)  }
 0x275   : > { %s2621_s23 = scalar_lea.vmem %s547_s10, 16  ;;  %p2626_p12 = scmp.lt.s32.totalorder %s547_s10, %s3163_s13 }
 0x276   : > { %p2622_p9 = scmp.ne.s32.totalorder %s547_s10, %s2621_s23  ;;  %p2627_p13 = scmp.lt.s32.totalorder %s3187_s16, %s2621_s23 }
 0x278   : > { %p2628_p1 = por %p2627_p13, %p2626_p12 }
 0x27a   : > { %p2629_p5 = pnand %p2628_p1, %p2622_p9 }
 0x27c   : > { %2632 = shalt.err (!%p2629_p5)  }
 0x27d   : > { %549 = dma.hbm_to_vmem [thread:$0]  %s536_s29, 16, %s547_s10, [#allocation3 + $0x6] }
 0x27e   : > { %s3608_s27 = sld [smem:[#allocation5 + %s566_s14]]  ;;  %s1670_s18 = sshll.u32 %s3593_s30, 4 }
 0x27f   : > { %s3023_s7 = smov [#allocation2 + $0x46]   ;;  %s553_s15 = scalar_lea.hbm %s3923_s3, %s1670_s18 }
 0x280   : > { %s578_s12 = sshll.u32 %s3023_s7, 4  ;;  %s2633_s24 = scalar_lea.hbm %s553_s15, 16  ;;  %s3614_s12 = int_to_ptr.vmem [resolvable:$true] %s578_s12 }
 0x281   : > { %p2634_p6 = scmp.ne.s32.totalorder %s553_s15, %s2633_s24  ;;  %p2636_p7 = scmp.lt.u32.totalorder %s553_s15, %s3923_s3 }
 0x282   : > { %p2637_p10 = scmp.lt.u32.totalorder %s3178_s5, %s2633_s24  ;;  %p2639_p0 = scmp.lt.u32.totalorder %s2633_s24, %s553_s15 }
 0x284   : > { %p2638_p11 = por %p2637_p10, %p2636_p7 }
 0x286   : > { %p2640_p2 = por %p2639_p0, %p2638_p11 }
 0x288   : > { %p2641_p4 = pnand %p2640_p2, %p2634_p6 }
 0x28a   : > { %2644 = shalt.err (!%p2641_p4)  }
 0x28b   : > { %s2645_s10 = scalar_lea.vmem %s3600_s17, 16  ;;  %p2650_p8 = scmp.lt.s32.totalorder %s3600_s17, %s3163_s13 }
 0x28c   : > { %p2646_p3 = scmp.ne.s32.totalorder %s3600_s17, %s2645_s10  ;;  %p2651_p9 = scmp.lt.s32.totalorder %s3187_s16, %s2645_s10 }
 0x28e   : > { %p2652_p12 = por %p2651_p9, %p2650_p8 }
 0x290   : > { %p2653_p13 = pnand %p2652_p12, %p2646_p3 }
 0x292   : > { %2656 = shalt.err (!%p2653_p13)  }
 0x293   : > { %565 = dma.hbm_to_vmem [thread:$0]  %s553_s15, 16, %s3600_s17, [#allocation3 + $0x6] }
 0x294   : > { %s582_s30 = sadd.s32 27, %s3155_s6  ;;  %s3024_s29 = smov [#allocation2 + $0x66]  }
 0x295   : > { %s3627_s14 = sld [smem:[#allocation5 + %s582_s30]]  ;;  %s594_s1 = sshll.u32 %s3024_s29, 4  ;;  %s3630_s1 = int_to_ptr.vmem [resolvable:$true] %s594_s1 }
 0x296   : > { %s1671_s23 = sshll.u32 %s3608_s27, 4  ;;  %s598_s22 = sadd.s32 28, %s3155_s6 }
 0x297   : > { %s569_s19 = scalar_lea.hbm %s3923_s3, %s1671_s23 }
 0x298   : > { %s2657_s24 = scalar_lea.hbm %s569_s19, 16  ;;  %p2660_p5 = scmp.lt.u32.totalorder %s569_s19, %s3923_s3 }
 0x299   : > { %p2658_p1 = scmp.ne.s32.totalorder %s569_s19, %s2657_s24  ;;  %p2661_p6 = scmp.lt.u32.totalorder %s3178_s5, %s2657_s24 }
 0x29a   : > { %p2663_p10 = scmp.lt.u32.totalorder %s2657_s24, %s569_s19 }
 0x29b   : > { %p2662_p7 = por %p2661_p6, %p2660_p5 }
 0x29d   : > { %p2664_p11 = por %p2663_p10, %p2662_p7 }
 0x29f   : > { %p2665_p0 = pnand %p2664_p11, %p2658_p1 }
 0x2a1   : > { %2668 = shalt.err (!%p2665_p0)  }
 0x2a2   : > { %s2669_s17 = scalar_lea.vmem %s3614_s12, 16  ;;  %p2674_p4 = scmp.lt.s32.totalorder %s3614_s12, %s3163_s13 }
 0x2a3   : > { %p2670_p2 = scmp.ne.s32.totalorder %s3614_s12, %s2669_s17  ;;  %p2675_p3 = scmp.lt.s32.totalorder %s3187_s16, %s2669_s17 }
 0x2a5   : > { %p2676_p8 = por %p2675_p3, %p2674_p4 }
 0x2a7   : > { %p2677_p9 = pnand %p2676_p8, %p2670_p2 }
 0x2a9   : > { %2680 = shalt.err (!%p2677_p9)  }
 0x2aa   : > { %581 = dma.hbm_to_vmem [thread:$0]  %s569_s19, 16, %s3614_s12, [#allocation3 + $0x6] }
 0x2ab   : > { %s3646_s27 = sld [smem:[#allocation5 + %s598_s22]]  ;;  %s3025_s15 = smov [#allocation2 + $0x7]  }
 0x2ac   : > { %s611_s10 = sshll.u32 %s3025_s15, 4  ;;  %s615_s30 = sadd.s32 29, %s3155_s6  ;;  %s3650_s10 = int_to_ptr.vmem [resolvable:$true] %s611_s10 }
 0x2ad   : > { %s1672_s29 = sshll.u32 %s3627_s14, 4  ;;  %s3655_s24 = sld [smem:[#allocation5 + %s615_s30]] }
 0x2ae   : > { %s585_s7 = scalar_lea.hbm %s3923_s3, %s1672_s29 }
 0x2af   : > { %s2681_s20 = scalar_lea.hbm %s585_s7, 16  ;;  %p2684_p13 = scmp.lt.u32.totalorder %s585_s7, %s3923_s3 }
 0x2b0   : > { %p2682_p12 = scmp.ne.s32.totalorder %s585_s7, %s2681_s20  ;;  %p2685_p1 = scmp.lt.u32.totalorder %s3178_s5, %s2681_s20 }
 0x2b1   : > { %p2687_p6 = scmp.lt.u32.totalorder %s2681_s20, %s585_s7 }
 0x2b2   : > { %p2686_p5 = por %p2685_p1, %p2684_p13 }
 0x2b4   : > { %p2688_p7 = por %p2687_p6, %p2686_p5 }
 0x2b6   : > { %p2689_p10 = pnand %p2688_p7, %p2682_p12 }
 0x2b8   : > { %2692 = shalt.err (!%p2689_p10)  }
 0x2b9   : > { %s2693_s12 = scalar_lea.vmem %s3630_s1, 16  ;;  %p2698_p0 = scmp.lt.s32.totalorder %s3630_s1, %s3163_s13 }
 0x2ba   : > { %p2694_p11 = scmp.ne.s32.totalorder %s3630_s1, %s2693_s12  ;;  %p2699_p2 = scmp.lt.s32.totalorder %s3187_s16, %s2693_s12 }
 0x2bc   : > { %p2700_p4 = por %p2699_p2, %p2698_p0 }
 0x2be   : > { %p2701_p3 = pnand %p2700_p4, %p2694_p11 }
 0x2c0   : > { %2704 = shalt.err (!%p2701_p3)  }
 0x2c1   : > { %597 = dma.hbm_to_vmem [thread:$0]  %s585_s7, 16, %s3630_s1, [#allocation3 + $0x6] }
 0x2c2   : > { %s631_s14 = sadd.s32 30, %s3155_s6  ;;  %s1673_s19 = sshll.u32 %s3646_s27, 4 }
 0x2c3   : > { %s3026_s22 = smov [#allocation2 + $0x27]   ;;  %s601_s23 = scalar_lea.hbm %s3923_s3, %s1673_s19 }
 0x2c4   : > { %s627_s15 = sshll.u32 %s3026_s22, 4  ;;  %s2705_s18 = scalar_lea.hbm %s601_s23, 16  ;;  %s3672_s15 = int_to_ptr.vmem [resolvable:$true] %s627_s15 }
 0x2c5   : > { %p2706_p8 = scmp.ne.s32.totalorder %s601_s23, %s2705_s18  ;;  %p2708_p9 = scmp.lt.u32.totalorder %s601_s23, %s3923_s3 }
 0x2c6   : > { %p2709_p12 = scmp.lt.u32.totalorder %s3178_s5, %s2705_s18  ;;  %p2711_p1 = scmp.lt.u32.totalorder %s2705_s18, %s601_s23 }
 0x2c8   : > { %p2710_p13 = por %p2709_p12, %p2708_p9 }
 0x2ca   : > { %p2712_p5 = por %p2711_p1, %p2710_p13 }
 0x2cc   : > { %p2713_p6 = pnand %p2712_p5, %p2706_p8 }
 0x2ce   : > { %2716 = shalt.err (!%p2713_p6)  }
 0x2cf   : > { %s2717_s1 = scalar_lea.vmem %s3650_s10, 16  ;;  %p2722_p10 = scmp.lt.s32.totalorder %s3650_s10, %s3163_s13 }
 0x2d0   : > { %p2718_p7 = scmp.ne.s32.totalorder %s3650_s10, %s2717_s1  ;;  %p2723_p11 = scmp.lt.s32.totalorder %s3187_s16, %s2717_s1 }
 0x2d2   : > { %p2724_p0 = por %p2723_p11, %p2722_p10 }
 0x2d4   : > { %p2725_p2 = pnand %p2724_p0, %p2718_p7 }
 0x2d6   : > { %2728 = shalt.err (!%p2725_p2)  }
 0x2d7   : > { %614 = dma.hbm_to_vmem [thread:$0]  %s601_s23, 16, %s3650_s10, [#allocation3 + $0x7] }
 0x2d8   : > { %s1674_s27 = sshll.u32 %s3655_s24, 4  ;;  %s632_s7 = sld [smem:[#allocation5 + %s631_s14]] }
 0x2d9   : > { %s618_s19 = scalar_lea.hbm %s3923_s3, %s1674_s27 }
 0x2da   : > { %s2729_s22 = scalar_lea.hbm %s618_s19, 16  ;;  %p2732_p3 = scmp.lt.u32.totalorder %s618_s19, %s3923_s3 }
 0x2db   : > { %p2730_p4 = scmp.ne.s32.totalorder %s618_s19, %s2729_s22  ;;  %p2733_p8 = scmp.lt.u32.totalorder %s3178_s5, %s2729_s22 }
 0x2dc   : > { %p2735_p12 = scmp.lt.u32.totalorder %s2729_s22, %s618_s19 }
 0x2dd   : > { %p2734_p9 = por %p2733_p8, %p2732_p3 }
 0x2df   : > { %p2736_p13 = por %p2735_p12, %p2734_p9 }
 0x2e1   : > { %p2737_p1 = pnand %p2736_p13, %p2730_p4 }
 0x2e3   : > { %2740 = shalt.err (!%p2737_p1)  }
 0x2e4   : > { %s2741_s10 = scalar_lea.vmem %s3672_s15, 16  ;;  %p2746_p6 = scmp.lt.s32.totalorder %s3672_s15, %s3163_s13 }
 0x2e5   : > { %p2742_p5 = scmp.ne.s32.totalorder %s3672_s15, %s2741_s10  ;;  %p2747_p7 = scmp.lt.s32.totalorder %s3187_s16, %s2741_s10 }
 0x2e7   : > { %p2748_p10 = por %p2747_p7, %p2746_p6 }
 0x2e9   : > { %p2749_p11 = pnand %p2748_p10, %p2742_p5 }
 0x2eb   : > { %2752 = shalt.err (!%p2749_p11)  }
 0x2ec   : > { %630 = dma.hbm_to_vmem [thread:$0]  %s618_s19, 16, %s3672_s15, [#allocation3 + $0x7] }
 0x2ed   : > { %s3027_s24 = smov [#allocation2 + $0x47]   ;;  %s647_s23 = sadd.s32 31, %s3155_s6 }
 0x2ee   : > { %s643_s14 = sshll.u32 %s3027_s24, 4  ;;  %s648_s18 = sld [smem:[#allocation5 + %s647_s23]]  ;;  %s644_s14 = int_to_ptr.vmem [resolvable:$true] %s643_s14 }
 0x2ef   : > { %s1675_s20 = sshll.u32 %s632_s7, 4  ;;  %s3028_s21 = smov [#allocation2 + $0x67]  }
 0x2f0   : > { %s659_s1 = sshll.u32 %s3028_s21, 4  ;;  %s634_s12 = scalar_lea.hbm %s3923_s3, %s1675_s20  ;;  %s660_s1 = int_to_ptr.vmem [resolvable:$true] %s659_s1 }
 0x2f1   : > { %s2753_s22 = scalar_lea.hbm %s634_s12, 16  ;;  %p2756_p2 = scmp.lt.u32.totalorder %s634_s12, %s3923_s3 }
 0x2f2   : > { %p2754_p0 = scmp.ne.s32.totalorder %s634_s12, %s2753_s22  ;;  %p2757_p4 = scmp.lt.u32.totalorder %s3178_s5, %s2753_s22 }
 0x2f3   : > { %p2759_p8 = scmp.lt.u32.totalorder %s2753_s22, %s634_s12 }
 0x2f4   : > { %p2758_p3 = por %p2757_p4, %p2756_p2 }
 0x2f6   : > { %p2760_p9 = por %p2759_p8, %p2758_p3 }
 0x2f8   : > { %p2761_p12 = pnand %p2760_p9, %p2754_p0 }
 0x2fa   : > { %2764 = shalt.err (!%p2761_p12)  }
 0x2fb   : > { %s2765_s15 = scalar_lea.vmem %s644_s14, 16  ;;  %p2770_p1 = scmp.lt.s32.totalorder %s644_s14, %s3163_s13 }
 0x2fc   : > { %p2766_p13 = scmp.ne.s32.totalorder %s644_s14, %s2765_s15  ;;  %p2771_p5 = scmp.lt.s32.totalorder %s3187_s16, %s2765_s15 }
 0x2fe   : > { %p2772_p6 = por %p2771_p5, %p2770_p1 }
 0x300   : > { %p2773_p7 = pnand %p2772_p6, %p2766_p13 }
 0x302   : > { %2776 = shalt.err (!%p2773_p7)  }
 0x303   : > { %646 = dma.hbm_to_vmem [thread:$0]  %s634_s12, 16, %s644_s14, [#allocation3 + $0x7] }
 0x304   : > { %s1676_s7 = sshll.u32 %s648_s18, 4 }
 0x305   : > { %s650_s24 = scalar_lea.hbm %s3923_s3, %s1676_s7 }
 0x306   : > { %s2777_s23 = scalar_lea.hbm %s650_s24, 16  ;;  %p2780_p11 = scmp.lt.u32.totalorder %s650_s24, %s3923_s3 }
 0x307   : > { %p2778_p10 = scmp.ne.s32.totalorder %s650_s24, %s2777_s23  ;;  %p2781_p0 = scmp.lt.u32.totalorder %s3178_s5, %s2777_s23 }
 0x308   : > { %p2783_p4 = scmp.lt.u32.totalorder %s2777_s23, %s650_s24 }
 0x309   : > { %p2782_p2 = por %p2781_p0, %p2780_p11 }
 0x30b   : > { %p2784_p3 = por %p2783_p4, %p2782_p2 }
 0x30d   : > { %p2785_p8 = pnand %p2784_p3, %p2778_p10 }
 0x30f   : > { %2788 = shalt.err (!%p2785_p8)  }
 0x310   : > { %s2789_s14 = scalar_lea.vmem %s660_s1, 16  ;;  %p2794_p12 = scmp.lt.s32.totalorder %s660_s1, %s3163_s13 }
 0x311   : > { %p2790_p9 = scmp.ne.s32.totalorder %s660_s1, %s2789_s14  ;;  %p2795_p13 = scmp.lt.s32.totalorder %s3187_s16, %s2789_s14 }
 0x313   : > { %p2796_p1 = por %p2795_p13, %p2794_p12 }
 0x315   : > { %p2797_p5 = pnand %p2796_p1, %p2790_p9 }
 0x317   : > { %2800 = shalt.err (!%p2797_p5)  }
 0x318   : > { %662 = dma.hbm_to_vmem [thread:$0]  %s650_s24, 16, %s660_s1, [#allocation3 + $0x7] }
 0x319   : > { %s3718_s18 = scalar_lea.vmem [#allocation9], %s3159_s11  ;;  %s3720_s27 = smov 0  }
 0x31a LB: >> { %s669_s17 = sand.u32 7, %s2991_s27  ;;  %s2991_s27 = sphi %s3720_s27, %s668_s27  }
 0x31b   : >> { %s670_s12 = scalar_lea.sflag [#allocation3], %s669_s17 }
 0x31c   : >> { %2967 = dma.done.wait %s670_s12, 64 }
 0x31d   : >> { %2968 = vsyncadd %s670_s12, 4294967232  ;;  %s3952_s6 = sld [smem:[#allocation98_spill]]  ;;  %s680_s1 = sadd.s32 8, %s2991_s27 }
 0x31e   : >> { %s1761_s22 = sshll.u32 %s2991_s27, 2  ;;  %p3728_p6 = scmp.lt.s32.totalorder %s680_s1, 32 }
 0x31f   : >> { %s685_s30 = sand.u32 7, %s680_s1  ;;  %s1762_s29 = sadd.s32 32, %s1761_s22 }
 0x320   : >> { %s1794_s7 = scalar_select %p3728_p6, [#allocation5], [#allocation84] }
 0x321   : >> { %s3741_s10 = scalar_lea.vmem [#allocation2], %s2991_s27 }
 0x322   : >> { %s1587_s24 = scalar_lea.vmem %s3741_s10, 8 [#allocation2]  ;;  %s1592_s17 = scalar_lea.vmem %s3741_s10, 40 [#allocation2] }
 0x323   : >> { %s3733_s15 = sadd.s32 %s1762_s29, %s3952_s6  ;;  %s700_s20 = sshll.u32 %s1587_s24, 4  ;;  %s3749_s20 = int_to_ptr.vmem [resolvable:$true] %s700_s20 }
 0x324   : >> { %s1795_s19 = scalar_select %p3728_p6, %s3733_s15, 0 }
 0x325   : >> { %s704_s21 = sadd.s32 1, %s3733_s15  ;;  %s717_s1 = sshll.u32 %s1592_s17, 4  ;;  %s3758_s1 = int_to_ptr.vmem [resolvable:$true] %s717_s1 }
 0x326   : >> { %s688_s23 = sld [smem:[%s1794_s7 + %s1795_s19]]  ;;  %s3966_s21 = smov (!%p3728_p6, %s704_s21), 0 }
 0x327   : >> { %s1797_s14 = scalar_select %p3728_p6, [#allocation5], [#allocation85] }
 0x328   : >> { %s721_s29 = sadd.s32 2, %s3733_s15  ;;  %s3760_s19 = scalar_lea.sflag [#allocation3], %s685_s30 }
 0x329   : >> { %s3752_s12 = sld [smem:[%s1797_s14 + %s3966_s21]] }
 0x32c   : >> { %s1679_s22 = sshll.u32 %s688_s23, 4 }
 0x32d   : >> { %s690_s7 = scalar_lea.hbm %s3923_s3, %s1679_s22 }
 0x32e   : >> { %s2801_s24 = scalar_lea.hbm %s690_s7, 16  ;;  %p2806_p0 = scmp.lt.u32.totalorder %s690_s7, %s3923_s3 }
 0x32f   : >> { %p2802_p7 = scmp.ne.s32.totalorder %s690_s7, %s2801_s24  ;;  %p2807_p2 = scmp.lt.u32.totalorder %s3178_s5, %s2801_s24 }
 0x330   : >> { %p2809_p3 = scmp.lt.u32.totalorder %s2801_s24, %s690_s7 }
 0x331   : >> { %p2803_p10 = pnand %p2802_p7, %p3728_p6  ;;  %p2808_p4 = por %p2807_p2, %p2806_p0 }
 0x333   : >> { %p2804_p11 = pneg %p2803_p10  ;;  %p2810_p8 = por %p2809_p3, %p2808_p4 }
 0x335   : >> { %p2811_p9 = pnand %p2810_p8, %p2804_p11 }
 0x337   : >> { %2814 = shalt.err (!%p2811_p9)  }
 0x338   : >> { %s2815_s9 = scalar_lea.vmem %s3749_s20, 16  ;;  %p2822_p5 = scmp.lt.s32.totalorder %s3749_s20, %s3163_s13 }
 0x339   : >> { %p2816_p12 = scmp.ne.s32.totalorder %s3749_s20, %s2815_s9  ;;  %p2823_p7 = scmp.lt.s32.totalorder %s3187_s16, %s2815_s9 }
 0x33b   : >> { %p2817_p13 = pnand %p2816_p12, %p3728_p6  ;;  %p2824_p10 = por %p2823_p7, %p2822_p5 }
 0x33d   : >> { %p2818_p1 = pneg %p2817_p13 }
 0x33f   : >> { %p2825_p0 = pnand %p2824_p10, %p2818_p1 }
 0x341   : >> { %2828 = shalt.err (!%p2825_p0)  }
 0x342   : >> { %1796 = dma.hbm_to_vmem [thread:$0]  (%p3728_p6), %s690_s7, 16, %s3749_s20, %s3760_s19 }
 0x343   : >> { %s1800_s25 = scalar_select %p3728_p6, [#allocation5], [#allocation86] }
 0x344   : >> { %s3968_s29 = smov (!%p3728_p6, %s721_s29), 0  ;;  %s1680_s28 = sshll.u32 %s3752_s12, 4 }
 0x345   : >> { %s1596_s6 = scalar_lea.vmem %s3741_s10, 72 [#allocation2]  ;;  %s707_s21 = scalar_lea.hbm %s3923_s3, %s1680_s28 }
 0x346   : >> { %s3788_s14 = sld [smem:[%s1800_s25 + %s3968_s29]]  ;;  %s2829_s17 = scalar_lea.hbm %s707_s21, 16 }
 0x347   : >> { %p2830_p11 = scmp.ne.s32.totalorder %s707_s21, %s2829_s17  ;;  %p2834_p3 = scmp.lt.u32.totalorder %s707_s21, %s3923_s3 }
 0x348   : >> { %p2835_p8 = scmp.lt.u32.totalorder %s3178_s5, %s2829_s17  ;;  %p2837_p12 = scmp.lt.u32.totalorder %s2829_s17, %s707_s21 }
 0x349   : >> { %p2831_p2 = pnand %p2830_p11, %p3728_p6 }
 0x34a   : >> { %p2836_p9 = por %p2835_p8, %p2834_p3 }
 0x34b   : >> { %p2832_p4 = pneg %p2831_p2 }
 0x34c   : >> { %p2838_p13 = por %p2837_p12, %p2836_p9 }
 0x34e   : >> { %p2839_p1 = pnand %p2838_p13, %p2832_p4 }
 0x350   : >> { %2842 = shalt.err (!%p2839_p1)  }
 0x351   : >> { %s2843_s20 = scalar_lea.vmem %s3758_s1, 16  ;;  %p2850_p0 = scmp.lt.s32.totalorder %s3758_s1, %s3163_s13 }
 0x352   : >> { %p2844_p5 = scmp.ne.s32.totalorder %s3758_s1, %s2843_s20  ;;  %p2851_p11 = scmp.lt.s32.totalorder %s3187_s16, %s2843_s20 }
 0x354   : >> { %p2845_p7 = pnand %p2844_p5, %p3728_p6  ;;  %p2852_p2 = por %p2851_p11, %p2850_p0 }
 0x356   : >> { %p2846_p10 = pneg %p2845_p7 }
 0x358   : >> { %p2853_p3 = pnand %p2852_p2, %p2846_p10 }
 0x35a   : >> { %2856 = shalt.err (!%p2853_p3)  }
 0x35b   : >> { %1799 = dma.hbm_to_vmem [thread:$0]  (%p3728_p6), %s707_s21, 16, %s3758_s1, %s3760_s19 }
 0x35c   : >> { %s734_s12 = sshll.u32 %s1596_s6, 4  ;;  %s738_s29 = sadd.s32 3, %s3733_s15  ;;  %s735_s12 = int_to_ptr.vmem [resolvable:$true] %s734_s12 }
 0x35d   : >> { %s1803_s7 = scalar_select %p3728_p6, [#allocation5], [#allocation87] }
 0x35e   : >> { %s3970_s29 = smov (!%p3728_p6, %s738_s29), 0  ;;  %s1600_s9 = scalar_lea.vmem %s3741_s10, 104 [#allocation2] }
 0x35f   : >> { %s1681_s25 = sshll.u32 %s3788_s14, 4  ;;  %s739_s28 = sld [smem:[%s1803_s7 + %s3970_s29]] }
 0x360   : >> { %s724_s17 = scalar_lea.hbm %s3923_s3, %s1681_s25  ;;  %s751_s22 = sshll.u32 %s1600_s9, 4  ;;  %s752_s22 = int_to_ptr.vmem [resolvable:$true] %s751_s22 }
 0x361   : >> { %s2857_s24 = scalar_lea.hbm %s724_s17, 16  ;;  %p2862_p12 = scmp.lt.u32.totalorder %s724_s17, %s3923_s3 }
 0x362   : >> { %p2858_p4 = scmp.ne.s32.totalorder %s724_s17, %s2857_s24  ;;  %p2863_p13 = scmp.lt.u32.totalorder %s3178_s5, %s2857_s24 }
 0x363   : >> { %p2865_p5 = scmp.lt.u32.totalorder %s2857_s24, %s724_s17 }
 0x364   : >> { %p2859_p8 = pnand %p2858_p4, %p3728_p6  ;;  %p2864_p1 = por %p2863_p13, %p2862_p12 }
 0x366   : >> { %p2860_p9 = pneg %p2859_p8  ;;  %p2866_p7 = por %p2865_p5, %p2864_p1 }
 0x368   : >> { %p2867_p10 = pnand %p2866_p7, %p2860_p9 }
 0x36a   : >> { %2870 = shalt.err (!%p2867_p10)  }
 0x36b   : >> { %s2871_s10 = scalar_lea.vmem %s735_s12, 16  ;;  %p2878_p3 = scmp.lt.s32.totalorder %s735_s12, %s3163_s13 }
 0x36c   : >> { %p2872_p0 = scmp.ne.s32.totalorder %s735_s12, %s2871_s10  ;;  %p2879_p4 = scmp.lt.s32.totalorder %s3187_s16, %s2871_s10 }
 0x36e   : >> { %p2873_p11 = pnand %p2872_p0, %p3728_p6  ;;  %p2880_p8 = por %p2879_p4, %p2878_p3 }
 0x370   : >> { %p2874_p2 = pneg %p2873_p11 }
 0x372   : >> { %p2881_p12 = pnand %p2880_p8, %p2874_p2 }
 0x374   : >> { %2884 = shalt.err (!%p2881_p12)  }
 0x375   : >> { %1802 = dma.hbm_to_vmem [thread:$0]  (%p3728_p6), %s724_s17, 16, %s735_s12, %s3760_s19 }
 0x376   : >> { %s1682_s6 = sshll.u32 %s739_s28, 4 }
 0x377   : >> { %s741_s20 = scalar_lea.hbm %s3923_s3, %s1682_s6 }
 0x378   : >> { %s2885_s29 = scalar_lea.hbm %s741_s20, 16  ;;  %p2890_p5 = scmp.lt.u32.totalorder %s741_s20, %s3923_s3 }
 0x379   : >> { %p2886_p9 = scmp.ne.s32.totalorder %s741_s20, %s2885_s29  ;;  %p2891_p7 = scmp.lt.u32.totalorder %s3178_s5, %s2885_s29 }
 0x37a   : >> { %p2893_p0 = scmp.lt.u32.totalorder %s2885_s29, %s741_s20 }
 0x37b   : >> { %p2887_p13 = pnand %p2886_p9, %p3728_p6  ;;  %p2892_p10 = por %p2891_p7, %p2890_p5 }
 0x37d   : >> { %p2888_p1 = pneg %p2887_p13  ;;  %p2894_p11 = por %p2893_p0, %p2892_p10 }
 0x37f   : >> { %p2895_p2 = pnand %p2894_p11, %p2888_p1 }
 0x381   : >> { %2898 = shalt.err (!%p2895_p2)  }
 0x382   : >> { %s2899_s12 = scalar_lea.vmem %s752_s22, 16  ;;  %p2906_p12 = scmp.lt.s32.totalorder %s752_s22, %s3163_s13 }
 0x383   : >> { %p2900_p3 = scmp.ne.s32.totalorder %s752_s22, %s2899_s12  ;;  %p2907_p9 = scmp.lt.s32.totalorder %s3187_s16, %s2899_s12 }
 0x385   : >> { %p2901_p4 = pnand %p2900_p3, %p3728_p6  ;;  %p2908_p13 = por %p2907_p9, %p2906_p12 }
 0x387   : >> { %p2902_p8 = pneg %p2901_p4 }
 0x389   : >> { %p2909_p5 = pnand %p2908_p13, %p2902_p8 }
 0x38b   : >> { %2912 = shalt.err (!%p2909_p5)  }
 0x38c   : >> { %1805 = dma.hbm_to_vmem [thread:$0]  (%p3728_p6), %s741_s20, 16, %s752_s22, %s3760_s19 }
 0x38d   : >> { %s668_s27 = sadd.s32 1, %s2991_s27  }
 0x38e   : >> { %p665_p1 = scmp.ge.s32.totalorder %s668_s27, 32  }
 0x38f   : > { %v1899_v0 = vld [vmem:[#allocation6 + $0x84] ss:$8 sps:$4 sm:$0xff] (%p665_p1)   ;;  %v3029_v2 = vmov (%p665_p1), 0   ;;  %v1903_v3 = vld [vmem:[#allocation6 + $0x80] ss:$8 sps:$4 sm:$0xff] (%p665_p1)   ;;  %v779_v51 = vld [vmem:[#allocation2 + $0x30] sm:$0xff] (%p665_p1) }
 0x390   : > { %667 = sbr.rel (!%p665_p1) target bundleno = 794 (0x31a), region = 307  ;;  %v1901_v1 = vld [vmem:[#allocation6 + $0x104] ss:$8 sps:$4 sm:$0xff] (%p665_p1)   ;;  %911 = vmatprep.mubr.bf16.mxu1 (%p665_p1), %v3029_v2  ;;  %1199 = vmatprep.mubr.bf16.mxu0 (%p665_p1), %v3029_v2  ;;  %v1904_v4 = vld [vmem:[#allocation6 + $0x100] ss:$8 sps:$4 sm:$0xff] (%p665_p1)   ;;  %v780_v52 = vld [vmem:[#allocation2 + $0x38] sm:$0xff] (%p665_p1) }
 0x391   : > { %879 = vmatprep.subr.bf16.mxu1 (%p665_p1), %v1899_v0  ;;  %1167 = vmatprep.subr.bf16.mxu0 (%p665_p1), %v1901_v1  ;;  %v1905_v5 = vld [vmem:[#allocation6 + $0x94] ss:$8 sps:$4 sm:$0xff] (%p665_p1)   ;;  %v1909_v7 = vld [vmem:[#allocation6 + $0x90] ss:$8 sps:$4 sm:$0xff] (%p665_p1)   ;;  %v1911_v9 = vld [vmem:[#allocation6 + $0xa4] ss:$8 sps:$4 sm:$0xff] (%p665_p1)   ;;  %v782_v55 = vpack.c.bf16 (%p665_p1), %v780_v52, %v779_v51 }
 0x392   : > { %880 = vmatpush1.bf16.msra.mxu1 (%p665_p1), %v1903_v3  ;;  %1168 = vmatpush1.bf16.msra.mxu0 (%p665_p1), %v1904_v4  ;;  %v1907_v6 = vld [vmem:[#allocation6 + $0x114] ss:$8 sps:$4 sm:$0xff] (%p665_p1)   ;;  %v1910_v8 = vld [vmem:[#allocation6 + $0x110] ss:$8 sps:$4 sm:$0xff] (%p665_p1)   ;;  %v1913_v10 = vld [vmem:[#allocation6 + $0x124] ss:$8 sps:$4 sm:$0xff] (%p665_p1)  }
 0x393   : > { %881 = vmatprep.subr.bf16.mxu1 (%p665_p1), %v1905_v5  ;;  %1169 = vmatprep.subr.bf16.mxu0 (%p665_p1), %v1907_v6  ;;  %v1915_v11 = vld [vmem:[#allocation6 + $0xa0] ss:$8 sps:$4 sm:$0xff] (%p665_p1)   ;;  %v1917_v13 = vld [vmem:[#allocation6 + $0xb4] ss:$8 sps:$4 sm:$0xff] (%p665_p1)   ;;  %v1921_v15 = vld [vmem:[#allocation6 + $0xb0] ss:$8 sps:$4 sm:$0xff] (%p665_p1)  }
 0x394   : > { %v1916_v12 = vld [vmem:[#allocation6 + $0x120] ss:$8 sps:$4 sm:$0xff] (%p665_p1)   ;;  %v1919_v14 = vld [vmem:[#allocation6 + $0x134] ss:$8 sps:$4 sm:$0xff] (%p665_p1)   ;;  %v1922_v16 = vld [vmem:[#allocation6 + $0x130] ss:$8 sps:$4 sm:$0xff] (%p665_p1)  }
 0x395   : > { %v1923_v17 = vld [vmem:[#allocation6 + $0xc4] ss:$8 sps:$4 sm:$0xff] (%p665_p1)   ;;  %v1927_v19 = vld [vmem:[#allocation6 + $0xc0] ss:$8 sps:$4 sm:$0xff] (%p665_p1)   ;;  %v1929_v21 = vld [vmem:[#allocation6 + $0xd4] ss:$8 sps:$4 sm:$0xff] (%p665_p1)  }
 0x396   : > { %882 = vmatpush1.bf16.msra.mxu1 (%p665_p1), %v1909_v7  ;;  %1170 = vmatpush1.bf16.msra.mxu0 (%p665_p1), %v1910_v8  ;;  %v1925_v18 = vld [vmem:[#allocation6 + $0x144] ss:$8 sps:$4 sm:$0xff] (%p665_p1)   ;;  %v1928_v20 = vld [vmem:[#allocation6 + $0x140] ss:$8 sps:$4 sm:$0xff] (%p665_p1)   ;;  %v1931_v22 = vld [vmem:[#allocation6 + $0x154] ss:$8 sps:$4 sm:$0xff] (%p665_p1)  }
 0x397   : > { %883 = vmatprep.subr.bf16.mxu1 %v1911_v9  ;;  %1171 = vmatprep.subr.bf16.mxu0 %v1913_v10  ;;  %v1933_v23 = vld [vmem:[#allocation6 + $0xd0] ss:$8 sps:$4 sm:$0xff]   ;;  %v1935_v25 = vld [vmem:[#allocation6 + $0xe4] ss:$8 sps:$4 sm:$0xff]   ;;  %v1939_v27 = vld [vmem:[#allocation6 + $0xe0] ss:$8 sps:$4 sm:$0xff]  }
 0x398   : > { %v1934_v24 = vld [vmem:[#allocation6 + $0x150] ss:$8 sps:$4 sm:$0xff]   ;;  %v1937_v26 = vld [vmem:[#allocation6 + $0x164] ss:$8 sps:$4 sm:$0xff]   ;;  %v1940_v28 = vld [vmem:[#allocation6 + $0x160] ss:$8 sps:$4 sm:$0xff]  }
 0x399   : > { %v1941_v29 = vld [vmem:[#allocation6 + $0xf4] ss:$8 sps:$4 sm:$0xff]   ;;  %v1945_v31 = vld [vmem:[#allocation6 + $0xf0] ss:$8 sps:$4 sm:$0xff]   ;;  %v777_v33 = vld [vmem:[#allocation2 + $0x20] sm:$0xff]  ;;  %s1764_s16 = sshll.u32 %s3091_s0, 10 }
 0x39a   : > { %884 = vmatpush1.bf16.msra.mxu1 %v1915_v11  ;;  %1172 = vmatpush1.bf16.msra.mxu0 %v1916_v12  ;;  %v1943_v30 = vld [vmem:[#allocation6 + $0x174] ss:$8 sps:$4 sm:$0xff]   ;;  %v1946_v32 = vld [vmem:[#allocation6 + $0x170] ss:$8 sps:$4 sm:$0xff]   ;;  %v1949_v34 = vld [vmem:[#allocation6 + $0x4] ss:$8 sps:$4 sm:$0xff]   ;;  %s3870_s25 = scalar_lea.hbm %s3924_s4, %s1764_s16 }
 0x39b   : > { %885 = vmatprep.subr.bf16.mxu1 %v1917_v13  ;;  %1173 = vmatprep.subr.bf16.mxu0 %v1919_v14  ;;  %v778_v35 = vld [vmem:[#allocation2 + $0x28] sm:$0xff]  ;;  %v1065_v36 = vld [vmem:[#allocation2 + $0x40] sm:$0xff]  ;;  %v1955_v43 = vld [vmem:[#allocation6 + $0x14] ss:$8 sps:$4 sm:$0xff]   ;;  %s1434_s27 = sshll.u32 %s3718_s18, 4  ;;  %s3954_s0 = sand.u32 1, %s2979_s26   ;;  %s3872_s27 = int_to_ptr.vmem [resolvable:$true] %s1434_s27 }
 0x39c   : > { %v1066_v37 = vld [vmem:[#allocation2 + $0x48] sm:$0xff]  ;;  %v781_v41 = vpack.c.bf16 %v778_v35, %v777_v33  ;;  %v1958_v44 = vld [vmem:[#allocation6 + $0x194] ss:$8 sps:$4 sm:$0xff]   ;;  %v1953_v45 = vld [vmem:[#allocation6 + $0x10] ss:$8 sps:$4 sm:$0xff]   ;;  %s3879_s28 = scalar_lea.sflag [#allocation8], %s3954_s0 }
 0x39d   : > { %v1952_v38 = vld [vmem:[#allocation6 + $0x184] ss:$8 sps:$4 sm:$0xff]   ;;  %v1947_v39 = vld [vmem:[#allocation6] ss:$8 sps:$4 sm:$0xff]   ;;  %v1069_v42 = vpack.c.bf16 %v1066_v37, %v1065_v36  ;;  %v1956_v46 = vld [vmem:[#allocation6 + $0x190] ss:$8 sps:$4 sm:$0xff]  }
 0x39e   : > { %886 = vmatpush1.bf16.msra.mxu1 %v1921_v15  ;;  %1174 = vmatpush1.bf16.msra.mxu0 %v1922_v16  ;;  %v1950_v40 = vld [vmem:[#allocation6 + $0x180] ss:$8 sps:$4 sm:$0xff]   ;;  %v1961_v47 = vld [vmem:[#allocation6 + $0x24] ss:$8 sps:$4 sm:$0xff]   ;;  %v1967_v53 = vld [vmem:[#allocation6 + $0x34] ss:$8 sps:$4 sm:$0xff]  }
 0x39f   : > { %887 = vmatprep.subr.bf16.mxu1 %v1923_v17  ;;  %1175 = vmatprep.subr.bf16.mxu0 %v1925_v18  ;;  %v1964_v48 = vld [vmem:[#allocation6 + $0x1a4] ss:$8 sps:$4 sm:$0xff]   ;;  %v1959_v49 = vld [vmem:[#allocation6 + $0x20] ss:$8 sps:$4 sm:$0xff]   ;;  %v1970_v54 = vld [vmem:[#allocation6 + $0x1b4] ss:$8 sps:$4 sm:$0xff]  }
 0x3a0   : > { %v1962_v50 = vld [vmem:[#allocation6 + $0x1a0] ss:$8 sps:$4 sm:$0xff]   ;;  %v1067_v56 = vld [vmem:[#allocation2 + $0x50] sm:$0xff]  ;;  %v1068_v57 = vld [vmem:[#allocation2 + $0x58] sm:$0xff]  ;;  %s2913_s30 = scalar_lea.vmem %s3872_s27, 1024  ;;  %p3955_p7 = scmp.ne.s32.totalorder %s3942_s8, 0 }
 0x3a1   : > { %v1070_v58 = vpack.c.bf16 %v1068_v57, %v1067_v56  ;;  %v1965_v59 = vld [vmem:[#allocation6 + $0x30] ss:$8 sps:$4 sm:$0xff]   ;;  %v1973_v61 = vld [vmem:[#allocation6 + $0x44] ss:$8 sps:$4 sm:$0xff]   ;;  %v1971_v63 = vld [vmem:[#allocation6 + $0x40] ss:$8 sps:$4 sm:$0xff]   ;;  %p2914_p6 = scmp.ne.s32.totalorder %s3872_s27, %s2913_s30 }
 0x3a2   : > { %888 = vmatpush1.bf16.msra.mxu1 %v1927_v19  ;;  %1176 = vmatpush1.bf16.msra.mxu0 %v1928_v20  ;;  %v1968_v60 = vld [vmem:[#allocation6 + $0x1b0] ss:$8 sps:$4 sm:$0xff]   ;;  %v1976_v62 = vld [vmem:[#allocation6 + $0x1c4] ss:$8 sps:$4 sm:$0xff]   ;;  %v1974_v0 = vld [vmem:[#allocation6 + $0x1c0] ss:$8 sps:$4 sm:$0xff]  }
 0x3a3   : > { %889 = vmatprep.subr.bf16.mxu1 %v1929_v21  ;;  %1177 = vmatprep.subr.bf16.mxu0 %v1931_v22  ;;  %v1979_v1 = vld [vmem:[#allocation6 + $0x54] ss:$8 sps:$4 sm:$0xff]   ;;  %v1977_v4 = vld [vmem:[#allocation6 + $0x50] ss:$8 sps:$4 sm:$0xff]   ;;  %v1985_v6 = vld [vmem:[#allocation6 + $0x64] ss:$8 sps:$4 sm:$0xff]   ;;  %p2915_p10 = pnand %p2914_p6, %p3955_p7 }
 0x3a4   : > { %v1982_v3 = vld [vmem:[#allocation6 + $0x1d4] ss:$8 sps:$4 sm:$0xff]   ;;  %v1980_v5 = vld [vmem:[#allocation6 + $0x1d0] ss:$8 sps:$4 sm:$0xff]   ;;  %v1988_v7 = vld [vmem:[#allocation6 + $0x1e4] ss:$8 sps:$4 sm:$0xff]  }
 0x3a5   : > { %v1983_v8 = vld [vmem:[#allocation6 + $0x60] ss:$8 sps:$4 sm:$0xff]   ;;  %v1991_v10 = vld [vmem:[#allocation6 + $0x74] ss:$8 sps:$4 sm:$0xff]   ;;  %v1989_v12 = vld [vmem:[#allocation6 + $0x70] ss:$8 sps:$4 sm:$0xff]   ;;  %p2916_p0 = pneg %p2915_p10 }
 0x3a6   : > { %890 = vmatpush1.bf16.msra.mxu1 %v1933_v23  ;;  %1178 = vmatpush1.bf16.msra.mxu0 %v1934_v24  ;;  %v1986_v9 = vld [vmem:[#allocation6 + $0x1e0] ss:$8 sps:$4 sm:$0xff]   ;;  %v1994_v11 = vld [vmem:[#allocation6 + $0x1f4] ss:$8 sps:$4 sm:$0xff]   ;;  %v1992_v13 = vld [vmem:[#allocation6 + $0x1f0] ss:$8 sps:$4 sm:$0xff]  }
 0x3a7   : > { %891 = vmatprep.subr.bf16.mxu1 %v1935_v25  ;;  %1179 = vmatprep.subr.bf16.mxu0 %v1937_v26  ;;  %v755_v14 = vld [vmem:[#allocation2] sm:$0xff]  ;;  %v756_v15 = vld [vmem:[#allocation2 + $0x8] sm:$0xff]  ;;  %v757_v20 = vld [vmem:[#allocation2 + $0x10] sm:$0xff]  ;;  %v1393_v26 = vlaneseq  ;;  %s3030_s23 = smov [#allocation9]  }
 0x3a8   : > { %v1228_v16 = vld [vmem:[#allocation2 + $0x60] sm:$0xff]  ;;  %v1229_v17 = vld [vmem:[#allocation2 + $0x68] sm:$0xff]  ;;  %v759_v18 = vpack.c.bf16 %v756_v15, %v755_v14  ;;  %v758_v21 = vld [vmem:[#allocation2 + $0x18] sm:$0xff]  ;;  %s2917_s17 = sshll.u32 %s3030_s23, 4  ;;  %s2918_s17 = int_to_ptr.vmem [resolvable:$false] %s2917_s17 }
 0x3a9   : > { %v1232_v19 = vpack.c.bf16 %v1229_v17, %v1228_v16  ;;  %v1230_v22 = vld [vmem:[#allocation2 + $0x70] sm:$0xff]  ;;  %v1231_v23 = vld [vmem:[#allocation2 + $0x78] sm:$0xff]  ;;  %v760_v24 = vpack.c.bf16 %v758_v21, %v757_v20  ;;  %s2919_s22 = scalar_lea.vmem %s2918_s17, 2048  ;;  %p2920_p11 = scmp.lt.s32.totalorder %s3872_s27, %s2918_s17 }
 0x3aa   : > { %892 = vmatpush1.bf16.msra.mxu1 %v1939_v27  ;;  %1180 = vmatpush1.bf16.msra.mxu0 %v1940_v28  ;;  %v1233_v25 = vpack.c.bf16 %v1231_v23, %v1230_v22  ;;  %v1394_v27 = vshrl.u32 %v1393_v26, 7  ;;  %p2921_p2 = scmp.lt.s32.totalorder %s2919_s22, %s2913_s30 }
 0x3ab   : > { %893 = vmatprep.subr.bf16.mxu1 %v1941_v29  ;;  %1181 = vmatprep.subr.bf16.mxu0 %v1943_v30  ;;  %v1391_v29 = vld [vmem:[%s3922_s2] sm:$0x3] }
 0x3ac   : > { %v1395_v28 = vsub.s32 0, %v1394_v27  ;;  %v1399_v30 = vsub.s32 1, %v1394_v27  ;;  %p2922_p3 = por %p2921_p2, %p2920_p11 }
 0x3ae   : > { %894 = vmatpush1.bf16.msra.mxu1 %v1945_v31  ;;  %1182 = vmatpush1.bf16.msra.mxu0 %v1946_v32  ;;  %v1396_v31 = vrot.slane %v1391_v29, %v1395_v28  ;;  %p2923_p4 = pnand %p2922_p3, %p2916_p0 }
 0x3af   : > { %1012 = vmatprep.subr.bf16.mxu1 %v1949_v34  ;;  %1330 = vmatprep.subr.bf16.mxu0 %v1952_v38 }
 0x3b1   : > { %912 = vmatmul.mubr.bf16.vlgmr.msra.gmra.mrb[0].mxu1 %v781_v41  ;;  %1200 = vmatmul.mubr.bf16.vlgmr.msra.gmra.mrb[0].mxu0 %v1069_v42 }
 0x3b2   : > { %1013 = vmatpush1.bf16.msra.mxu1 %v1947_v39  ;;  %1331 = vmatpush1.bf16.msra.mxu0 %v1950_v40 }
 0x3b3   : > { %1014 = vmatprep.subr.bf16.mxu1 %v1955_v43  ;;  %1332 = vmatprep.subr.bf16.mxu0 %v1958_v44 }
 0x3b4   : > { %921 = vmatprep.mubr.bf16.mxu1 %v3029_v2  ;;  %1209 = vmatprep.mubr.bf16.mxu0 %v3029_v2 }
 0x3b6   : > { %1015 = vmatpush1.bf16.msra.mxu1 %v1953_v45  ;;  %1333 = vmatpush1.bf16.msra.mxu0 %v1956_v46 }
 0x3b7   : > { %1016 = vmatprep.subr.bf16.mxu1 %v1961_v47  ;;  %1334 = vmatprep.subr.bf16.mxu0 %v1964_v48 }
 0x3b9   : > { %922 = vmatmul.mubr.bf16.gmra.mrb[4].mxu1 %v782_v55  ;;  %1210 = vmatmul.mubr.bf16.gmra.mrb[4].mxu0 %v1070_v58 }
 0x3ba   : > { %1017 = vmatpush1.bf16.msra.mxu1 %v1959_v49  ;;  %1335 = vmatpush1.bf16.msra.mxu0 %v1962_v50 }
 0x3bb   : > { %1018 = vmatprep.subr.bf16.mxu1 %v1967_v53  ;;  %1336 = vmatprep.subr.bf16.mxu0 %v1970_v54 }
 0x3bc   : > { %1044 = vmatprep.mubr.bf16.mxu1 %v3029_v2  ;;  %1362 = vmatprep.mubr.bf16.mxu0 %v3029_v2 }
 0x3be   : > { %1019 = vmatpush1.bf16.msra.mxu1 %v1965_v59  ;;  %1337 = vmatpush1.bf16.msra.mxu0 %v1968_v60 }
 0x3bf   : > { %1020 = vmatprep.subr.bf16.mxu1 %v1973_v61  ;;  %1338 = vmatprep.subr.bf16.mxu0 %v1976_v62 }
 0x3c2   : > { %1021 = vmatpush1.bf16.msra.mxu1 %v1971_v63  ;;  %1339 = vmatpush1.bf16.msra.mxu0 %v1974_v0 }
 0x3c3   : > { %1022 = vmatprep.subr.bf16.mxu1 %v1979_v1  ;;  %1340 = vmatprep.subr.bf16.mxu0 %v1982_v3 }
 0x3c6   : > { %1023 = vmatpush1.bf16.msra.mxu1 %v1977_v4  ;;  %1341 = vmatpush1.bf16.msra.mxu0 %v1980_v5 }
 0x3c7   : > { %1024 = vmatprep.subr.bf16.mxu1 %v1985_v6  ;;  %1342 = vmatprep.subr.bf16.mxu0 %v1988_v7 }
 0x3ca   : > { %1025 = vmatpush1.bf16.msra.mxu1 %v1983_v8  ;;  %1343 = vmatpush1.bf16.msra.mxu0 %v1986_v9 }
 0x3cb   : > { %1026 = vmatprep.subr.bf16.mxu1 %v1991_v10  ;;  %1344 = vmatprep.subr.bf16.mxu0 %v1994_v11 }
 0x3ce   : > { %1027 = vmatpush1.bf16.msra.mxu1 %v1989_v12  ;;  %1345 = vmatpush1.bf16.msra.mxu0 %v1992_v13 }
 0x3d1   : > { %1045 = vmatmul.mubr.bf16.vlgmr.msra.gmra.mrb[0].mxu1 %v759_v18  ;;  %1363 = vmatmul.mubr.bf16.vlgmr.msra.gmra.mrb[0].mxu0 %v1232_v19 }
 0x3d2   : > { %1054 = vmatprep.mubr.bf16.mxu1 %v3029_v2  ;;  %1372 = vmatprep.mubr.bf16.mxu0 %v3029_v2  ;;  %v1400_v2 = vrot.slane %v1391_v29, %v1399_v30 }
 0x3d9   : > { %1055 = vmatmul.mubr.bf16.gmra.mrb[4].mxu1 %v760_v24  ;;  %1373 = vmatmul.mubr.bf16.gmra.mrb[4].mxu0 %v1233_v25 }
 0x4a4   : > { %v1046_v32 = vpop.f32.mrb[0].mxu1  ;;  %v1364_v33 = vpop.f32.mrb[0].mxu0 }
 0x4a5   : > { %v1765_v34 = vadd.f32 %v1364_v33, %v1046_v32  ;;  %v1048_v35 = vpop.f32.mrb[1].mxu1  ;;  %v1366_v36 = vpop.f32.mrb[1].mxu0 }
 0x4a6   : > { %v1766_v37 = vadd.f32 %v1366_v36, %v1048_v35  ;;  %v1050_v38 = vpop.f32.mrb[2].mxu1  ;;  %v1368_v39 = vpop.f32.mrb[2].mxu0 }
 0x4a7   : > { %v1403_v40 = vadd.f32 %v1765_v34, %v1396_v31  ;;  %v1767_v41 = vadd.f32 %v1368_v39, %v1050_v38  ;;  %v1052_v42 = vpop.f32.mrb[3].mxu1  ;;  %v1370_v43 = vpop.f32.mrb[3].mxu0 }
 0x4a8   : > { %v1404_v44 = vadd.f32 %v1766_v37, %v1400_v2  ;;  %v1768_v45 = vadd.f32 %v1370_v43, %v1052_v42 }
 0x4a9   : > { %1411 = vst [vmem:[%s3718_s18] sm:$0xff] %v1403_v40  ;;  %v1405_v46 = vadd.f32 %v1767_v41, %v1396_v31 }
 0x4aa   : > { %1412 = vst [vmem:[%s3718_s18 + $0x8] sm:$0xff] %v1404_v44  ;;  %v1406_v47 = vadd.f32 %v1768_v45, %v1400_v2 }
 0x4ab   : > { %1413 = vst [vmem:[%s3718_s18 + $0x10] sm:$0xff] %v1405_v46 }
 0x4ac   : > { %1414 = vst [vmem:[%s3718_s18 + $0x18] sm:$0xff] %v1406_v47  ;;  %v1056_v48 = vpop.f32.mrb[4].mxu1  ;;  %v1374_v49 = vpop.f32.mrb[4].mxu0 }
 0x4ad   : > { %v1769_v50 = vadd.f32 %v1374_v49, %v1056_v48  ;;  %v1058_v51 = vpop.f32.mrb[5].mxu1  ;;  %v1376_v52 = vpop.f32.mrb[5].mxu0 }
 0x4ae   : > { %v1770_v53 = vadd.f32 %v1376_v52, %v1058_v51  ;;  %v1060_v54 = vpop.f32.mrb[6].mxu1  ;;  %v1378_v55 = vpop.f32.mrb[6].mxu0 }
 0x4af   : > { %v1407_v56 = vadd.f32 %v1769_v50, %v1396_v31  ;;  %v1771_v57 = vadd.f32 %v1378_v55, %v1060_v54  ;;  %v1062_v58 = vpop.f32.mrb[7].mxu1  ;;  %v1380_v59 = vpop.f32.mrb[7].mxu0 }
 0x4b0   : > { %v1408_v60 = vadd.f32 %v1770_v53, %v1400_v2  ;;  %v1772_v61 = vadd.f32 %v1380_v59, %v1062_v58 }
 0x4b1   : > { %1415 = vst [vmem:[%s3718_s18 + $0x20] sm:$0xff] %v1407_v56  ;;  %v1409_v62 = vadd.f32 %v1771_v57, %v1396_v31 }
 0x4b2   : > { %1416 = vst [vmem:[%s3718_s18 + $0x28] sm:$0xff] %v1408_v60  ;;  %v1410_v63 = vadd.f32 %v1772_v61, %v1400_v2 }
 0x4b3   : > { %1417 = vst [vmem:[%s3718_s18 + $0x30] sm:$0xff] %v1409_v62 }
 0x4b4   : > { %1418 = vst [vmem:[%s3718_s18 + $0x38] sm:$0xff] %v1410_v63 }
 0x4b5   : > { %2926 = shalt.err (!%p2923_p4)
}
 0x4b6   : > { %s2927_s18 = scalar_lea.hbm %s3870_s25, 1024  ;;  %s2931_s15 = scalar_lea.hbm %s3924_s4, 4096 }
 0x4b7   : > { %p2928_p8 = scmp.ne.s32.totalorder %s3870_s25, %s2927_s18  ;;  %p2932_p13 = scmp.lt.u32.totalorder %s3870_s25, %s3924_s4 }
 0x4b8   : > { %p2933_p5 = scmp.lt.u32.totalorder %s2931_s15, %s2927_s18  ;;  %p2935_p6 = scmp.lt.u32.totalorder %s2927_s18, %s3870_s25 }
 0x4b9   : > { %p2929_p12 = pnand %p2928_p8, %p3955_p7 }
 0x4ba   : > { %p2934_p1 = por %p2933_p5, %p2932_p13 }
 0x4bb   : > { %p2930_p9 = pneg %p2929_p12 }
 0x4bc   : > { %p2936_p10 = por %p2935_p6, %p2934_p1 }
 0x4be   : > { %p2937_p0 = pnand %p2936_p10, %p2930_p9 }
 0x4c0   : > { %2940 = shalt.err (!%p2937_p0)
}
 0x4c1   : > { %s3031_s21 = smov 256   ;;  %s3032_s14 = smov 16  }
 0x4c2   : > { %1806 = dma.vmem_to_hbm [thread:$0]  (%p3955_p7), %s3872_s27, 1024, %s3870_s25, %s3879_s28, %s3031_s21, %s3031_s21, %s3032_s14  }
 0x4c3 PF: > { %s3956_s20 = sld [smem:[#allocation94_spill]]  ;;  %s3957_s29 = sld [smem:[#allocation92_spill]] }
 0x4c4   : > { %s3958_s7 = sld [smem:[#allocation97_spill]] }
 0x4c9   : > { %p1819_p11 = scmp.ge.s32.totalorder %s3956_s20, 2  ;;  %s1449_s9 = sand.u32 1, %s3957_s29  }
 0x4ca   : > { %p3959_p2 = scmp.ne.s32.totalorder %s3958_s7, 0  ;;  %s1450_s12 = scalar_lea.sflag [#allocation8], %s1449_s9 }
 0x4cc   : > { %p1813_p3 = pnand %p1819_p11, %p3959_p2 }
 0x4ce   : > { %2970 = dma.done.wait (!%p1813_p3), %s1450_s12, 1024  }
 0x4cf   : > { %2972 = vsyncadd (!%p1813_p3), %s1450_s12, 4294966272  ;;  %s3960_s28 = sld [smem:[#allocation95_spill]]  ;;  %s3961_s5 = sld [smem:[#allocation93_spill]] }
 0x4d0   : > { %s3962_s27 = sld [smem:[#allocation96_spill]]  ;;  %s3963_s25 = smov %s2979_s26 }
 0x4d5   : > { %p19_p4 = scmp.ge.s32.totalorder %s3960_s28, 6   ;;  %s3964_s26 = smov %s3961_s5 }
 0x4d7   :  { %21 = sbr.rel (!%p19_p4) target bundleno = 16 (0x10), region = 318 }
 0x4de   :  { %1455 = vsyncpa [#allocation7], 1 }
 0x4df   :  { %1457 = vsyncpa [#allocation7 + $0x1], 1 }
 0x4e0   :  { %1458 = vsyncpa [#allocation8], 1 }
 0x4e1   :  { %1460 = vsyncpa [#allocation8 + $0x1], 1 }
 0x4e2   :  { %1461 = vsyncmov [#allocation3] }
 0x4e5   :  { %s1462_s8 = vpop.sfrf %1461 }
 0x4e6   :  { %p1753_p7 = scmp.ne.s32.totalorder %s1462_s8, 0 }
 0x4e8   :  { %1466 = shalt.err (%p1753_p7)  }
 0x4e9   :  { %1468 = vsyncmov [#allocation3 + $0x1] }
 0x4ec   :  { %s1469_s13 = vpop.sfrf %1468 }
 0x4ed   :  { %p1754_p8 = scmp.ne.s32.totalorder %s1469_s13, 0 }
 0x4ef   :  { %1473 = shalt.err (%p1754_p8)  }
 0x4f0   :  { %1475 = vsyncmov [#allocation3 + $0x2] }
 0x4f3   :  { %s1476_s16 = vpop.sfrf %1475 }
 0x4f4   :  { %p1755_p12 = scmp.ne.s32.totalorder %s1476_s16, 0 }
 0x4f6   :  { %1480 = shalt.err (%p1755_p12)  }
 0x4f7   :  { %1482 = vsyncmov [#allocation3 + $0x3] }
 0x4fa   :  { %s1483_s11 = vpop.sfrf %1482 }
 0x4fb   :  { %p1756_p9 = scmp.ne.s32.totalorder %s1483_s11, 0 }
 0x4fd   :  { %1487 = shalt.err (%p1756_p9)  }
 0x4fe   :  { %1489 = vsyncmov [#allocation3 + $0x4] }
 0x501   :  { %s1490_s2 = vpop.sfrf %1489 }
 0x502   :  { %p1757_p13 = scmp.ne.s32.totalorder %s1490_s2, 0 }
 0x504   :  { %1494 = shalt.err (%p1757_p13)  }
 0x505   :  { %1496 = vsyncmov [#allocation3 + $0x5] }
 0x508   :  { %s1497_s3 = vpop.sfrf %1496 }
 0x509   :  { %p1758_p5 = scmp.ne.s32.totalorder %s1497_s3, 0 }
 0x50b   :  { %1501 = shalt.err (%p1758_p5)  }
 0x50c   :  { %1503 = vsyncmov [#allocation3 + $0x6] }
 0x50f   :  { %s1504_s4 = vpop.sfrf %1503 }
 0x510   :  { %p1759_p1 = scmp.ne.s32.totalorder %s1504_s4, 0 }
 0x512   :  { %1508 = shalt.err (%p1759_p1)  }
 0x513   :  { %1510 = vsyncmov [#allocation3 + $0x7] }
 0x516   :  { %s1511_s26 = vpop.sfrf %1510 }
 0x517   :  { %p1760_p6 = scmp.ne.s32.totalorder %s1511_s26, 0 }
 0x519   :  { %1515 = shalt.err (%p1760_p6)  }

</bundles_post_ra>
